<compile_context>
chip_gen: v5e
topology: v5e:2x2
jax: 0.10.0
libtpu: 0.0.40
codegen_flags: <defaults>
</compile_context>

<pallas_src>
import numpy as np
import jax
import jax.numpy as jnp
from jax.experimental import pallas as pl
from jax.experimental.pallas import tpu as pltpu

NB = 8          # images per grid step (MUST be a multiple of 8: sublane align)
EPS = 1e-5      # BatchNorm2d default eps


# ------------------------- kernel 1: conv1+pool+conv2 -----------------------
def conv_kernel(x_ref, B1_ref, B2_ref, y2_ref, st_ref):
    """Per batch tile: conv1 -> maxpool -> conv2 (pre-BN) + per-tile BN sums.

    x_ref : (28*NB, 28) f32; row = m*7*NB + i4*NB + n for image row y = 4*i4+m.
    B1_ref: (28, 1280) bf16 banded conv1 weights; lane = ki*256+dx*128+jp*10+c.
    B2_ref: (120, 1280) bf16 banded conv2 weights; lane = ki*256+dx*128+jp*20+c2.
    y2_ref: (8*NB, 256) f32 pre-BN conv2 output; row = dy*4*NB + ii*NB + n,
            lane = dx*128 + jp*20 + c2 (lanes 80..127 of each half are zero pad).
    st_ref: (2, 256) f32 per-tile (sum, sum-of-squares) over rows, per lane.
    """
    f32 = jnp.float32
    bf16 = jnp.bfloat16

    # ---- Stage A: Conv2d(1,10,5) + MaxPool2d(2) ----------------------------
    xr = x_ref[...].astype(bf16)                                    # (28NB, 28)
    Z1 = jnp.dot(xr, B1_ref[...], preferred_element_type=f32)       # (28NB, 1280)

    h1_blocks = []
    for q in range(2):                        # parity of the pooled output row
        win = []
        for dy in range(2):                   # pool-row phase
            acc = None
            for ki in range(5):               # conv height tap
                t = 2 * q + dy + ki
                m, o = t % 4, t // 4
                r0 = m * 7 * NB + o * NB      # multiple of 8 -> aligned slice
                sl = Z1[r0:r0 + 6 * NB, ki * 256:(ki + 1) * 256]
                acc = sl if acc is None else acc + sl
            win.append(acc)                                   # (6NB, 256)
        w = jnp.maximum(win[0], win[1])                       # max over pool rows
        hq = jnp.maximum(w[:, 0:120], w[:, 128:248])          # max over pool cols
        h1_blocks.append(hq)              # conv1 bias dropped (absorbed by BN)
    # rows: q*6NB + i2*NB + n ; lanes: jp*10 + c
    h1 = jnp.concatenate(h1_blocks, axis=0)                   # (12NB, 120)

    # ---- Stage B: Conv2d(10,20,5), pre-BatchNorm ---------------------------
    Z2 = jnp.dot(h1.astype(bf16), B2_ref[...],
                 preferred_element_type=f32)                  # (12NB, 1280)
    wins = []
    for dy in range(2):                       # pool-row phase of conv2 output
        acc = None
        for ki in range(5):
            t = dy + ki
            q, o = t % 2, t // 2
            r0 = q * 6 * NB + o * NB          # multiple of 8 -> aligned slice
            sl = Z2[r0:r0 + 4 * NB, ki * 256:(ki + 1) * 256]
            acc = sl if acc is None else acc + sl
        wins.append(acc)                                       # (4NB, 256)
    # conv2 bias omitted: absorbed exactly by the training-mode BN batch mean.
    Y2 = jnp.concatenate(wins, axis=0)                         # (8NB, 256)
    y2_ref[...] = Y2

    # Per-tile partial BatchNorm statistics (cross-tile combine in wrapper).
    s_lane = jnp.sum(Y2, axis=0, keepdims=True)                # (1, 256)
    q_lane = jnp.sum(Y2 * Y2, axis=0, keepdims=True)           # (1, 256)
    st_ref[...] = jnp.concatenate([s_lane, q_lane], axis=0)    # (2, 256)


# ---------------- kernel 2: BN + pool + ReLU + MLP + softmax ----------------
def bn_fc_kernel(y2_ref, sc_ref, sh_ref, W1_ref, bf1_ref, W2_ref, bf2_ref,
                 o_ref):
    f32 = jnp.float32
    Y2 = y2_ref[...]                                           # (8NB, 256)
    Ybn = Y2 * sc_ref[...] + sh_ref[...]                       # BN (batch stats)

    A = jnp.maximum(Ybn[0:4 * NB, :], Ybn[4 * NB:8 * NB, :])   # max over pool rows
    Pm = jnp.maximum(A[:, 0:128], A[:, 128:256])               # max over pool cols
    H2 = jnp.maximum(Pm, 0.0)                                  # ReLU, (4NB, 128)

    # Flatten (torch NCHW order is baked into W1eff's row layout).
    xf = jnp.concatenate([H2[i * NB:(i + 1) * NB, :] for i in range(4)],
                         axis=1)                               # (NB, 512)
    h = jnp.dot(xf.astype(jnp.bfloat16), W1_ref[...],
                preferred_element_type=f32) + bf1_ref[...]
    h = jnp.maximum(h, 0.0)
    logits = jnp.dot(h, W2_ref[...], preferred_element_type=f32) + bf2_ref[...]

    mrow = jnp.max(logits, axis=-1, keepdims=True)
    e = jnp.exp(logits - mrow)
    den = jnp.sum(e, axis=-1, keepdims=True)
    r = pl.reciprocal(den, approx=True)
    r = r * (2.0 - den * r)            # one Newton step -> ~f32-exact normalize
    o_ref[...] = e * r


# ------------------ one-time parameter repacking (outside jit) --------------
def prepare_params(params):
    """Repack PyTorch-layout parameters into the constant matrices consumed by
    the kernels.  Done once with numpy, outside the jitted path."""
    (w1, b1, w2, b2, g, beta, wf1, bf1, wf2, bf2) = [
        np.asarray(p, dtype=np.float32) for p in params]
    del b1, b2   # per-channel constants: absorbed exactly by train-mode BN mean

    # Conv1 banded weights: block ki (256 cols); column dx*128 + jp*10 + c
    # holds w1[c,0,ki,kj] at input-column row p = 2*jp + dx + kj.
    B1 = np.zeros((28, 5, 2, 12, 10), np.float32)
    for ki in range(5):
        for kj in range(5):
            for dx in range(2):
                for jp in range(12):
                    B1[2 * jp + dx + kj, ki, dx, jp, :] = w1[:, 0, ki, kj]
    B1 = B1.reshape(28, 5, 2, 120)
    B1 = np.concatenate([B1, np.zeros((28, 5, 2, 8), np.float32)], axis=-1)
    B1cat = B1.reshape(28, 5 * 256)

    # Conv2 banded weights: rows j1*10 + c (h1 lane layout), columns
    # dx*128 + jp*20 + c2, one 256-col block per height tap ki.
    B2 = np.zeros((12, 10, 5, 2, 4, 20), np.float32)
    for ki in range(5):
        for kj in range(5):
            for dx in range(2):
                for jp in range(4):
                    B2[2 * jp + dx + kj, :, ki, dx, jp, :] = w2[:, :, ki, kj].T
    B2 = B2.reshape(120, 5, 2, 80)
    B2 = np.concatenate([B2, np.zeros((120, 5, 2, 48), np.float32)], axis=-1)
    B2cat = B2.reshape(120, 5 * 256)

    # Linear(320,50) remapped to the kernel's (i, jp, c2) lane layout.
    wf1r = wf1.reshape(50, 20, 4, 4)                     # (k, c2, i, j)
    W1eff = np.zeros((4, 128, 50), np.float32)
    W1eff[:, :80, :] = np.transpose(wf1r, (2, 3, 1, 0)).reshape(4, 80, 50)
    W1eff = W1eff.reshape(512, 50)
    W2eff = np.ascontiguousarray(wf2.T)                  # (50, 10)

    return dict(
        B1cat=jnp.asarray(B1cat, jnp.bfloat16),          # bf16: single-pass MXU
        B2cat=jnp.asarray(B2cat, jnp.bfloat16),          #       + half the DMA
        W1eff=jnp.asarray(W1eff, jnp.bfloat16),
        W2eff=jnp.asarray(W2eff, jnp.float32),           # tiny; keep f32
        bf1=jnp.asarray(bf1.reshape(1, 50), jnp.float32),
        bf2=jnp.asarray(bf2.reshape(1, 10), jnp.float32),
        g=jnp.asarray(g, jnp.float32),
        beta=jnp.asarray(beta, jnp.float32),
    )


# ------------------------------- forward wrapper ----------------------------
def forward(prepped, x):
    N = x.shape[0]
    assert N % NB == 0, f"batch {N} must be a multiple of the batch tile {NB}"
    T = N // NB
    cparams = pltpu.CompilerParams(
        dimension_semantics=("parallel",),   # v7x: 2 TCs split the batch grid
        vmem_limit_bytes=32 * 1024 * 1024)

    # Per-tile mod-4 row regrouping (replaces the old P permutation matmul):
    # row within tile = m*7*NB + i4*NB + n, with image row y = 4*i4 + m.
    xg = (x.reshape(T, NB, 7, 4, 28)
           .transpose(0, 3, 2, 1, 4)
           .reshape(T * 28 * NB, 28))

    # ---- pass 1: conv1 + pool + conv2 (pre-BN) + per-tile BN sums ----------
    y2, st = pl.pallas_call(
        conv_kernel,
        out_shape=(jax.ShapeDtypeStruct((T * 8 * NB, 256), jnp.float32),
                   jax.ShapeDtypeStruct((2, T * 256), jnp.float32)),
        grid_spec=pltpu.PrefetchScalarGridSpec(
            num_scalar_prefetch=0, grid=(T,),
            in_specs=[
                pl.BlockSpec((28 * NB, 28), lambda b: (b, 0)),   # image tile
                pl.BlockSpec((28, 1280), lambda b: (0, 0)),      # VMEM-resident
                pl.BlockSpec((120, 1280), lambda b: (0, 0)),     # VMEM-resident
            ],
            out_specs=[
                pl.BlockSpec((8 * NB, 256), lambda b: (b, 0)),   # Y2 per tile
                pl.BlockSpec((2, 256), lambda b: (0, b)),        # partial stats
            ]),
        compiler_params=cparams,
    )(xg, prepped['B1cat'], prepped['B2cat'])

    # ---- cross-tile BatchNorm statistics combine (40 floats; XLA glue) -----
    s = (st.reshape(2, T, 2, 128)[:, :, :, :80]
           .reshape(2, T, 2, 4, 20).sum(axis=(1, 2, 3)))        # (2, 20)
    inv_cnt = 1.0 / (64.0 * N)                                  # N*8*8 / channel
    mean = s[0] * inv_cnt
    var = s[1] * inv_cnt - mean * mean                          # biased, as torch
    scale = prepped['g'] * jax.lax.rsqrt(var + EPS)
    shift = prepped['beta'] - mean * scale
    lane = jnp.arange(128)
    valid = lane < 80
    c2 = lane % 20
    sc = jnp.where(valid, scale[c2], 0.0)
    sh = jnp.where(valid, shift[c2], 0.0)
    scale_l = jnp.tile(sc, 2)[None, :]                          # (1, 256)
    shift_l = jnp.tile(sh, 2)[None, :]                          # (1, 256)

    # ---- pass 2: BN + pool + ReLU + Linear/ReLU/Linear + softmax -----------
    out = pl.pallas_call(
        bn_fc_kernel,
        out_shape=jax.ShapeDtypeStruct((N, 10), jnp.float32),
        grid_spec=pltpu.PrefetchScalarGridSpec(
            num_scalar_prefetch=0, grid=(T,),
            in_specs=[
                pl.BlockSpec((8 * NB, 256), lambda b: (b, 0)),   # Y2 tile
                pl.BlockSpec((1, 256), lambda b: (0, 0)),        # scale (resident)
                pl.BlockSpec((1, 256), lambda b: (0, 0)),        # shift (resident)
                pl.BlockSpec((512, 50), lambda b: (0, 0)),       # W1eff (resident)
                pl.BlockSpec((1, 50), lambda b: (0, 0)),
                pl.BlockSpec((50, 10), lambda b: (0, 0)),
                pl.BlockSpec((1, 10), lambda b: (0, 0)),
            ],
            out_specs=pl.BlockSpec((NB, 10), lambda b: (b, 0))),
        compiler_params=cparams,
    )(y2, scale_l, shift_l, prepped['W1eff'], prepped['bf1'],
      prepped['W2eff'], prepped['bf2'])
    return out


# --------------------------- pure-JAX reference -----------------------------
def reference_forward(params, x):
    (w1, b1, w2, b2, g, beta, wf1, bf1, wf2, bf2) = params
    dn = ('NCHW', 'OIHW', 'NCHW')
    hi = jax.lax.Precision.HIGHEST
    y = jax.lax.conv_general_dilated(x, w1, (1, 1), 'VALID',
                                     dimension_numbers=dn, precision=hi)
    y = y + b1[None, :, None, None]
    y = jax.lax.reduce_window(y, -jnp.inf, jax.lax.max,
                              (1, 1, 2, 2), (1, 1, 2, 2), 'VALID')
    y = jax.lax.conv_general_dilated(y, w2, (1, 1), 'VALID',
                                     dimension_numbers=dn, precision=hi)
    y = y + b2[None, :, None, None]
    mean = jnp.mean(y, axis=(0, 2, 3), keepdims=True)
    var = jnp.mean((y - mean) ** 2, axis=(0, 2, 3), keepdims=True)   # biased
    y = (y - mean) * jax.lax.rsqrt(var + EPS)
    y = y * g[None, :, None, None] + beta[None, :, None, None]
    y = jax.lax.reduce_window(y, -jnp.inf, jax.lax.max,
                              (1, 1, 2, 2), (1, 1, 2, 2), 'VALID')
    y = jnp.maximum(y, 0.0)
    y = y.reshape(y.shape[0], -1)                                    # NCHW flatten
    y = jnp.maximum(jnp.dot(y, wf1.T, precision=hi) + bf1, 0.0)
    y = jnp.dot(y, wf2.T, precision=hi) + bf2
    return jax.nn.softmax(y, axis=1)


if __name__ == "__main__":
    key = jax.random.PRNGKey(0)
    ks = jax.random.split(key, 11)
    # Deterministic synthetic parameters (PyTorch param shapes).
    w1 = jax.random.normal(ks[0], (10, 1, 5, 5), jnp.float32) * 0.2
    b1 = jax.random.normal(ks[1], (10,), jnp.float32) * 0.1
    b2 = jax.random.normal(ks[3], (20,), jnp.float32) * 0.1
    w2 = jax.random.normal(ks[2], (20, 10, 5, 5), jnp.float32) * 0.1
    wf1 = jax.random.normal(ks[4], (50, 320), jnp.float32) * 0.05
    bf1 = jax.random.normal(ks[5], (50,), jnp.float32) * 0.05
    wf2 = jax.random.normal(ks[6], (10, 50), jnp.float32) * 0.1
    bf2 = jax.random.normal(ks[7], (10,), jnp.float32) * 0.1
    bn_g = jax.random.normal(ks[8], (20,), jnp.float32)      # incl. negatives
    bn_b = jax.random.normal(ks[9], (20,), jnp.float32) * 0.2
    params = (w1, b1, w2, b2, bn_g, bn_b, wf1, bf1, wf2, bf2)

    NBATCH = 2 * NB   # 16 images -> grid of 2 batch tiles
    x = jax.random.normal(ks[10], (NBATCH, 1, 28, 28), jnp.float32)  # NCHW

    prepped = prepare_params(params)            # one-time, outside jit
    fwd = jax.jit(forward)
    out = jax.block_until_ready(fwd(prepped, x))

    assert out.shape == (NBATCH, 10), out.shape
    assert bool(jnp.all(jnp.isfinite(out)))
    # softmax rows must sum to ~1
    assert bool(jnp.all(jnp.abs(jnp.sum(out, axis=-1) - 1.0) < 1e-4))
    # match the pure-JAX reference of the PyTorch module (train-mode BN).
    # Tolerance 2e-2 on probabilities: kernel uses bf16 matmul operands with
    # f32 accumulation, reference runs at Precision.HIGHEST.
    ref = reference_forward(params, x)
    err = float(jnp.max(jnp.abs(out - ref)))
    assert err < 2e-2, f"max |pallas - reference| = {err}"
    print("KERNEL_OK")
</pallas_src>

<mosaic_0001>
module attributes {stable_mosaic.version = 11 : i64} {
  func.func @conv_kernel(%arg0: i32, %arg1: memref<224x28xf32, #tpu.memory_space<vmem>>, %arg2: memref<28x1280xbf16, #tpu.memory_space<vmem>>, %arg3: memref<120x1280xbf16, #tpu.memory_space<vmem>>, %arg4: memref<64x256xf32, #tpu.memory_space<vmem>>, %arg5: memref<2x256xf32, #tpu.memory_space<vmem>>) attributes {dimension_semantics = [#tpu.dimension_semantics<parallel>], iteration_bounds = array<i64: 2>, scalar_prefetch = 0 : i64, scratch_operands = 0 : i64, tpu.core_type = #tpu.core_type<tc>, window_params = [{transform_indices = @transform_0, window_bounds = array<i64: 224, 28>}, {pipeline_mode = #tpu.pipeline_mode<synchronous>, transform_indices = @transform_1, window_bounds = array<i64: 28, 1280>}, {pipeline_mode = #tpu.pipeline_mode<synchronous>, transform_indices = @transform_2, window_bounds = array<i64: 120, 1280>}, {transform_indices = @transform_3, window_bounds = array<i64: 64, 256>}, {transform_indices = @transform_4, window_bounds = array<i64: 2, 256>}]} {
    %c0 = arith.constant 0 : index
    %c0_0 = arith.constant 0 : index
    %0 = vector.load %arg1[%c0, %c0_0] : memref<224x28xf32, #tpu.memory_space<vmem>>, vector<224x28xf32>
    %1 = arith.truncf %0 : vector<224x28xf32> to vector<224x28xbf16>
    %c0_1 = arith.constant 0 : index
    %c0_2 = arith.constant 0 : index
    %2 = vector.load %arg2[%c0_1, %c0_2] : memref<28x1280xbf16, #tpu.memory_space<vmem>>, vector<28x1280xbf16>
    %cst = arith.constant dense<0.000000e+00> : vector<224x1280xf32>
    %3 = tpu.matmul %1, %2, %cst {dimension_numbers = #tpu.dot_dimension_numbers<[1], [0], [0], [1], [0, 0, 1, 1], [], []>} : vector<224x28xbf16>, vector<28x1280xbf16>, vector<224x1280xf32> -> vector<224x1280xf32>
    %4 = vector.extract_strided_slice %3 {offsets = [0, 0], sizes = [48, 256], strides = [1, 1]} : vector<224x1280xf32> to vector<48x256xf32>
    %5 = vector.extract_strided_slice %3 {offsets = [56, 256], sizes = [48, 256], strides = [1, 1]} : vector<224x1280xf32> to vector<48x256xf32>
    %6 = arith.addf %4, %5 : vector<48x256xf32>
    %7 = vector.extract_strided_slice %3 {offsets = [112, 512], sizes = [48, 256], strides = [1, 1]} : vector<224x1280xf32> to vector<48x256xf32>
    %8 = arith.addf %6, %7 : vector<48x256xf32>
    %9 = vector.extract_strided_slice %3 {offsets = [168, 768], sizes = [48, 256], strides = [1, 1]} : vector<224x1280xf32> to vector<48x256xf32>
    %10 = arith.addf %8, %9 : vector<48x256xf32>
    %11 = vector.extract_strided_slice %3 {offsets = [8, 1024], sizes = [48, 256], strides = [1, 1]} : vector<224x1280xf32> to vector<48x256xf32>
    %12 = arith.addf %10, %11 : vector<48x256xf32>
    %13 = vector.extract_strided_slice %3 {offsets = [56, 0], sizes = [48, 256], strides = [1, 1]} : vector<224x1280xf32> to vector<48x256xf32>
    %14 = vector.extract_strided_slice %3 {offsets = [112, 256], sizes = [48, 256], strides = [1, 1]} : vector<224x1280xf32> to vector<48x256xf32>
    %15 = arith.addf %13, %14 : vector<48x256xf32>
    %16 = vector.extract_strided_slice %3 {offsets = [168, 512], sizes = [48, 256], strides = [1, 1]} : vector<224x1280xf32> to vector<48x256xf32>
    %17 = arith.addf %15, %16 : vector<48x256xf32>
    %18 = vector.extract_strided_slice %3 {offsets = [8, 768], sizes = [48, 256], strides = [1, 1]} : vector<224x1280xf32> to vector<48x256xf32>
    %19 = arith.addf %17, %18 : vector<48x256xf32>
    %20 = vector.extract_strided_slice %3 {offsets = [64, 1024], sizes = [48, 256], strides = [1, 1]} : vector<224x1280xf32> to vector<48x256xf32>
    %21 = arith.addf %19, %20 : vector<48x256xf32>
    %22 = arith.maximumf %12, %21 : vector<48x256xf32>
    %23 = vector.extract_strided_slice %22 {offsets = [0, 0], sizes = [48, 120], strides = [1, 1]} : vector<48x256xf32> to vector<48x120xf32>
    %24 = vector.extract_strided_slice %22 {offsets = [0, 128], sizes = [48, 120], strides = [1, 1]} : vector<48x256xf32> to vector<48x120xf32>
    %25 = arith.maximumf %23, %24 : vector<48x120xf32>
    %26 = vector.extract_strided_slice %3 {offsets = [112, 0], sizes = [48, 256], strides = [1, 1]} : vector<224x1280xf32> to vector<48x256xf32>
    %27 = vector.extract_strided_slice %3 {offsets = [168, 256], sizes = [48, 256], strides = [1, 1]} : vector<224x1280xf32> to vector<48x256xf32>
    %28 = arith.addf %26, %27 : vector<48x256xf32>
    %29 = vector.extract_strided_slice %3 {offsets = [8, 512], sizes = [48, 256], strides = [1, 1]} : vector<224x1280xf32> to vector<48x256xf32>
    %30 = arith.addf %28, %29 : vector<48x256xf32>
    %31 = vector.extract_strided_slice %3 {offsets = [64, 768], sizes = [48, 256], strides = [1, 1]} : vector<224x1280xf32> to vector<48x256xf32>
    %32 = arith.addf %30, %31 : vector<48x256xf32>
    %33 = vector.extract_strided_slice %3 {offsets = [120, 1024], sizes = [48, 256], strides = [1, 1]} : vector<224x1280xf32> to vector<48x256xf32>
    %34 = arith.addf %32, %33 : vector<48x256xf32>
    %35 = vector.extract_strided_slice %3 {offsets = [168, 0], sizes = [48, 256], strides = [1, 1]} : vector<224x1280xf32> to vector<48x256xf32>
    %36 = vector.extract_strided_slice %3 {offsets = [8, 256], sizes = [48, 256], strides = [1, 1]} : vector<224x1280xf32> to vector<48x256xf32>
    %37 = arith.addf %35, %36 : vector<48x256xf32>
    %38 = vector.extract_strided_slice %3 {offsets = [64, 512], sizes = [48, 256], strides = [1, 1]} : vector<224x1280xf32> to vector<48x256xf32>
    %39 = arith.addf %37, %38 : vector<48x256xf32>
    %40 = vector.extract_strided_slice %3 {offsets = [120, 768], sizes = [48, 256], strides = [1, 1]} : vector<224x1280xf32> to vector<48x256xf32>
    %41 = arith.addf %39, %40 : vector<48x256xf32>
    %42 = vector.extract_strided_slice %3 {offsets = [176, 1024], sizes = [48, 256], strides = [1, 1]} : vector<224x1280xf32> to vector<48x256xf32>
    %43 = arith.addf %41, %42 : vector<48x256xf32>
    %44 = arith.maximumf %34, %43 : vector<48x256xf32>
    %45 = vector.extract_strided_slice %44 {offsets = [0, 0], sizes = [48, 120], strides = [1, 1]} : vector<48x256xf32> to vector<48x120xf32>
    %46 = vector.extract_strided_slice %44 {offsets = [0, 128], sizes = [48, 120], strides = [1, 1]} : vector<48x256xf32> to vector<48x120xf32>
    %47 = arith.maximumf %45, %46 : vector<48x120xf32>
    %48 = tpu.concatenate %25, %47 in 0 : vector<48x120xf32>, vector<48x120xf32> -> vector<96x120xf32>
    %49 = arith.truncf %48 : vector<96x120xf32> to vector<96x120xbf16>
    %c0_3 = arith.constant 0 : index
    %c0_4 = arith.constant 0 : index
    %50 = vector.load %arg3[%c0_3, %c0_4] : memref<120x1280xbf16, #tpu.memory_space<vmem>>, vector<120x1280xbf16>
    %cst_5 = arith.constant dense<0.000000e+00> : vector<96x1280xf32>
    %51 = tpu.matmul %49, %50, %cst_5 {dimension_numbers = #tpu.dot_dimension_numbers<[1], [0], [0], [1], [0, 0, 1, 1], [], []>} : vector<96x120xbf16>, vector<120x1280xbf16>, vector<96x1280xf32> -> vector<96x1280xf32>
    %52 = vector.extract_strided_slice %51 {offsets = [0, 0], sizes = [32, 256], strides = [1, 1]} : vector<96x1280xf32> to vector<32x256xf32>
    %53 = vector.extract_strided_slice %51 {offsets = [48, 256], sizes = [32, 256], strides = [1, 1]} : vector<96x1280xf32> to vector<32x256xf32>
    %54 = arith.addf %52, %53 : vector<32x256xf32>
    %55 = vector.extract_strided_slice %51 {offsets = [8, 512], sizes = [32, 256], strides = [1, 1]} : vector<96x1280xf32> to vector<32x256xf32>
    %56 = arith.addf %54, %55 : vector<32x256xf32>
    %57 = vector.extract_strided_slice %51 {offsets = [56, 768], sizes = [32, 256], strides = [1, 1]} : vector<96x1280xf32> to vector<32x256xf32>
    %58 = arith.addf %56, %57 : vector<32x256xf32>
    %59 = vector.extract_strided_slice %51 {offsets = [16, 1024], sizes = [32, 256], strides = [1, 1]} : vector<96x1280xf32> to vector<32x256xf32>
    %60 = arith.addf %58, %59 : vector<32x256xf32>
    %61 = vector.extract_strided_slice %51 {offsets = [48, 0], sizes = [32, 256], strides = [1, 1]} : vector<96x1280xf32> to vector<32x256xf32>
    %62 = vector.extract_strided_slice %51 {offsets = [8, 256], sizes = [32, 256], strides = [1, 1]} : vector<96x1280xf32> to vector<32x256xf32>
    %63 = arith.addf %61, %62 : vector<32x256xf32>
    %64 = vector.extract_strided_slice %51 {offsets = [56, 512], sizes = [32, 256], strides = [1, 1]} : vector<96x1280xf32> to vector<32x256xf32>
    %65 = arith.addf %63, %64 : vector<32x256xf32>
    %66 = vector.extract_strided_slice %51 {offsets = [16, 768], sizes = [32, 256], strides = [1, 1]} : vector<96x1280xf32> to vector<32x256xf32>
    %67 = arith.addf %65, %66 : vector<32x256xf32>
    %68 = vector.extract_strided_slice %51 {offsets = [64, 1024], sizes = [32, 256], strides = [1, 1]} : vector<96x1280xf32> to vector<32x256xf32>
    %69 = arith.addf %67, %68 : vector<32x256xf32>
    %70 = tpu.concatenate %60, %69 in 0 : vector<32x256xf32>, vector<32x256xf32> -> vector<64x256xf32>
    %c0_6 = arith.constant 0 : index
    %c0_7 = arith.constant 0 : index
    %71 = vector.load %arg4[%c0_6, %c0_7] : memref<64x256xf32, #tpu.memory_space<vmem>>, vector<64x256xf32>
    tpu.vector_store %arg4[%c0_6, %c0_7], %70 {strides = array<i32>} : memref<64x256xf32, #tpu.memory_space<vmem>>, vector<64x256xf32>,
    %cst_8 = arith.constant dense<0.000000e+00> : vector<256xf32>
    %72 = vector.multi_reduction <add>, %70, %cst_8 [0] : vector<64x256xf32> to vector<256xf32>
    %73 = vector.shape_cast %72 : vector<256xf32> to vector<1x256xf32>
    %74 = arith.mulf %70, %70 : vector<64x256xf32>
    %cst_9 = arith.constant dense<0.000000e+00> : vector<256xf32>
    %75 = vector.multi_reduction <add>, %74, %cst_9 [0] : vector<64x256xf32> to vector<256xf32>
    %76 = vector.shape_cast %75 : vector<256xf32> to vector<1x256xf32>
    %77 = tpu.concatenate %73, %76 in 0 : vector<1x256xf32>, vector<1x256xf32> -> vector<2x256xf32>
    %c0_10 = arith.constant 0 : index
    %c0_11 = arith.constant 0 : index
    %78 = vector.load %arg5[%c0_10, %c0_11] : memref<2x256xf32, #tpu.memory_space<vmem>>, vector<2x256xf32>
    tpu.vector_store %arg5[%c0_10, %c0_11], %77 {strides = array<i32>} : memref<2x256xf32, #tpu.memory_space<vmem>>, vector<2x256xf32>,
    return
  }
  func.func @transform_0(%arg0: i32) -> (i32, i32) {
    %c0_i32 = arith.constant 0 : i32
    %c0_i32_0 = arith.constant 0 : i32
    return %arg0, %c0_i32 : i32, i32
  }
  func.func @transform_1(%arg0: i32) -> (i32, i32) {
    %c0_i32 = arith.constant 0 : i32
    %c0_i32_0 = arith.constant 0 : i32
    %c0_i32_1 = arith.constant 0 : i32
    return %c0_i32, %c0_i32_0 : i32, i32
  }
  func.func @transform_2(%arg0: i32) -> (i32, i32) {
    %c0_i32 = arith.constant 0 : i32
    %c0_i32_0 = arith.constant 0 : i32
    %c0_i32_1 = arith.constant 0 : i32
    return %c0_i32, %c0_i32_0 : i32, i32
  }
  func.func @transform_3(%arg0: i32) -> (i32, i32) {
    %c0_i32 = arith.constant 0 : i32
    %c0_i32_0 = arith.constant 0 : i32
    return %arg0, %c0_i32 : i32, i32
  }
  func.func @transform_4(%arg0: i32) -> (i32, i32) {
    %c0_i32 = arith.constant 0 : i32
    %c0_i32_0 = arith.constant 0 : i32
    return %c0_i32, %arg0 : i32, i32
  }
}

module attributes {stable_mosaic.version = 11 : i64} {
  func.func @bn_fc_kernel(%arg0: i32, %arg1: memref<64x256xf32, #tpu.memory_space<vmem>>, %arg2: memref<1x256xf32, #tpu.memory_space<vmem>>, %arg3: memref<1x256xf32, #tpu.memory_space<vmem>>, %arg4: memref<512x50xbf16, #tpu.memory_space<vmem>>, %arg5: memref<1x50xf32, #tpu.memory_space<vmem>>, %arg6: memref<50x10xf32, #tpu.memory_space<vmem>>, %arg7: memref<1x10xf32, #tpu.memory_space<vmem>>, %arg8: memref<8x10xf32, #tpu.memory_space<vmem>>) attributes {dimension_semantics = [#tpu.dimension_semantics<parallel>], iteration_bounds = array<i64: 2>, scalar_prefetch = 0 : i64, scratch_operands = 0 : i64, tpu.core_type = #tpu.core_type<tc>, window_params = [{transform_indices = @transform_0, window_bounds = array<i64: 64, 256>}, {pipeline_mode = #tpu.pipeline_mode<synchronous>, transform_indices = @transform_1, window_bounds = array<i64: 1, 256>}, {pipeline_mode = #tpu.pipeline_mode<synchronous>, transform_indices = @transform_2, window_bounds = array<i64: 1, 256>}, {pipeline_mode = #tpu.pipeline_mode<synchronous>, transform_indices = @transform_3, window_bounds = array<i64: 512, 50>}, {pipeline_mode = #tpu.pipeline_mode<synchronous>, transform_indices = @transform_4, window_bounds = array<i64: 1, 50>}, {pipeline_mode = #tpu.pipeline_mode<synchronous>, transform_indices = @transform_5, window_bounds = array<i64: 50, 10>}, {pipeline_mode = #tpu.pipeline_mode<synchronous>, transform_indices = @transform_6, window_bounds = array<i64: 1, 10>}, {transform_indices = @transform_7, window_bounds = array<i64: 8, 10>}]} {
    %c0 = arith.constant 0 : index
    %c0_0 = arith.constant 0 : index
    %0 = vector.load %arg1[%c0, %c0_0] : memref<64x256xf32, #tpu.memory_space<vmem>>, vector<64x256xf32>
    %c0_1 = arith.constant 0 : index
    %c0_2 = arith.constant 0 : index
    %1 = vector.load %arg2[%c0_1, %c0_2] : memref<1x256xf32, #tpu.memory_space<vmem>>, vector<1x256xf32>
    %2 = vector.broadcast %1 : vector<1x256xf32> to vector<64x256xf32>
    %3 = arith.mulf %0, %2 : vector<64x256xf32>
    %c0_3 = arith.constant 0 : index
    %c0_4 = arith.constant 0 : index
    %4 = vector.load %arg3[%c0_3, %c0_4] : memref<1x256xf32, #tpu.memory_space<vmem>>, vector<1x256xf32>
    %5 = vector.broadcast %4 : vector<1x256xf32> to vector<64x256xf32>
    %6 = arith.addf %3, %5 : vector<64x256xf32>
    %7 = vector.extract_strided_slice %6 {offsets = [0, 0], sizes = [32, 256], strides = [1, 1]} : vector<64x256xf32> to vector<32x256xf32>
    %8 = vector.extract_strided_slice %6 {offsets = [32, 0], sizes = [32, 256], strides = [1, 1]} : vector<64x256xf32> to vector<32x256xf32>
    %9 = arith.maximumf %7, %8 : vector<32x256xf32>
    %10 = vector.extract_strided_slice %9 {offsets = [0, 0], sizes = [32, 128], strides = [1, 1]} : vector<32x256xf32> to vector<32x128xf32>
    %11 = vector.extract_strided_slice %9 {offsets = [0, 128], sizes = [32, 128], strides = [1, 1]} : vector<32x256xf32> to vector<32x128xf32>
    %12 = arith.maximumf %10, %11 : vector<32x128xf32>
    %cst = arith.constant 0.000000e+00 : f32
    %13 = vector.broadcast %cst : f32 to vector<32x128xf32>
    %14 = arith.maximumf %12, %13 : vector<32x128xf32>
    %15 = vector.extract_strided_slice %14 {offsets = [0, 0], sizes = [8, 128], strides = [1, 1]} : vector<32x128xf32> to vector<8x128xf32>
    %16 = vector.extract_strided_slice %14 {offsets = [8, 0], sizes = [8, 128], strides = [1, 1]} : vector<32x128xf32> to vector<8x128xf32>
    %17 = vector.extract_strided_slice %14 {offsets = [16, 0], sizes = [8, 128], strides = [1, 1]} : vector<32x128xf32> to vector<8x128xf32>
    %18 = vector.extract_strided_slice %14 {offsets = [24, 0], sizes = [8, 128], strides = [1, 1]} : vector<32x128xf32> to vector<8x128xf32>
    %19 = tpu.concatenate %15, %16, %17, %18 in 1 : vector<8x128xf32>, vector<8x128xf32>, vector<8x128xf32>, vector<8x128xf32> -> vector<8x512xf32>
    %20 = arith.truncf %19 : vector<8x512xf32> to vector<8x512xbf16>
    %c0_5 = arith.constant 0 : index
    %c0_6 = arith.constant 0 : index
    %21 = vector.load %arg4[%c0_5, %c0_6] : memref<512x50xbf16, #tpu.memory_space<vmem>>, vector<512x50xbf16>
    %cst_7 = arith.constant dense<0.000000e+00> : vector<8x50xf32>
    %22 = tpu.matmul %20, %21, %cst_7 {dimension_numbers = #tpu.dot_dimension_numbers<[1], [0], [0], [1], [0, 0, 1, 1], [], []>} : vector<8x512xbf16>, vector<512x50xbf16>, vector<8x50xf32> -> vector<8x50xf32>
    %c0_8 = arith.constant 0 : index
    %c0_9 = arith.constant 0 : index
    %23 = vector.load %arg5[%c0_8, %c0_9] : memref<1x50xf32, #tpu.memory_space<vmem>>, vector<1x50xf32>
    %24 = vector.broadcast %23 : vector<1x50xf32> to vector<8x50xf32>
    %25 = arith.addf %22, %24 : vector<8x50xf32>
    %cst_10 = arith.constant 0.000000e+00 : f32
    %26 = vector.broadcast %cst_10 : f32 to vector<8x50xf32>
    %27 = arith.maximumf %25, %26 : vector<8x50xf32>
    %c0_11 = arith.constant 0 : index
    %c0_12 = arith.constant 0 : index
    %28 = vector.load %arg6[%c0_11, %c0_12] : memref<50x10xf32, #tpu.memory_space<vmem>>, vector<50x10xf32>
    %cst_13 = arith.constant dense<0.000000e+00> : vector<8x10xf32>
    %29 = tpu.matmul %27, %28, %cst_13 {dimension_numbers = #tpu.dot_dimension_numbers<[1], [0], [0], [1], [0, 0, 1, 1], [], []>} : vector<8x50xf32>, vector<50x10xf32>, vector<8x10xf32> -> vector<8x10xf32>
    %c0_14 = arith.constant 0 : index
    %c0_15 = arith.constant 0 : index
    %30 = vector.load %arg7[%c0_14, %c0_15] : memref<1x10xf32, #tpu.memory_space<vmem>>, vector<1x10xf32>
    %31 = vector.broadcast %30 : vector<1x10xf32> to vector<8x10xf32>
    %32 = arith.addf %29, %31 : vector<8x10xf32>
    %cst_16 = arith.constant dense<0xFF800000> : vector<8xf32>
    %33 = vector.multi_reduction <maximumf>, %32, %cst_16 [1] : vector<8x10xf32> to vector<8xf32>
    %34 = vector.shape_cast %33 : vector<8xf32> to vector<8x1xf32>
    %35 = vector.broadcast %34 : vector<8x1xf32> to vector<8x10xf32>
    %36 = arith.subf %32, %35 : vector<8x10xf32>
    %37 = math.exp %36 : vector<8x10xf32>
    %cst_17 = arith.constant dense<0.000000e+00> : vector<8xf32>
    %38 = vector.multi_reduction <add>, %37, %cst_17 [1] : vector<8x10xf32> to vector<8xf32>
    %39 = vector.shape_cast %38 : vector<8xf32> to vector<8x1xf32>
    %40 = tpu.reciprocal %39 {approx = true} : vector<8x1xf32> -> vector<8x1xf32>
    %41 = arith.mulf %39, %40 : vector<8x1xf32>
    %cst_18 = arith.constant 2.000000e+00 : f32
    %42 = vector.broadcast %cst_18 : f32 to vector<8x1xf32>
    %43 = arith.subf %42, %41 : vector<8x1xf32>
    %44 = arith.mulf %40, %43 : vector<8x1xf32>
    %45 = vector.broadcast %44 : vector<8x1xf32> to vector<8x10xf32>
    %46 = arith.mulf %37, %45 : vector<8x10xf32>
    %c0_19 = arith.constant 0 : index
    %c0_20 = arith.constant 0 : index
    %47 = vector.load %arg8[%c0_19, %c0_20] : memref<8x10xf32, #tpu.memory_space<vmem>>, vector<8x10xf32>
    tpu.vector_store %arg8[%c0_19, %c0_20], %46 {strides = array<i32>} : memref<8x10xf32, #tpu.memory_space<vmem>>, vector<8x10xf32>,
    return
  }
  func.func @transform_0(%arg0: i32) -> (i32, i32) {
    %c0_i32 = arith.constant 0 : i32
    %c0_i32_0 = arith.constant 0 : i32
    return %arg0, %c0_i32 : i32, i32
  }
  func.func @transform_1(%arg0: i32) -> (i32, i32) {
    %c0_i32 = arith.constant 0 : i32
    %c0_i32_0 = arith.constant 0 : i32
    %c0_i32_1 = arith.constant 0 : i32
    return %c0_i32, %c0_i32_0 : i32, i32
  }
  func.func @transform_2(%arg0: i32) -> (i32, i32) {
    %c0_i32 = arith.constant 0 : i32
    %c0_i32_0 = arith.constant 0 : i32
    %c0_i32_1 = arith.constant 0 : i32
    return %c0_i32, %c0_i32_0 : i32, i32
  }
  func.func @transform_3(%arg0: i32) -> (i32, i32) {
    %c0_i32 = arith.constant 0 : i32
    %c0_i32_0 = arith.constant 0 : i32
    %c0_i32_1 = arith.constant 0 : i32
    return %c0_i32, %c0_i32_0 : i32, i32
  }
  func.func @transform_4(%arg0: i32) -> (i32, i32) {
    %c0_i32 = arith.constant 0 : i32
    %c0_i32_0 = arith.constant 0 : i32
    %c0_i32_1 = arith.constant 0 : i32
    return %c0_i32, %c0_i32_0 : i32, i32
  }
  func.func @transform_5(%arg0: i32) -> (i32, i32) {
    %c0_i32 = arith.constant 0 : i32
    %c0_i32_0 = arith.constant 0 : i32
    %c0_i32_1 = arith.constant 0 : i32
    return %c0_i32, %c0_i32_0 : i32, i32
  }
  func.func @transform_6(%arg0: i32) -> (i32, i32) {
    %c0_i32 = arith.constant 0 : i32
    %c0_i32_0 = arith.constant 0 : i32
    %c0_i32_1 = arith.constant 0 : i32
    return %c0_i32, %c0_i32_0 : i32, i32
  }
  func.func @transform_7(%arg0: i32) -> (i32, i32) {
    %c0_i32 = arith.constant 0 : i32
    %c0_i32_0 = arith.constant 0 : i32
    return %arg0, %c0_i32 : i32, i32
  }
}

</mosaic_0001>

<bundles_post_ra>
// kernel: tile.18
= control target key start
LH: loop header
LB: loop body
LE: loop exit
PB: predicated region body
PF: predicated region fallthrough
CT: control target
= control target key end

     0   :  { %s22_s0 = inlined_call_operand.vmem [shape: f32[128], index: 0, kind: input, shape index: {}]   ;;  %s23_s1 = inlined_call_operand.vmem [shape: f32[2,128], index: 1, kind: output, shape index: {}]  }
   0x1   :  { %v4_v0 = vld [vmem:[%s22_s0] ss:$0 sm:$0xff] }
   0x2   :  { %5 = vst [vmem:[%s23_s1] sm:$0x3] %v4_v0 }

// kernel: forward.3
= control target key start
LH: loop header
LB: loop body
LE: loop exit
PB: predicated region body
PF: predicated region fallthrough
CT: control target
= control target key end

     0   :  { %12 = vsyncpa [#allocation3], 0  ;;  %s1403_s0 = inlined_call_operand.vmem [shape: f32[128,256], index: 0, kind: input, shape index: {}]   ;;  %s1404_s1 = inlined_call_operand.vmem [shape: f32[1,256], index: 1, kind: input, shape index: {}]   ;;  %s1405_s2 = inlined_call_operand.vmem [shape: f32[1,256], index: 2, kind: input, shape index: {}]   ;;  %s1406_s3 = inlined_call_operand.vmem [shape: bf16[512,50], index: 3, kind: input, shape index: {}]   ;;  %s1407_s4 = inlined_call_operand.vmem [shape: f32[1,50], index: 4, kind: input, shape index: {}]   ;;  %s1408_s5 = inlined_call_operand.vmem [shape: f32[50,10], index: 5, kind: input, shape index: {}]   ;;  %s1409_s6 = inlined_call_operand.vmem [shape: f32[1,10], index: 6, kind: input, shape index: {}]   ;;  %s1410_s7 = inlined_call_operand.hbm [shape: f32[16,10], index: 7, kind: output, shape index: {}]  }
   0x1   :  { %14 = vsyncpa [#allocation3 + $0x1], 0  ;;  %s1129_s24 = smov 0   ;;  %s1131_s25 = smov 0  }
   0x2   :  { %s1133_s26 = smov 0   ;;  %s1135_s27 = smov 0  }
   0x3 LB: > { %s804_s28 = sadd.s32 4294967295, %s1087_s27   ;;  %s805_s29 = sadd.s32 4294967294, %s1087_s27   ;;  %s1087_s27 = sphi %s1135_s27, %s1416_s27   ;;  %s1083_s26 = sphi %s1133_s26, %s1415_s26   ;;  %s1079_s25 = sphi %s1131_s25, %s1414_s25   ;;  %s1075_s24 = sphi %s1129_s24, %s1413_s24  }
   0x4   : > { %s1152_s30 = sadd.s32 1, %s1087_s27   ;;  %s179_s8 = sadd.s32 1, %s1083_s26 }
   0x5   : > { %s176_s9 = ssub.s32 %s1087_s27, %s1152_s30  ;;  %p189_p0 = scmp.ne.s32.totalorder %s1083_s26, %s1079_s25 }
   0x6   : > { %p177_p1 = scmp.eq.s32.totalorder %s176_s9, 0  ;;  %p190_p2 = scmp.eq.s32.totalorder %s804_s28, 1 }
   0x7   : > { %p195_p3 = scmp.ne.s32.totalorder %s1079_s25, %s1075_s24  ;;  %p196_p4 = scmp.eq.s32.totalorder %s805_s29, 1 }
   0x8   : > { %s1162_s10 = scalar_select %p177_p1, %s1083_s26, %s179_s8  }
   0x9   : > { %p1164_p5 = por %p190_p2, %p189_p0  ;;  %p1168_p6 = por %p196_p4, %p195_p3 }
   0xa   : > { %p808_p7 = scmp.ge.s32.totalorder %s1087_s27, 1  ;;  %p242_p8 = scmp.lt.s32.totalorder %s1087_s27, 3 }
   0xc   : > { %p243_p9 = pnand %p808_p7, %p242_p8 }
   0xd   : > { %s1183_s19 = sshll.u32 (!%p243_p9), %s804_s28, 3  ;;  %s272_s22 = sand.u32 (!%p243_p9), 1, %s1079_s25  }
   0xe   : > { %246 = sbr.rel (%p243_p9) target bundleno = 582 (0x246), region = 48  ;;  %p276_p10 = scmp.lt.s32.totalorder (!%p243_p9), %s1183_s19, 15 }
   0xf   : > { %s809_s23 = sshll.u32 (!%p243_p9), %s272_s22, 3  ;;  %s741_s28 = scalar_lea.hbm (!%p243_p9), %s1410_s7, %s1183_s19 }
  0x10   : > { %s274_s9 = scalar_lea.vmem (!%p243_p9), [#allocation2], %s809_s23  ;;  %s731_s17 = scalar_lea.sflag (!%p243_p9), [#allocation3], %s272_s22 }
  0x11   : > { %s743_s14 = sshll.u32 (!%p243_p9), %s274_s9, 4  ;;  %s744_s14 = int_to_ptr.vmem [resolvable:$true] %s743_s14 }
  0x13   : > { %v955_v0 = vld [vmem:[%s1406_s3 + $0x38] sm:$0xff]  ;;  %v954_v4 = vld [vmem:[%s1406_s3 + $0x30] sm:$0xff]  ;;  %s277_s15 = scalar_select %p276_p10, %s1183_s19, 15  ;;  %v953_v8 = vld [vmem:[%s1406_s3 + $0x28] sm:$0xff]  ;;  %vm690_vm0 = vcmask 1041408   ;;  %vm686_vm1 = vcmask 408576  }
  0x14   : > { %v963_v1 = vld [vmem:[%s1406_s3 + $0x78] sm:$0xff]  ;;  %622 = vmatpush.bf16.msra.mxu0 %v955_v0  ;;  %v962_v5 = vld [vmem:[%s1406_s3 + $0x70] sm:$0xff]  ;;  %v961_v9 = vld [vmem:[%s1406_s3 + $0x68] sm:$0xff]  ;;  %vm714_vm2 = vcmask 80896  }
  0x15   : > { %v971_v2 = vld [vmem:[%s1406_s3 + $0xb8] sm:$0xff]  ;;  %635 = vmatpush.bf16.msra.mxu1 %v963_v1  ;;  %v970_v6 = vld [vmem:[%s1406_s3 + $0xb0] sm:$0xff]  ;;  %s947_s16 = sshll.u32 %s277_s15, 4  ;;  %v969_v10 = vld [vmem:[%s1406_s3 + $0xa8] sm:$0xff]  ;;  %s745_s15 = sshll.u32 %s741_s28, 4  ;;  %s746_s15 = int_to_ptr.hbm [resolvable:$true] %s745_s15 }
  0x16   : > { %v979_v3 = vld [vmem:[%s1406_s3 + $0xf8] sm:$0xff]  ;;  %648 = vmatpush.bf16.msra.mxu2 %v971_v2  ;;  %v978_v7 = vld [vmem:[%s1406_s3 + $0xf0] sm:$0xff]  ;;  %v977_v11 = vld [vmem:[%s1406_s3 + $0xe8] sm:$0xff]  ;;  %s1217_s13 = scalar_lea.vmem %s1403_s0, %s947_s16  ;;  %s1039_s18 = sshra.s32 %s746_s15, 4  ;;  %s1040_s18 = int_to_ptr.hbm [resolvable:$true] %s1039_s18 }
  0x17   : > { %661 = vmatpush.bf16.msra.mxu3 %v979_v3  ;;  %v952_v12 = vld [vmem:[%s1406_s3 + $0x20] sm:$0xff]  ;;  %v283_v17 = vld [vmem:[%s1217_s13 + $0x8] sm:$0xff]  ;;  %v284_v22 = vld [vmem:[%s1217_s13 + $0x10] sm:$0xff]  ;;  %s1041_s20 = scalar_lea.hbm %s1040_s18, 8  ;;  %p1046_p0 = scmp.lt.s32.totalorder %s1040_s18, %s1410_s7 }
  0x18   : > { %623 = vmatpush.bf16.msra.mxu0 %v954_v4  ;;  %v960_v13 = vld [vmem:[%s1406_s3 + $0x60] sm:$0xff]  ;;  %v291_v19 = vld [vmem:[%s1217_s13 + $0x48] sm:$0xff]  ;;  %v285_v27 = vld [vmem:[%s1217_s13 + $0x18] sm:$0xff]  ;;  %p1042_p11 = scmp.ne.s32.totalorder %s1040_s18, %s1041_s20 }
  0x19   : > { %636 = vmatpush.bf16.msra.mxu1 %v962_v5  ;;  %v968_v14 = vld [vmem:[%s1406_s3 + $0xa0] sm:$0xff]  ;;  %v292_v28 = vld [vmem:[%s1217_s13 + $0x50] sm:$0xff]  ;;  %v951_v29 = vld [vmem:[%s1406_s3 + $0x18] sm:$0xff] }
  0x1a   : > { %649 = vmatpush.bf16.msra.mxu2 %v970_v6  ;;  %v976_v15 = vld [vmem:[%s1406_s3 + $0xe0] sm:$0xff]  ;;  %v959_v30 = vld [vmem:[%s1406_s3 + $0x58] sm:$0xff]  ;;  %v950_v37 = vld [vmem:[%s1406_s3 + $0x10] sm:$0xff]  ;;  %p1043_p12 = pnand %p1042_p11, %p1164_p5 }
  0x1b   : > { %662 = vmatpush.bf16.msra.mxu3 %v978_v7  ;;  %v282_v16 = vld [vmem:[%s1217_s13] sm:$0xff]  ;;  %v293_v31 = vld [vmem:[%s1217_s13 + $0x58] sm:$0xff]  ;;  %v958_v38 = vld [vmem:[%s1406_s3 + $0x50] sm:$0xff] }
  0x1c   : > { %624 = vmatpush.bf16.msra.mxu0 %v953_v8  ;;  %v290_v18 = vld [vmem:[%s1217_s13 + $0x40] sm:$0xff]  ;;  %v967_v32 = vld [vmem:[%s1406_s3 + $0x98] sm:$0xff]  ;;  %v287_v48 = vld [vmem:[%s1217_s13 + $0x28] sm:$0xff]  ;;  %p1044_p13 = pneg %p1043_p12 }
  0x1d   : > { %637 = vmatpush.bf16.msra.mxu1 %v961_v9  ;;  %v298_v20 = vld [vmem:[%s1404_s1] sm:$0x3]  ;;  %v975_v33 = vld [vmem:[%s1406_s3 + $0xd8] sm:$0xff]  ;;  %v295_v53 = vld [vmem:[%s1217_s13 + $0x68] sm:$0xff] }
  0x1e   : > { %650 = vmatpush.bf16.msra.mxu2 %v969_v10  ;;  %v320_v21 = vld [vmem:[%s1405_s2] sm:$0x3]  ;;  %v1242_v23 = vperm.slane %v298_v20, 0  ;;  %v1244_v24 = vperm.slane %v298_v20, 1  ;;  %v288_v54 = vld [vmem:[%s1217_s13 + $0x30] sm:$0xff]  ;;  %v289_v3 = vld [vmem:[%s1217_s13 + $0x38] sm:$0xff] }
  0x1f   : > { %663 = vmatpush.bf16.msra.mxu3 %v977_v11  ;;  %v1246_v25 = vperm.slane %v320_v21, 0  ;;  %v1248_v26 = vperm.slane %v320_v21, 1  ;;  %v286_v43 = vld [vmem:[%s1217_s13 + $0x20] sm:$0xff]  ;;  %v966_v55 = vld [vmem:[%s1406_s3 + $0x90] sm:$0xff]  ;;  %v297_v5 = vld [vmem:[%s1217_s13 + $0x78] sm:$0xff] }
  0x20   : > { %625 = vmatpush.bf16.msra.mxu0 %v952_v12  ;;  %v304_v34 = vmul.f32 %v1242_v23, %v282_v16  ;;  %v305_v35 = vmul.f32 %v1244_v24, %v283_v17  ;;  %v312_v36 = vmul.f32 %v1242_v23, %v290_v18  ;;  %v313_v39 = vmul.f32 %v1244_v24, %v291_v19  ;;  %v294_v49 = vld [vmem:[%s1217_s13 + $0x60] sm:$0xff]  ;;  %v974_v56 = vld [vmem:[%s1406_s3 + $0xd0] sm:$0xff]  ;;  %v949_v7 = vld [vmem:[%s1406_s3 + $0x8] sm:$0xff] }
  0x21   : > { %638 = vmatpush.bf16.msra.mxu1 %v960_v13  ;;  %v306_v40 = vmul.f32 %v1242_v23, %v284_v22  ;;  %v307_v41 = vmul.f32 %v1244_v24, %v285_v27  ;;  %v314_v42 = vmul.f32 %v1242_v23, %v292_v28  ;;  %v315_v47 = vmul.f32 %v1244_v24, %v293_v31  ;;  %v296_v4 = vld [vmem:[%s1217_s13 + $0x70] sm:$0xff]  ;;  %v957_v8 = vld [vmem:[%s1406_s3 + $0x48] sm:$0xff]  ;;  %s1045_s13 = scalar_lea.hbm %s1410_s7, 16 }
  0x22   : > { %651 = vmatpush.bf16.msra.mxu2 %v968_v14  ;;  %v326_v44 = vadd.f32 %v1246_v25, %v304_v34  ;;  %v327_v45 = vadd.f32 %v1248_v26, %v305_v35  ;;  %v334_v46 = vadd.f32 %v1246_v25, %v312_v36  ;;  %v335_v50 = vadd.f32 %v1248_v26, %v313_v39  ;;  %v965_v12 = vld [vmem:[%s1406_s3 + $0x88] sm:$0xff]  ;;  %p1047_p1 = scmp.lt.s32.totalorder %s1045_s13, %s1041_s20 }
  0x23   : > { %664 = vmatpush.bf16.msra.mxu3 %v976_v15  ;;  %v328_v51 = vadd.f32 %v1246_v25, %v306_v40  ;;  %v329_v52 = vadd.f32 %v1248_v26, %v307_v41  ;;  %v336_v58 = vadd.f32 %v1246_v25, %v314_v42  ;;  %v337_v59 = vadd.f32 %v1248_v26, %v315_v47  ;;  %v973_v13 = vld [vmem:[%s1406_s3 + $0xc8] sm:$0xff] }
  0x24   : > { %626 = vmatpush.bf16.msra.mxu0 %v951_v29  ;;  %v342_v57 = vmax.f32 %v326_v44, %v334_v46  ;;  %v343_v60 = vmax.f32 %v327_v45, %v335_v50  ;;  %v308_v61 = vmul.f32 %v1242_v23, %v286_v43  ;;  %v309_v62 = vmul.f32 %v1244_v24, %v287_v48  ;;  %v948_v29 = vld [vmem:[%s1406_s3] sm:$0xff]  ;;  %v680_v43 = vld [vmem:[%s1408_s5 + $0x28] sm:$0xff]  ;;  %v678_v45 = vld [vmem:[%s1408_s5 + $0x18] sm:$0xff]  ;;  %p1048_p2 = por %p1047_p1, %p1046_p0 }
  0x25   : > { %639 = vmatpush.bf16.msra.mxu1 %v959_v30  ;;  %v316_v63 = vmul.f32 %v1242_v23, %v294_v49  ;;  %v344_v0 = vmax.f32 %v328_v51, %v336_v58  ;;  %v345_v1 = vmax.f32 %v329_v52, %v337_v59  ;;  %v317_v2 = vmul.f32 %v1244_v24, %v295_v53  ;;  %v956_v30 = vld [vmem:[%s1406_s3 + $0x40] sm:$0xff]  ;;  %v677_v46 = vld [vmem:[%s1408_s5 + $0x10] sm:$0xff]  ;;  %v676_v47 = vld [vmem:[%s1408_s5 + $0x8] sm:$0xff] }
  0x26   : > { %652 = vmatpush.bf16.msra.mxu2 %v967_v32  ;;  %v310_v6 = vmul.f32 %v1242_v23, %v288_v54  ;;  %v350_v9 = vmax.f32 %v342_v57, %v343_v60  ;;  %v330_v10 = vadd.f32 %v1246_v25, %v308_v61  ;;  %v331_v11 = vadd.f32 %v1248_v26, %v309_v62  ;;  %v972_v32 = vld [vmem:[%s1406_s3 + $0xc0] sm:$0xff]  ;;  %p1049_p3 = pnand %p1048_p2, %p1044_p13 }
  0x27   : > { %665 = vmatpush.bf16.msra.mxu3 %v975_v33  ;;  %v351_v14 = vmax.f32 %v344_v0, %v345_v1  ;;  %v338_v15 = vadd.f32 %v1246_v25, %v316_v63  ;;  %v339_v16 = vadd.f32 %v1248_v26, %v317_v2  ;;  %v311_v18 = vmul.f32 %v1244_v24, %v289_v3  ;;  %v679_v44 = vld [vmem:[%s1408_s5 + $0x20] sm:$0xff] }
  0x28   : > { %627 = vmatpush.bf16.msra.mxu0 %v950_v37  ;;  %v354_v17 = vmax.f32 %v350_v9, 0.0  ;;  %v318_v19 = vmul.f32 %v1242_v23, %v296_v4  ;;  %v319_v20 = vmul.f32 %v1244_v24, %v297_v5  ;;  %v332_v28 = vadd.f32 %v1246_v25, %v310_v6  ;;  %v964_v24 = vld [vmem:[%s1406_s3 + $0x80] sm:$0xff] }
  0x29   : > { %640 = vmatpush.bf16.msra.mxu1 %v958_v38  ;;  %v355_v21 = vmax.f32 %v351_v14, 0.0  ;;  %v346_v22 = vmax.f32 %v330_v10, %v338_v15  ;;  %v347_v27 = vmax.f32 %v331_v11, %v339_v16  ;;  %v333_v31 = vadd.f32 %v1248_v26, %v311_v18  ;;  %v675_v48 = vld [vmem:[%s1408_s5] sm:$0xff] }
  0x2a   : > { %653 = vmatpush.bf16.msra.mxu2 %v966_v55  ;;  %v340_v23 = vadd.f32 %v1246_v25, %v318_v19  ;;  %v341_v34 = vadd.f32 %v1248_v26, %v319_v20  ;;  %v358_v36 = vpack.c.bf16 %v354_v17, %v354_v17  ;;  %v681_v25 = vld [vmem:[%s1408_s5 + $0x30] sm:$0x3]  ;;  %v1019_v49 = vld [vmem:[%s1407_s4] ss:$0 sm:$0xff] }
  0x2b   : > { %666 = vmatpush.bf16.msra.mxu3 %v974_v56  ;;  %v352_v33 = vmax.f32 %v346_v22, %v347_v27  ;;  %v359_v37 = vpack.c.bf16 %v355_v21, %v355_v21  ;;  %v1020_v63 = vld [vmem:[%s1409_s6] ss:$0 sm:$0xff] }
  0x2c   : > { %628 = vmatpush.bf16.msra.mxu0 %v949_v7  ;;  %v348_v35 = vmax.f32 %v332_v28, %v340_v23  ;;  %v349_v39 = vmax.f32 %v333_v31, %v341_v34 }
  0x2d   : > { %641 = vmatpush.bf16.msra.mxu1 %v957_v8  ;;  %v356_v38 = vmax.f32 %v352_v33, 0.0 }
  0x2e   : > { %654 = vmatpush.bf16.msra.mxu2 %v965_v12  ;;  %v353_v41 = vmax.f32 %v348_v35, %v349_v39 }
  0x2f   : > { %667 = vmatpush.bf16.msra.mxu3 %v973_v13  ;;  %v360_v40 = vpack.c.bf16 %v356_v38, %v356_v38 }
  0x30   : > { %629 = vmatpush.bf16.msra.mxu0 %v948_v29  ;;  %v357_v26 = vmax.f32 %v353_v41, 0.0 }
  0x31   : > { %642 = vmatpush.bf16.msra.mxu1 %v956_v30 }
  0x32   : > { %655 = vmatpush.bf16.msra.mxu2 %v964_v24  ;;  %v361_v42 = vpack.c.bf16 %v357_v26, %v357_v26 }
  0x33   : > { %668 = vmatpush.bf16.msra.mxu3 %v972_v32  ;;  %630 = vmatmul.bf16.vlgmr.msra.gmra.mxu0 %v358_v36 }
  0x34   : > { %941 = vmatpush.msk.msrb.mxu0 %vm690_vm0, %v681_v25  ;;  %643 = vmatmul.bf16.vlgmr.msra.gmra.mxu1 %v359_v37 }
  0x35   : > { %656 = vmatmul.bf16.vlgmr.msra.gmra.mxu2 %v360_v40 }
  0x36   : > { %669 = vmatmul.bf16.vlgmr.msra.gmra.mxu3 %v361_v42  ;;  %704 = vmatpush.msrb.mxu0 %v680_v43 }
  0x38   : > { %705 = vmatpush.msrb.mxu0 %v679_v44 }
  0x3a   : > { %706 = vmatpush.msrb.mxu0 %v678_v45 }
  0x3c   : > { %707 = vmatpush.msrb.mxu0 %v677_v46 }
  0x3e   : > { %708 = vmatpush.msrb.mxu0 %v676_v47 }
  0x40   : > { %709 = vmatpush.msrb.mxu0 %v675_v48 }
  0xb0   : > { %v631_v50 = vpop.f32.mrf.mxu0 }
  0xb1   : > { %v644_v51 = vpop.f32.mrf.mxu1  ;;  %v632_v52 = vadd.f32 %v1019_v49, %v631_v50 }
  0xb3   : > { %v645_v53 = vadd.f32 %v644_v51, %v632_v52 }
  0xb8   : > { %v657_v54 = vpop.f32.mrf.mxu2  ;;  %v633_v56 = vpop.f32.mrf.mxu0 }
  0xb9   : > { %v658_v55 = vadd.f32 %v657_v54, %v645_v53  ;;  %v646_v57 = vpop.f32.mrf.mxu1  ;;  %v670_v58 = vpop.f32.mrf.mxu3 }
  0xbb   : > { %v671_v59 = vadd.f32 %v670_v58, %v658_v55 }
  0xbd   : > { %v674_v60 = vmax.f32 %v671_v59, 0.0 }
  0xbf   : > { %942 = vmatmul.msk.f32.vlgmr.msrb.gmra.mxu0 %vm686_vm1, %v674_v60 }
  0xc0   : > { %v659_v61 = vpop.f32.mrf.mxu2 }
  0xc1   : > { %v672_v62 = vpop.f32.mrf.mxu3 }
 0x13c   : > { %v711_v0 = vpop.f32.mrf.mxu0 }
 0x13d   : > { %v712_v1 = vadd.f32 %v1020_v63, %v711_v0 }
 0x13f   : > { %v715_v2 = vsel %vm714_vm2, %v712_v1, -inf }
 0x140   : > { %716 = vmax.xlane.f32.xlu0 %v715_v2 }
 0x1b3   : > { %v717_v3 = vpop.xlane.xlu0 %716 }
 0x1b4   : > { %v718_v4 = vsub.f32 %v712_v1, %v717_v3 }
 0x1b6   : > { %v719_v5 = vmul.f32 1.442695, %v718_v4 }
 0x1b8   : > { %1021 = vpow2.f32 %v719_v5 }
 0x1be   : > { %v1022_v6 = vpop.eup %1021 }
 0x1bf   : > { %v721_v7 = vsel %vm714_vm2, %v1022_v6, 0.0 }
 0x1c0   : > { %722 = vadd.xlane.f32.xlu0 %v721_v7 }
 0x233   : > { %v723_v8 = vpop.xlane.xlu0 %722 }
 0x234   : > { %1023 = vrcp.f32 %v723_v8 }
 0x23a   : > { %v1024_v9 = vpop.eup %1023 }
 0x23b   : > { %v725_v10 = vmul.f32 %v1024_v9, %v723_v8 }
 0x23d   : > { %v726_v11 = vsub.f32 2.0, %v725_v10 }
 0x23f   : > { %v727_v12 = vmul.f32 %v1024_v9, %v726_v11 }
 0x241   : > { %v728_v13 = vmul.f32 %v1022_v6, %v727_v12 }
 0x243   : > { %729 = vst.msk [vmem:[%s274_s9] sm:$0xff] %vm714_vm2, %v728_v13 }
 0x244   : > { %1052 = shalt.err (!%p1049_p3)
}
 0x245   : > { %980 = dma.vmem_to_hbm [thread:$0]  (%p1164_p5), %s744_s14, 128, %s746_s15, %s731_s17  }
 0x246 PF: > { %p986_p4 = scmp.ge.s32.totalorder %s1087_s27, 2  ;;  %s757_s22 = sand.u32 1, %s1075_s24  }
 0x247   : > { %s758_s29 = scalar_lea.sflag [#allocation3], %s757_s22 }
 0x248   : > { %p983_p7 = pnand %p986_p4, %p1168_p6 }
 0x24a   : > { %p984_p8 = pneg %p983_p7 }
 0x24c   : > { %1070 = dma.done.wait (%p984_p8), %s758_s29, 128  }
 0x24d   : > { %1072 = vsyncadd (%p984_p8), %s758_s29, 4294967168  ;;  %p17_p9 = scmp.ge.s32.totalorder %s1152_s30, 4   ;;  %s1413_s24 = smov %s1079_s25 }
 0x24e   : > { %s1414_s25 = smov %s1083_s26  ;;  %s1415_s26 = smov %s1162_s10 }
 0x24f   : > { %s1416_s27 = smov %s1152_s30  ;;  %19 = sbr.rel (!%p17_p9) target bundleno = 3 (0x3), region = 83 }
 0x254   :  { %764 = vsyncpa [#allocation3], 1 }
 0x255   :  { %766 = vsyncpa [#allocation3 + $0x1], 1 }

// kernel: forward.2
= control target key start
LH: loop header
LB: loop body
LE: loop exit
PB: predicated region body
PF: predicated region fallthrough
CT: control target
= control target key end

     0   :  { %s3237_s15 = smov 0   ;;  %s4953_s0 = inlined_call_operand.vmem [shape: f32[448,28], index: 0, kind: input, shape index: {}]   ;;  %s4954_s1 = inlined_call_operand.vmem [shape: bf16[28,1280], index: 1, kind: input, shape index: {}]   ;;  %s4955_s2 = inlined_call_operand.vmem [shape: bf16[120,1280], index: 2, kind: input, shape index: {}]   ;;  %s4956_s3 = inlined_call_operand.vmem [shape: f32[128,256], index: 3, kind: output, shape index: {0}]   ;;  %s4957_s4 = inlined_call_operand.vmem [shape: f32[2,512], index: 4, kind: output, shape index: {1}]  }
   0x1 LB: > { %s3243_s16 = sadd.s32 4294967295, %s3210_s15   ;;  %p2532_p0 = scmp.ge.s32.totalorder %s3210_s15, 1  ;;  %s3210_s15 = sphi %s3237_s15, %s15_s15  }
   0x2   : > { %p166_p1 = scmp.lt.s32.totalorder %s3210_s15, 3 }
   0x4   : > { %p167_p2 = pnand %p2532_p0, %p166_p1 }
   0x6   : > { %170 = sbr.rel (%p167_p2) target bundleno = 1305 (0x519), region = 32 }
   0xb   : > { %v2581_v0 = vld [vmem:[%s4954_s1 + $0x50] sm:$0xf]  ;;  %v3117_v1 = vld [vmem:[%s4954_s1 + $0x74] sm:$0x30]  ;;  %vm413_vm0 = vcmask 1045504   ;;  %s198_s21 = smul.u32 28, %s3243_s16 }
   0xc   : > { %v2582_v2 = vor.u32 %v3117_v1, %v2581_v0  ;;  %v3112_v3 = vld [vmem:[%s4954_s1 + $0x54] sm:$0xf]  ;;  %v2583_v4 = vld [vmem:[%s4954_s1 + $0x78] sm:$0x30]  ;;  %v2589_v5 = vld [vmem:[%s4954_s1 + $0x58] sm:$0xf] }
   0xd   : > { %v2586_v6 = vor.u32 %v3112_v3, %v2583_v4  ;;  %v3118_v7 = vld [vmem:[%s4954_s1 + $0x7c] sm:$0x30]  ;;  %v3113_v8 = vld [vmem:[%s4954_s1 + $0x5c] sm:$0xf]  ;;  %v2591_v9 = vld [vmem:[%s4954_s1 + $0x80] sm:$0x30] }
   0xe   : > { %v415_v10 = vsel %vm413_vm0, %v2582_v2, 0  ;;  %v2590_v11 = vor.u32 %v3118_v7, %v2589_v5  ;;  %v2594_v12 = vor.u32 %v3113_v8, %v2591_v9  ;;  %v2541_v13 = vld [vmem:[%s4954_s1] sm:$0xf]  ;;  %v3107_v14 = vld [vmem:[%s4954_s1 + $0x24] sm:$0xf0]  ;;  %p3281_p3 = scmp.lt.s32.totalorder %s198_s21, 55 }
   0xf   : > { %450 = vmatpush.bf16.msra.mxu0 %v415_v10  ;;  %v418_v15 = vsel %vm413_vm0, %v2586_v6, 0  ;;  %v2542_v16 = vor.u32 %v3107_v14, %v2541_v13  ;;  %v3102_v17 = vld [vmem:[%s4954_s1 + $0x4] sm:$0xf]  ;;  %v2543_v18 = vld [vmem:[%s4954_s1 + $0x28] sm:$0xf0]  ;;  %vm370_vm1 = vcmask 228352  }
  0x10   : > { %525 = vmatpush.bf16.msra.mxu1 %v418_v15  ;;  %v421_v19 = vsel %vm413_vm0, %v2590_v11, 0  ;;  %v424_v20 = vsel %vm413_vm0, %v2594_v12, 0  ;;  %v2546_v21 = vor.u32 %v3102_v17, %v2543_v18  ;;  %v2549_v22 = vld [vmem:[%s4954_s1 + $0x8] sm:$0xf]  ;;  %v3108_v23 = vld [vmem:[%s4954_s1 + $0x2c] sm:$0xf0] }
  0x11   : > { %3192 = vmatpush.bf16.msra.mxu2 %v421_v19  ;;  %3194 = vmatpush.bf16.msra.mxu3 %v424_v20  ;;  %v2550_v24 = vor.u32 %v3108_v23, %v2549_v22  ;;  %v3103_v25 = vld [vmem:[%s4954_s1 + $0xc] sm:$0xf]  ;;  %v2551_v26 = vld [vmem:[%s4954_s1 + $0x30] sm:$0xf0]  ;;  %s5068_s21 = smov (!%p3281_p3, %s198_s21), 55  ;;  %vm1897_vm2 = vcmask 1043456  }
  0x12   : > { %v2554_v27 = vor.u32 %v3103_v25, %v2551_v26  ;;  %s2533_s28 = sshll.u32 %s5068_s21, 3  ;;  %v3120_v17 = vld [vmem:[%s4954_s1 + $0x8c] sm:$0x30]  ;;  %v3115_v18 = vld [vmem:[%s4954_s1 + $0x6c] sm:$0xf]  ;;  %vm1878_vm3 = vcmask 982016  }
  0x13   : > { %451 = vmatpush.bf16.msra.mxu0 %v2542_v16  ;;  %s3313_s5 = scalar_lea.vmem %s4953_s0, %s2533_s28  ;;  %v2605_v16 = vld [vmem:[%s4954_s1 + $0x68] sm:$0xf]  ;;  %s2534_s7 = sshll.u32 %s3243_s16, 3  ;;  %vm2426_vm4 = vcmask 1040384   ;;  %vm2432_vm5 = vcmask 1041408  }
  0x14   : > { %526 = vmatpush.bf16.msra.mxu1 %v2546_v21  ;;  %v218_v28 = vld [vmem:[%s3313_s5] sm:$0xff]  ;;  %v219_v29 = vld [vmem:[%s3313_s5 + $0x8] sm:$0xff]  ;;  %v220_v34 = vld [vmem:[%s3313_s5 + $0x10] sm:$0xff]  ;;  %p205_p4 = scmp.lt.s32.totalorder %s2534_s7, 15  ;;  %s2537_s12 = sshll.u32 %s3243_s16, 1 }
  0x15   : > { %3193 = vmatpush.bf16.msra.mxu2 %v2550_v24  ;;  %3195 = vmatpush.bf16.msra.mxu3 %v2554_v27  ;;  %v222_v30 = vld [vmem:[%s3313_s5 + $0x20] sm:$0xff]  ;;  %v3318_v31 = vpack.c.bf16 %v219_v29, %v218_v28  ;;  %v223_v32 = vld [vmem:[%s3313_s5 + $0x28] sm:$0xff]  ;;  %v221_v35 = vld [vmem:[%s3313_s5 + $0x18] sm:$0xff]  ;;  %p212_p5 = scmp.lt.s32.totalorder %s2537_s12, 3 }
  0x16   : > { %v3321_v33 = vpack.c.bf16 %v223_v32, %v222_v30  ;;  %v224_v36 = vld [vmem:[%s3313_s5 + $0x30] sm:$0xff]  ;;  %v225_v37 = vld [vmem:[%s3313_s5 + $0x38] sm:$0xff]  ;;  %v3335_v38 = vpack.c.bf16 %v221_v35, %v220_v34  ;;  %v226_v40 = vld [vmem:[%s3313_s5 + $0x40] sm:$0xff]  ;;  %s5070_s7 = smov (!%p205_p4, %s2534_s7), 15 }
  0x17   : > { %600 = vmatpush.bf16.msrb.mxu0 %v421_v19  ;;  %2633 = vmatmul.msk.bf16.vlgmr.msra.gmra.mxu1 %vm370_vm1, %v3318_v31  ;;  %v3337_v39 = vpack.c.bf16 %v225_v37, %v224_v36  ;;  %v227_v41 = vld [vmem:[%s3313_s5 + $0x48] sm:$0xff]  ;;  %v228_v43 = vld [vmem:[%s3313_s5 + $0x50] sm:$0xff]  ;;  %v229_v44 = vld [vmem:[%s3313_s5 + $0x58] sm:$0xff]  ;;  %v2606_v19 = vor.u32 %v3120_v17, %v2605_v16  ;;  %s3101_s8 = sshll.u32 %s5070_s7, 4  ;;  %s5072_s12 = smov (!%p212_p5, %s2537_s12), 3 }
  0x18   : > { %675 = vmatpush.bf16.msrb.mxu1 %v424_v20  ;;  %2619 = vmatmul.msk.bf16.vlgmr.msra.gmra.mxu0 %vm370_vm1, %v3318_v31  ;;  %v3349_v42 = vpack.c.bf16 %v227_v41, %v226_v40  ;;  %v3361_v45 = vpack.c.bf16 %v229_v44, %v228_v43  ;;  %v230_v46 = vld [vmem:[%s3313_s5 + $0x60] sm:$0xff]  ;;  %v231_v47 = vld [vmem:[%s3313_s5 + $0x68] sm:$0xff]  ;;  %v232_v49 = vld [vmem:[%s3313_s5 + $0x70] sm:$0xff]  ;;  %s4902_s11 = scalar_lea.vmem %s4956_s3, %s3101_s8  ;;  %s2538_s16 = sshll.u32 %s5072_s12, 1 }
  0x19   : > { %2649 = vmatmul.msk.bf16.vlgmr.msra.gmra.mxu2 %vm370_vm1, %v3321_v33  ;;  %2663 = vmatmul.msk.bf16.vlgmr.msra.gmra.mxu3 %vm370_vm1, %v3321_v33  ;;  %4965 = vst [vmem:[#allocation2_spill] sm:$0xff] %v3337_v39  ;;  %v3373_v48 = vpack.c.bf16 %v231_v47, %v230_v46  ;;  %v233_v50 = vld [vmem:[%s3313_s5 + $0x78] sm:$0xff]  ;;  %v234_v52 = vld [vmem:[%s3313_s5 + $0x80] sm:$0xff]  ;;  %v235_v53 = vld [vmem:[%s3313_s5 + $0x88] sm:$0xff]  ;;  %v433_v29 = vsel %vm413_vm0, %v2606_v19, 0  ;;  %s215_s17 = scalar_lea.vmem %s4957_s4, %s2538_s16 }
  0x1a   : > { %4966 = vst [vmem:[#allocation3_spill] sm:$0xff] %v3349_v42  ;;  %v3385_v51 = vpack.c.bf16 %v233_v50, %v232_v49  ;;  %v3397_v54 = vpack.c.bf16 %v235_v53, %v234_v52  ;;  %v236_v55 = vld [vmem:[%s3313_s5 + $0x90] sm:$0xff]  ;;  %v237_v56 = vld [vmem:[%s3313_s5 + $0x98] sm:$0xff]  ;;  %v238_v58 = vld [vmem:[%s3313_s5 + $0xa0] sm:$0xff]  ;;  %900 = vmatpush.bf16.msrb.mxu2 %v433_v29 }
  0x1b   : > { %601 = vmatpush.bf16.msrb.mxu0 %v2550_v24  ;;  %4967 = vst [vmem:[#allocation4_spill] sm:$0xff] %v3361_v45  ;;  %v3409_v57 = vpack.c.bf16 %v237_v56, %v236_v55  ;;  %v239_v59 = vld [vmem:[%s3313_s5 + $0xa8] sm:$0xff]  ;;  %v240_v3 = vld [vmem:[%s3313_s5 + $0xb0] sm:$0xff]  ;;  %v241_v4 = vld [vmem:[%s3313_s5 + $0xb8] sm:$0xff] }
  0x1c   : > { %676 = vmatpush.bf16.msrb.mxu1 %v2554_v27  ;;  %v3421_v62 = vpack.c.bf16 %v239_v59, %v238_v58  ;;  %v3441_v9 = vpack.c.bf16 %v241_v4, %v240_v3  ;;  %v242_v14 = vld [vmem:[%s3313_s5 + $0xc0] sm:$0xff]  ;;  %v243_v15 = vld [vmem:[%s3313_s5 + $0xc8] sm:$0xff]  ;;  %v2607_v20 = vld [vmem:[%s4954_s1 + $0x90] sm:$0x30] }
  0x1d   : > { %v2610_v23 = vor.u32 %v3115_v18, %v2607_v20  ;;  %v3473_v28 = vpack.c.bf16 %v243_v15, %v242_v14  ;;  %v2565_v32 = vld [vmem:[%s4954_s1 + $0x18] sm:$0xf]  ;;  %v3110_v34 = vld [vmem:[%s4954_s1 + $0x3c] sm:$0xf0]  ;;  %v3105_v35 = vld [vmem:[%s4954_s1 + $0x1c] sm:$0xf] }
  0x1e   : > { %v2566_v36 = vor.u32 %v3110_v34, %v2565_v32  ;;  %v2567_v37 = vld [vmem:[%s4954_s1 + $0x40] sm:$0xf0]  ;;  %v244_v50 = vld [vmem:[%s3313_s5 + $0xd0] sm:$0xff]  ;;  %v245_v52 = vld [vmem:[%s3313_s5 + $0xd8] sm:$0xff] }
  0x1f   : > { %v436_v30 = vsel %vm413_vm0, %v2610_v23, 0  ;;  %v2570_v40 = vor.u32 %v3105_v35, %v2567_v37  ;;  %v3114_v20 = vld [vmem:[%s4954_s1 + $0x64] sm:$0xf] }
  0x20   : > { %975 = vmatpush.bf16.msrb.mxu3 %v436_v30  ;;  %901 = vmatpush.bf16.msrb.mxu2 %v2566_v36 }
  0x24   : > { %976 = vmatpush.bf16.msrb.mxu3 %v2570_v40 }
  0x27   : > { %2634 = vmatmul.msk.bf16.gmra.mxu1 %vm370_vm1, %v3335_v38 }
  0x28   : > { %2620 = vmatmul.msk.bf16.gmra.mxu0 %vm370_vm1, %v3335_v38 }
  0x29   : > { %2650 = vmatmul.msk.bf16.gmra.mxu2 %vm370_vm1, %v3337_v39  ;;  %2664 = vmatmul.msk.bf16.gmra.mxu3 %vm370_vm1, %v3337_v39 }
  0x37   : > { %2635 = vmatmul.msk.bf16.gmra.mxu1 %vm370_vm1, %v3321_v33 }
  0x38   : > { %2621 = vmatmul.msk.bf16.gmra.mxu0 %vm370_vm1, %v3321_v33 }
  0x39   : > { %2651 = vmatmul.msk.bf16.gmra.mxu2 %vm370_vm1, %v3349_v42  ;;  %2665 = vmatmul.msk.bf16.gmra.mxu3 %vm370_vm1, %v3349_v42 }
  0x47   : > { %2636 = vmatmul.msk.bf16.gmra.mxu1 %vm370_vm1, %v3337_v39 }
  0x48   : > { %2622 = vmatmul.msk.bf16.gmra.mxu0 %vm370_vm1, %v3337_v39 }
  0x49   : > { %2652 = vmatmul.msk.bf16.gmra.mxu2 %vm370_vm1, %v3361_v45  ;;  %2666 = vmatmul.msk.bf16.gmra.mxu3 %vm370_vm1, %v3361_v45 }
  0x57   : > { %2637 = vmatmul.msk.bf16.gmra.mxu1 %vm370_vm1, %v3349_v42 }
  0x58   : > { %2623 = vmatmul.msk.bf16.gmra.mxu0 %vm370_vm1, %v3349_v42 }
  0x59   : > { %2653 = vmatmul.msk.bf16.gmra.mxu2 %vm370_vm1, %v3373_v48  ;;  %2667 = vmatmul.msk.bf16.gmra.mxu3 %vm370_vm1, %v3373_v48 }
  0x67   : > { %2638 = vmatmul.msk.bf16.gmra.mxu1 %vm370_vm1, %v3361_v45 }
  0x68   : > { %2624 = vmatmul.msk.bf16.gmra.mxu0 %vm370_vm1, %v3361_v45 }
  0x69   : > { %2654 = vmatmul.msk.bf16.gmra.mxu2 %vm370_vm1, %v3385_v51  ;;  %2668 = vmatmul.msk.bf16.gmra.mxu3 %vm370_vm1, %v3385_v51 }
  0x77   : > { %2639 = vmatmul.msk.bf16.gmra.mxu1 %vm370_vm1, %v3373_v48 }
  0x78   : > { %2625 = vmatmul.msk.bf16.gmra.mxu0 %vm370_vm1, %v3373_v48 }
  0x79   : > { %2655 = vmatmul.msk.bf16.gmra.mxu2 %vm370_vm1, %v3397_v54  ;;  %2669 = vmatmul.msk.bf16.gmra.mxu3 %vm370_vm1, %v3397_v54 }
  0x87   : > { %2640 = vmatmul.msk.bf16.gmra.mxu1 %vm370_vm1, %v3385_v51 }
  0x88   : > { %2626 = vmatmul.msk.bf16.gmra.mxu0 %vm370_vm1, %v3385_v51 }
  0x89   : > { %2656 = vmatmul.msk.bf16.gmra.mxu2 %vm370_vm1, %v3409_v57  ;;  %2670 = vmatmul.msk.bf16.gmra.mxu3 %vm370_vm1, %v3409_v57 }
  0x94   : > { %v528_v61 = vpop.f32.mrf.mxu1 }
  0x95   : > { %v453_v60 = vpop.f32.mrf.mxu0 }
  0x97   : > { %2641 = vmatmul.msk.bf16.gmra.mxu1 %vm370_vm1, %v3397_v54 }
  0x98   : > { %2627 = vmatmul.msk.bf16.gmra.mxu0 %vm370_vm1, %v3397_v54 }
  0x99   : > { %2657 = vmatmul.msk.bf16.gmra.mxu2 %vm370_vm1, %v3421_v62  ;;  %2671 = vmatmul.msk.bf16.gmra.mxu3 %vm370_vm1, %v3421_v62 }
  0x9c   : > { %v3431_v63 = vpop.f32.mrf.mxu2  ;;  %v3433_v0 = vpop.f32.mrf.mxu3 }
  0x9d   : > { %v455_v1 = vpop.f32.mrf.mxu0  ;;  %v530_v2 = vpop.f32.mrf.mxu1 }
  0xa4   : > { %v3437_v5 = vpop.f32.mrf.mxu2  ;;  %v3439_v6 = vpop.f32.mrf.mxu3 }
  0xa5   : > { %v458_v7 = vpop.f32.mrf.mxu0  ;;  %v533_v8 = vpop.f32.mrf.mxu1 }
  0xa7   : > { %2642 = vmatmul.msk.bf16.gmra.mxu1 %vm370_vm1, %v3409_v57 }
  0xa8   : > { %2628 = vmatmul.msk.bf16.gmra.mxu0 %vm370_vm1, %v3409_v57 }
  0xa9   : > { %2658 = vmatmul.msk.bf16.gmra.mxu2 %vm370_vm1, %v3441_v9  ;;  %2672 = vmatmul.msk.bf16.gmra.mxu3 %vm370_vm1, %v3441_v9 }
  0xac   : > { %v3451_v10 = vpop.f32.mrf.mxu2  ;;  %v3453_v11 = vpop.f32.mrf.mxu3 }
  0xad   : > { %v460_v12 = vpop.f32.mrf.mxu0  ;;  %v535_v13 = vpop.f32.mrf.mxu1 }
  0xb4   : > { %v619_v21 = vpop.f32.mrf.mxu2  ;;  %v694_v22 = vpop.f32.mrf.mxu3 }
  0xb5   : > { %v3469_v24 = vadd.f32 %v619_v21, %v453_v60  ;;  %v3471_v25 = vadd.f32 %v694_v22, %v528_v61  ;;  %v463_v26 = vpop.f32.mrf.mxu0  ;;  %v538_v27 = vpop.f32.mrf.mxu1  ;;  %v3507_v61 = vpack.c.bf16 %v245_v52, %v244_v50  ;;  %v2599_v22 = vld [vmem:[%s4954_s1 + $0x88] sm:$0x30]  ;;  %v3104_v50 = vld [vmem:[%s4954_s1 + $0x14] sm:$0xf] }
  0xb6   : > { %v2602_v23 = vor.u32 %v3114_v20, %v2599_v22 }
  0xb7   : > { %2643 = vmatmul.msk.bf16.gmra.mxu1 %vm370_vm1, %v3421_v62 }
  0xb8   : > { %2629 = vmatmul.msk.bf16.gmra.mxu0 %vm370_vm1, %v3421_v62  ;;  %v430_v30 = vsel %vm413_vm0, %v2602_v23, 0 }
  0xb9   : > { %2659 = vmatmul.msk.bf16.gmra.mxu2 %vm370_vm1, %v3473_v28  ;;  %2673 = vmatmul.msk.bf16.gmra.mxu3 %vm370_vm1, %v3473_v28 }
  0xba   : > { %825 = vmatpush.bf16.msra.mxu1 %v430_v30 }
  0xbc   : > { %v622_v41 = vpop.f32.mrf.mxu2  ;;  %v697_v43 = vpop.f32.mrf.mxu3 }
  0xbd   : > { %v3497_v44 = vadd.f32 %v622_v41, %v455_v1  ;;  %v3499_v46 = vadd.f32 %v697_v43, %v530_v2  ;;  %v465_v47 = vpop.f32.mrf.mxu0  ;;  %v540_v49 = vpop.f32.mrf.mxu1 }
  0xc4   : > { %v624_v53 = vpop.f32.mrf.mxu2  ;;  %v699_v55 = vpop.f32.mrf.mxu3 }
  0xc5   : > { %v3503_v56 = vadd.f32 %v624_v53, %v458_v7  ;;  %v3505_v58 = vadd.f32 %v699_v55, %v533_v8  ;;  %v468_v59 = vpop.f32.mrf.mxu0  ;;  %v543_v60 = vpop.f32.mrf.mxu1  ;;  %v2559_v53 = vld [vmem:[%s4954_s1 + $0x38] sm:$0xf0] }
  0xc6   : > { %v2562_v55 = vor.u32 %v3104_v50, %v2559_v53 }
  0xc7   : > { %2644 = vmatmul.msk.bf16.gmra.mxu1 %vm370_vm1, %v3441_v9 }
  0xc8   : > { %2630 = vmatmul.msk.bf16.gmra.mxu0 %vm370_vm1, %v3441_v9  ;;  %826 = vmatpush.bf16.msra.mxu1 %v2562_v55 }
  0xc9   : > { %2660 = vmatmul.msk.bf16.gmra.mxu2 %vm370_vm1, %v3507_v61  ;;  %2674 = vmatmul.msk.bf16.gmra.mxu3 %vm370_vm1, %v3507_v61 }
  0xcc   : > { %v627_v1 = vpop.f32.mrf.mxu2  ;;  %v702_v2 = vpop.f32.mrf.mxu3 }
  0xcd   : > { %v3517_v3 = vadd.f32 %v627_v1, %v460_v12  ;;  %v3519_v4 = vadd.f32 %v702_v2, %v535_v13  ;;  %v469_v7 = vpop.f32.mrf.mxu0  ;;  %v544_v8 = vpop.f32.mrf.mxu1  ;;  %v2597_v12 = vld [vmem:[%s4954_s1 + $0x60] sm:$0xf]  ;;  %v3119_v13 = vld [vmem:[%s4954_s1 + $0x84] sm:$0x30] }
  0xce   : > { %v2598_v21 = vor.u32 %v3119_v13, %v2597_v12 }
  0xd4   : > { %v629_v14 = vpop.f32.mrf.mxu2  ;;  %v704_v15 = vpop.f32.mrf.mxu3 }
  0xd5   : > { %v3521_v16 = vadd.f32 %v629_v14, %v463_v26  ;;  %v3523_v17 = vadd.f32 %v704_v15, %v538_v27  ;;  %v472_v18 = vpop.f32.mrf.mxu0  ;;  %v547_v19 = vpop.f32.mrf.mxu1  ;;  %v427_v26 = vsel %vm413_vm0, %v2598_v21, 0 }
  0xd6   : > { %750 = vmatpush.bf16.msra.mxu0 %v427_v26  ;;  %v2615_v26 = vld [vmem:[%s4954_s1 + $0x98] sm:$0x30] }
  0xd7   : > { %4968 = vst [vmem:[#allocation5_spill] sm:$0xff] %v3523_v17  ;;  %2645 = vmatmul.msk.bf16.gmra.mxu1 %vm370_vm1, %v3473_v28 }
  0xd8   : > { %2631 = vmatmul.msk.bf16.gmra.mxu0 %vm370_vm1, %v3473_v28 }
  0xd9   : > { %2703 = vmatmul.msk.bf16.vlgmr.msrb.gmra.mxu2 %vm370_vm1, %v3318_v31  ;;  %2717 = vmatmul.msk.bf16.vlgmr.msrb.gmra.mxu3 %vm370_vm1, %v3318_v31 }
  0xdc   : > { %v632_v27 = vpop.f32.mrf.mxu2  ;;  %v707_v29 = vpop.f32.mrf.mxu3 }
  0xdd   : > { %v3547_v32 = vadd.f32 %v632_v27, %v465_v47  ;;  %v3549_v34 = vadd.f32 %v707_v29, %v540_v49  ;;  %v474_v35 = vpop.f32.mrf.mxu0  ;;  %v549_v36 = vpop.f32.mrf.mxu1  ;;  %v2557_v47 = vld [vmem:[%s4954_s1 + $0x10] sm:$0xf]  ;;  %v3109_v49 = vld [vmem:[%s4954_s1 + $0x34] sm:$0xf0] }
  0xde   : > { %v2558_v52 = vor.u32 %v3109_v49, %v2557_v47 }
  0xdf   : > { %4969 = vst [vmem:[#allocation6_spill] sm:$0xff] %v3547_v32 }
  0xe0   : > { %4970 = vst [vmem:[#allocation7_spill] sm:$0xff] %v3549_v34  ;;  %751 = vmatpush.bf16.msra.mxu0 %v2558_v52 }
  0xe4   : > { %v634_v37 = vpop.f32.mrf.mxu2  ;;  %v709_v40 = vpop.f32.mrf.mxu3 }
  0xe5   : > { %v477_v41 = vpop.f32.mrf.mxu0  ;;  %v552_v43 = vpop.f32.mrf.mxu1 }
  0xe7   : > { %2646 = vmatmul.msk.bf16.gmra.mxu1 %vm370_vm1, %v3507_v61 }
  0xe8   : > { %2632 = vmatmul.msk.bf16.gmra.mxu0 %vm370_vm1, %v3507_v61 }
  0xe9   : > { %2704 = vmatmul.msk.bf16.gmra.mxu2 %vm370_vm1, %v3335_v38  ;;  %2718 = vmatmul.msk.bf16.gmra.mxu3 %vm370_vm1, %v3335_v38 }
  0xec   : > { %v636_v59 = vpop.f32.mrf.mxu2  ;;  %v711_v60 = vpop.f32.mrf.mxu3 }
  0xed   : > { %v3571_v1 = vadd.f32 %v636_v59, %v469_v7  ;;  %v3573_v2 = vadd.f32 %v711_v60, %v544_v8  ;;  %v479_v14 = vpop.f32.mrf.mxu0  ;;  %v554_v15 = vpop.f32.mrf.mxu1  ;;  %v2613_v7 = vld [vmem:[%s4954_s1 + $0x70] sm:$0xf]  ;;  %v3121_v8 = vld [vmem:[%s4954_s1 + $0x94] sm:$0x30] }
  0xef   : > { %4971 = vst [vmem:[#allocation8_spill] sm:$0xff] %v3571_v1 }
  0xf0   : > { %4972 = vst [vmem:[#allocation9_spill] sm:$0xff] %v3573_v2 }
  0xf4   : > { %v638_v12 = vpop.f32.mrf.mxu2  ;;  %v713_v13 = vpop.f32.mrf.mxu3 }
  0xf5   : > { %v3575_v20 = vadd.f32 %v638_v12, %v472_v18  ;;  %v3577_v21 = vadd.f32 %v713_v13, %v547_v19  ;;  %v482_v22 = vpop.f32.mrf.mxu0  ;;  %v557_v23 = vpop.f32.mrf.mxu1  ;;  %v3116_v18 = vld [vmem:[%s4954_s1 + $0x74] sm:$0xf]  ;;  %v2614_v19 = vor.u32 %v3121_v8, %v2613_v7 }
  0xf6   : > { %v2618_v27 = vor.u32 %v3116_v18, %v2615_v26 }
  0xf7   : > { %4973 = vst [vmem:[#allocation10_spill] sm:$0xff] %v3575_v20  ;;  %2661 = vmatmul.msk.bf16.vlgmr.msrb.gmra.mxu1 %vm370_vm1, %v3318_v31  ;;  %v439_v29 = vsel %vm413_vm0, %v2614_v19, 0 }
  0xf8   : > { %4974 = vst [vmem:[#allocation11_spill] sm:$0xff] %v3577_v21  ;;  %2647 = vmatmul.msk.bf16.vlgmr.msrb.gmra.mxu0 %vm370_vm1, %v3318_v31  ;;  %v442_v40 = vsel %vm413_vm0, %v2618_v27, 0 }
  0xf9   : > { %2705 = vmatmul.msk.bf16.gmra.mxu2 %vm370_vm1, %v3321_v33  ;;  %2719 = vmatmul.msk.bf16.gmra.mxu3 %vm370_vm1, %v3321_v33 }
  0xfa   : > { %1050 = vmatpush.bf16.msrb.mxu0 %v439_v29  ;;  %1125 = vmatpush.bf16.msrb.mxu1 %v442_v40 }
  0xfc   : > { %v641_v30 = vpop.f32.mrf.mxu2  ;;  %v716_v37 = vpop.f32.mrf.mxu3 }
  0xfd   : > { %v3601_v47 = vadd.f32 %v641_v30, %v474_v35  ;;  %v3603_v49 = vadd.f32 %v716_v37, %v549_v36  ;;  %v484_v50 = vpop.f32.mrf.mxu0  ;;  %v559_v52 = vpop.f32.mrf.mxu1 }
  0xff   : > { %4975 = vst [vmem:[#allocation12_spill] sm:$0xff] %v3601_v47 }
 0x100   : > { %4976 = vst [vmem:[#allocation13_spill] sm:$0xff] %v3603_v49 }
 0x104   : > { %v643_v53 = vpop.f32.mrf.mxu2  ;;  %v718_v55 = vpop.f32.mrf.mxu3 }
 0x105   : > { %v3605_v59 = vadd.f32 %v643_v53, %v477_v41  ;;  %v3607_v60 = vadd.f32 %v718_v55, %v552_v43  ;;  %v486_v12 = vpop.f32.mrf.mxu0  ;;  %v561_v13 = vpop.f32.mrf.mxu1 }
 0x107   : > { %4977 = vst [vmem:[#allocation14_spill] sm:$0xff] %v3605_v59  ;;  %2662 = vmatmul.msk.bf16.gmra.mxu1 %vm370_vm1, %v3335_v38 }
 0x108   : > { %4978 = vst [vmem:[#allocation15_spill] sm:$0xff] %v3607_v60  ;;  %2648 = vmatmul.msk.bf16.gmra.mxu0 %vm370_vm1, %v3335_v38 }
 0x109   : > { %2706 = vmatmul.msk.bf16.gmra.mxu2 %vm370_vm1, %v3337_v39  ;;  %2720 = vmatmul.msk.bf16.gmra.mxu3 %vm370_vm1, %v3337_v39 }
 0x10c   : > { %v646_v35 = vpop.f32.mrf.mxu2  ;;  %v721_v36 = vpop.f32.mrf.mxu3 }
 0x10d   : > { %v3617_v41 = vadd.f32 %v646_v35, %v479_v14  ;;  %v3619_v43 = vadd.f32 %v721_v36, %v554_v15  ;;  %v488_v7 = vpop.f32.mrf.mxu0  ;;  %v563_v8 = vpop.f32.mrf.mxu1 }
 0x10f   : > { %4979 = vst [vmem:[#allocation16_spill] sm:$0xff] %v3617_v41 }
 0x110   : > { %4980 = vst [vmem:[#allocation17_spill] sm:$0xff] %v3619_v43 }
 0x114   : > { %v648_v18 = vpop.f32.mrf.mxu2  ;;  %v723_v19 = vpop.f32.mrf.mxu3 }
 0x115   : > { %v3621_v26 = vadd.f32 %v648_v18, %v482_v22  ;;  %v3623_v27 = vadd.f32 %v723_v19, %v557_v23  ;;  %v491_v29 = vpop.f32.mrf.mxu0  ;;  %v566_v30 = vpop.f32.mrf.mxu1 }
 0x117   : > { %4981 = vst [vmem:[#allocation18_spill] sm:$0xff] %v3621_v26  ;;  %2689 = vmatmul.msk.bf16.vlgmr.msra.gmra.mxu1 %vm370_vm1, %v3318_v31 }
 0x118   : > { %4982 = vst [vmem:[#allocation19_spill] sm:$0xff] %v3623_v27  ;;  %2675 = vmatmul.msk.bf16.vlgmr.msra.gmra.mxu0 %vm370_vm1, %v3318_v31 }
 0x119   : > { %2707 = vmatmul.msk.bf16.gmra.mxu2 %vm370_vm1, %v3349_v42  ;;  %2721 = vmatmul.msk.bf16.gmra.mxu3 %vm370_vm1, %v3349_v42 }
 0x11c   : > { %v651_v14 = vpop.f32.mrf.mxu2  ;;  %v726_v15 = vpop.f32.mrf.mxu3 }
 0x11d   : > { %v493_v22 = vpop.f32.mrf.mxu0  ;;  %v568_v37 = vpop.f32.mrf.mxu1 }
 0x124   : > { %v652_v23 = vpop.f32.mrf.mxu2  ;;  %v727_v40 = vpop.f32.mrf.mxu3 }
 0x125   : > { %v3633_v50 = vadd.f32 %v652_v23, %v486_v12  ;;  %v3635_v52 = vadd.f32 %v727_v40, %v561_v13  ;;  %v496_v53 = vpop.f32.mrf.mxu0  ;;  %v571_v55 = vpop.f32.mrf.mxu1 }
 0x127   : > { %2690 = vmatmul.msk.bf16.gmra.mxu1 %vm370_vm1, %v3335_v38 }
 0x128   : > { %2676 = vmatmul.msk.bf16.gmra.mxu0 %vm370_vm1, %v3335_v38 }
 0x129   : > { %2708 = vmatmul.msk.bf16.gmra.mxu2 %vm370_vm1, %v3361_v45  ;;  %2722 = vmatmul.msk.bf16.gmra.mxu3 %vm370_vm1, %v3361_v45 }
 0x12c   : > { %v655_v35 = vpop.f32.mrf.mxu2  ;;  %v730_v36 = vpop.f32.mrf.mxu3 }
 0x12d   : > { %v3645_v12 = vadd.f32 %v655_v35, %v488_v7  ;;  %v3647_v13 = vadd.f32 %v730_v36, %v563_v8  ;;  %v498_v18 = vpop.f32.mrf.mxu0  ;;  %v573_v19 = vpop.f32.mrf.mxu1 }
 0x134   : > { %v657_v14 = vpop.f32.mrf.mxu2  ;;  %v732_v15 = vpop.f32.mrf.mxu3 }
 0x135   : > { %v3649_v23 = vadd.f32 %v657_v14, %v491_v29  ;;  %v3651_v40 = vadd.f32 %v732_v15, %v566_v30  ;;  %v501_v27 = vpop.f32.mrf.mxu0  ;;  %v576_v26 = vpop.f32.mrf.mxu1 }
 0x137   : > { %2691 = vmatmul.msk.bf16.gmra.mxu1 %vm370_vm1, %v3321_v33 }
 0x138   : > { %2677 = vmatmul.msk.bf16.gmra.mxu0 %vm370_vm1, %v3321_v33 }
 0x139   : > { %2709 = vmatmul.msk.bf16.gmra.mxu2 %vm370_vm1, %v3373_v48  ;;  %2723 = vmatmul.msk.bf16.gmra.mxu3 %vm370_vm1, %v3373_v48 }
 0x13c   : > { %v660_v7 = vpop.f32.mrf.mxu2  ;;  %v735_v8 = vpop.f32.mrf.mxu3 }
 0x13d   : > { %v3661_v29 = vadd.f32 %v660_v7, %v493_v22  ;;  %v3663_v30 = vadd.f32 %v735_v8, %v568_v37  ;;  %v502_v27 = vpop.f32.mrf.mxu0  ;;  %v577_v26 = vpop.f32.mrf.mxu1 }
 0x144   : > { %v662_v35 = vpop.f32.mrf.mxu2  ;;  %v737_v36 = vpop.f32.mrf.mxu3 }
 0x145   : > { %v3665_v14 = vadd.f32 %v662_v35, %v496_v53  ;;  %v3667_v15 = vadd.f32 %v737_v36, %v571_v55  ;;  %v505_v43 = vpop.f32.mrf.mxu0  ;;  %v580_v41 = vpop.f32.mrf.mxu1 }
 0x147   : > { %2692 = vmatmul.msk.bf16.gmra.mxu1 %vm370_vm1, %v3337_v39 }
 0x148   : > { %2678 = vmatmul.msk.bf16.gmra.mxu0 %vm370_vm1, %v3337_v39 }
 0x149   : > { %2710 = vmatmul.msk.bf16.gmra.mxu2 %vm370_vm1, %v3385_v51  ;;  %2724 = vmatmul.msk.bf16.gmra.mxu3 %vm370_vm1, %v3385_v51 }
 0x14c   : > { %v665_v22 = vpop.f32.mrf.mxu2  ;;  %v740_v37 = vpop.f32.mrf.mxu3 }
 0x14d   : > { %v3677_v53 = vadd.f32 %v665_v22, %v498_v18  ;;  %v3679_v55 = vadd.f32 %v740_v37, %v573_v19  ;;  %v507_v7 = vpop.f32.mrf.mxu0  ;;  %v582_v8 = vpop.f32.mrf.mxu1 }
 0x154   : > { %v667_v35 = vpop.f32.mrf.mxu2  ;;  %v742_v36 = vpop.f32.mrf.mxu3 }
 0x155   : > { %v3681_v60 = vpop.f32.mrf.mxu0  ;;  %v3683_v59 = vpop.f32.mrf.mxu1 }
 0x157   : > { %2693 = vmatmul.msk.bf16.gmra.mxu1 %vm370_vm1, %v3349_v42 }
 0x158   : > { %2679 = vmatmul.msk.bf16.gmra.mxu0 %vm370_vm1, %v3349_v42 }
 0x159   : > { %2711 = vmatmul.msk.bf16.gmra.mxu2 %vm370_vm1, %v3397_v54  ;;  %2725 = vmatmul.msk.bf16.gmra.mxu3 %vm370_vm1, %v3397_v54 }
 0x15c   : > { %v903_v18 = vpop.f32.mrf.mxu2  ;;  %v978_v19 = vpop.f32.mrf.mxu3 }
 0x15d   : > { %v3693_v22 = vpop.f32.mrf.mxu0  ;;  %v3695_v37 = vpop.f32.mrf.mxu1  ;;  %v2573_v18 = vld [vmem:[%s4954_s1 + $0x20] sm:$0xf]  ;;  %v3111_v19 = vld [vmem:[%s4954_s1 + $0x44] sm:$0xf0] }
 0x164   : > { %v3697_v35 = vpop.f32.mrf.mxu2  ;;  %v3699_v36 = vpop.f32.mrf.mxu3 }
 0x165   : > { %4983 = vst [vmem:[#allocation20_spill] sm:$0xff] %v3697_v35  ;;  %v3701_v49 = vpop.f32.mrf.mxu0  ;;  %v3703_v47 = vpop.f32.mrf.mxu1  ;;  %v2574_v35 = vor.u32 %v3111_v19, %v2573_v18 }
 0x166   : > { %4984 = vst [vmem:[#allocation21_spill] sm:$0xff] %v3699_v36  ;;  %v3106_v36 = vld [vmem:[%s4954_s1 + $0x24] sm:$0xf] }
 0x167   : > { %2694 = vmatmul.msk.bf16.gmra.mxu1 %vm370_vm1, %v3361_v45  ;;  %1051 = vmatpush.bf16.msrb.mxu0 %v2574_v35 }
 0x168   : > { %2680 = vmatmul.msk.bf16.gmra.mxu0 %vm370_vm1, %v3361_v45  ;;  %v2575_v45 = vld [vmem:[%s4954_s1 + $0x48] sm:$0xf0] }
 0x169   : > { %2712 = vmatmul.msk.bf16.gmra.mxu2 %vm370_vm1, %v3409_v57  ;;  %2726 = vmatmul.msk.bf16.gmra.mxu3 %vm370_vm1, %v3409_v57  ;;  %v2578_v21 = vor.u32 %v3106_v36, %v2575_v45 }
 0x16b   : > { %1126 = vmatpush.bf16.msrb.mxu1 %v2578_v21 }
 0x16c   : > { %v3725_v20 = vpop.f32.mrf.mxu2  ;;  %v3727_v2 = vpop.f32.mrf.mxu3 }
 0x16d   : > { %4985 = vst [vmem:[#allocation22_spill] sm:$0xff] %v3725_v20  ;;  %v517_v1 = vpop.f32.mrf.mxu0  ;;  %v592_v42 = vpop.f32.mrf.mxu1 }
 0x16e   : > { %4986 = vst [vmem:[#allocation23_spill] sm:$0xff] %v3727_v2 }
 0x174   : > { %v3729_v34 = vpop.f32.mrf.mxu2  ;;  %v3731_v32 = vpop.f32.mrf.mxu3 }
 0x175   : > { %4987 = vst [vmem:[#allocation24_spill] sm:$0xff] %v3729_v34  ;;  %v603_v39 = vpop.f32.mrf.mxu0  ;;  %v678_v17 = vpop.f32.mrf.mxu1 }
 0x176   : > { %4988 = vst [vmem:[#allocation25_spill] sm:$0xff] %v3731_v32 }
 0x177   : > { %2695 = vmatmul.msk.bf16.gmra.mxu1 %vm370_vm1, %v3373_v48 }
 0x178   : > { %2681 = vmatmul.msk.bf16.gmra.mxu0 %vm370_vm1, %v3373_v48 }
 0x179   : > { %2713 = vmatmul.msk.bf16.gmra.mxu2 %vm370_vm1, %v3421_v62  ;;  %2727 = vmatmul.msk.bf16.gmra.mxu3 %vm370_vm1, %v3421_v62 }
 0x17c   : > { %v3741_v45 = vpop.f32.mrf.mxu2  ;;  %v3743_v42 = vpop.f32.mrf.mxu3 }
 0x17d   : > { %4989 = vst [vmem:[#allocation26_spill] sm:$0xff] %v3741_v45  ;;  %v604_v1 = vpop.f32.mrf.mxu0  ;;  %v679_v21 = vpop.f32.mrf.mxu1 }
 0x17e   : > { %4990 = vst [vmem:[#allocation27_spill] sm:$0xff] %v3743_v42  ;;  %v3745_v39 = vadd.f32 %v604_v1, %v502_v27  ;;  %v3747_v17 = vadd.f32 %v679_v21, %v577_v26 }
 0x184   : > { %v3749_v35 = vpop.f32.mrf.mxu2  ;;  %v3751_v36 = vpop.f32.mrf.mxu3 }
 0x185   : > { %4991 = vst [vmem:[#allocation28_spill] sm:$0xff] %v3749_v35  ;;  %v607_v18 = vpop.f32.mrf.mxu0  ;;  %v682_v19 = vpop.f32.mrf.mxu1 }
 0x186   : > { %4992 = vst [vmem:[#allocation29_spill] sm:$0xff] %v3751_v36  ;;  %v3753_v32 = vadd.f32 %v607_v18, %v505_v43  ;;  %v3755_v34 = vadd.f32 %v682_v19, %v580_v41 }
 0x187   : > { %2696 = vmatmul.msk.bf16.gmra.mxu1 %vm370_vm1, %v3385_v51 }
 0x188   : > { %2682 = vmatmul.msk.bf16.gmra.mxu0 %vm370_vm1, %v3385_v51 }
 0x189   : > { %2714 = vmatmul.msk.bf16.gmra.mxu2 %vm370_vm1, %v3441_v9  ;;  %2728 = vmatmul.msk.bf16.gmra.mxu3 %vm370_vm1, %v3441_v9 }
 0x18c   : > { %v3765_v27 = vpop.f32.mrf.mxu2  ;;  %v3767_v26 = vpop.f32.mrf.mxu3 }
 0x18d   : > { %4993 = vst [vmem:[#allocation30_spill] sm:$0xff] %v3765_v27  ;;  %v609_v43 = vpop.f32.mrf.mxu0  ;;  %v684_v1 = vpop.f32.mrf.mxu1 }
 0x18e   : > { %4994 = vst [vmem:[#allocation31_spill] sm:$0xff] %v3767_v26  ;;  %v3769_v41 = vadd.f32 %v609_v43, %v507_v7  ;;  %v3771_v21 = vadd.f32 %v684_v1, %v582_v8 }
 0x194   : > { %v919_v18 = vpop.f32.mrf.mxu2  ;;  %v994_v19 = vpop.f32.mrf.mxu3 }
 0x195   : > { %v753_v36 = vpop.f32.mrf.mxu0  ;;  %v828_v35 = vpop.f32.mrf.mxu1 }
 0x197   : > { %2697 = vmatmul.msk.bf16.gmra.mxu1 %vm370_vm1, %v3397_v54 }
 0x198   : > { %2683 = vmatmul.msk.bf16.gmra.mxu0 %vm370_vm1, %v3397_v54 }
 0x199   : > { %2715 = vmatmul.msk.bf16.gmra.mxu2 %vm370_vm1, %v3473_v28  ;;  %2729 = vmatmul.msk.bf16.gmra.mxu3 %vm370_vm1, %v3473_v28 }
 0x19c   : > { %v921_v7 = vpop.f32.mrf.mxu2  ;;  %v996_v43 = vpop.f32.mrf.mxu3 }
 0x19d   : > { %v754_v8 = vpop.f32.mrf.mxu0  ;;  %v829_v1 = vpop.f32.mrf.mxu1 }
 0x19e   : > { %v1320_v18 = vadd.f32 %v3633_v50, %v754_v8  ;;  %v1321_v35 = vadd.f32 %v3635_v52, %v829_v1 }
 0x1a0   : > { %v3783_v36 = vadd.f32 %v1320_v18, %v921_v7  ;;  %v3785_v19 = vadd.f32 %v1321_v35, %v996_v43 }
 0x1a4   : > { %v3787_v26 = vpop.f32.mrf.mxu2  ;;  %v3789_v27 = vpop.f32.mrf.mxu3 }
 0x1a5   : > { %4995 = vst [vmem:[#allocation32_spill] sm:$0xff] %v3789_v27  ;;  %v757_v42 = vpop.f32.mrf.mxu0  ;;  %v832_v45 = vpop.f32.mrf.mxu1 }
 0x1a6   : > { %v3792_v2 = vadd.f32 %v3645_v12, %v757_v42  ;;  %v3795_v20 = vadd.f32 %v3647_v13, %v832_v45 }
 0x1a7   : > { %2698 = vmatmul.msk.bf16.gmra.mxu1 %vm370_vm1, %v3409_v57 }
 0x1a8   : > { %4996 = vst [vmem:[#allocation33_spill] sm:$0xff] %v3795_v20  ;;  %2684 = vmatmul.msk.bf16.gmra.mxu0 %vm370_vm1, %v3409_v57 }
 0x1a9   : > { %2716 = vmatmul.msk.bf16.gmra.mxu2 %vm370_vm1, %v3507_v61  ;;  %2730 = vmatmul.msk.bf16.gmra.mxu3 %vm370_vm1, %v3507_v61 }
 0x1ac   : > { %v926_v50 = vpop.f32.mrf.mxu2  ;;  %v1001_v52 = vpop.f32.mrf.mxu3 }
 0x1ad   : > { %v759_v7 = vpop.f32.mrf.mxu0  ;;  %v834_v12 = vpop.f32.mrf.mxu1 }
 0x1ae   : > { %v1324_v42 = vadd.f32 %v3649_v23, %v759_v7  ;;  %v1325_v13 = vadd.f32 %v3651_v40, %v834_v12 }
 0x1b0   : > { %v3807_v45 = vadd.f32 %v1324_v42, %v926_v50  ;;  %v3809_v43 = vadd.f32 %v1325_v13, %v1001_v52 }
 0x1b4   : > { %v3811_v8 = vpop.f32.mrf.mxu2  ;;  %v3813_v1 = vpop.f32.mrf.mxu3 }
 0x1b5   : > { %4997 = vst [vmem:[#allocation34_spill] sm:$0xff] %v3811_v8  ;;  %v762_v18 = vpop.f32.mrf.mxu0  ;;  %v837_v35 = vpop.f32.mrf.mxu1 }
 0x1b6   : > { %4998 = vst [vmem:[#allocation35_spill] sm:$0xff] %v3813_v1  ;;  %v3816_v20 = vadd.f32 %v3661_v29, %v762_v18  ;;  %v3819_v27 = vadd.f32 %v3663_v30, %v837_v35 }
 0x1b7   : > { %2699 = vmatmul.msk.bf16.gmra.mxu1 %vm370_vm1, %v3421_v62 }
 0x1b8   : > { %4999 = vst [vmem:[#allocation36_spill] sm:$0xff] %v3816_v20  ;;  %2685 = vmatmul.msk.bf16.gmra.mxu0 %vm370_vm1, %v3421_v62 }
 0x1b9   : > { %5000 = vst [vmem:[#allocation37_spill] sm:$0xff] %v3819_v27 }
 0x1bc   : > { %v931_v23 = vpop.f32.mrf.mxu2  ;;  %v1006_v40 = vpop.f32.mrf.mxu3 }
 0x1bd   : > { %v764_v50 = vpop.f32.mrf.mxu0  ;;  %v839_v52 = vpop.f32.mrf.mxu1 }
 0x1be   : > { %v1328_v7 = vadd.f32 %v3665_v14, %v764_v50  ;;  %v1329_v12 = vadd.f32 %v3667_v15, %v839_v52 }
 0x1c0   : > { %v3827_v42 = vadd.f32 %v1328_v7, %v931_v23  ;;  %v3829_v29 = vadd.f32 %v1329_v12, %v1006_v40 }
 0x1c4   : > { %v3831_v30 = vpop.f32.mrf.mxu2  ;;  %v3833_v13 = vpop.f32.mrf.mxu3 }
 0x1c5   : > { %5001 = vst [vmem:[#allocation38_spill] sm:$0xff] %v3831_v30  ;;  %v767_v18 = vpop.f32.mrf.mxu0  ;;  %v842_v35 = vpop.f32.mrf.mxu1 }
 0x1c6   : > { %5002 = vst [vmem:[#allocation39_spill] sm:$0xff] %v3833_v13  ;;  %v3836_v27 = vadd.f32 %v3677_v53, %v767_v18  ;;  %v3839_v1 = vadd.f32 %v3679_v55, %v842_v35 }
 0x1c7   : > { %2700 = vmatmul.msk.bf16.gmra.mxu1 %vm370_vm1, %v3441_v9 }
 0x1c8   : > { %5003 = vst [vmem:[#allocation40_spill] sm:$0xff] %v3836_v27  ;;  %2686 = vmatmul.msk.bf16.gmra.mxu0 %vm370_vm1, %v3441_v9 }
 0x1c9   : > { %5004 = vst [vmem:[#allocation41_spill] sm:$0xff] %v3839_v1 }
 0x1cc   : > { %v936_v14 = vpop.f32.mrf.mxu2  ;;  %v1011_v15 = vpop.f32.mrf.mxu3 }
 0x1cd   : > { %v769_v23 = vpop.f32.mrf.mxu0  ;;  %v844_v40 = vpop.f32.mrf.mxu1 }
 0x1d4   : > { %v3845_v50 = vpop.f32.mrf.mxu2  ;;  %v3847_v52 = vpop.f32.mrf.mxu3 }
 0x1d5   : > { %v771_v7 = vpop.f32.mrf.mxu0  ;;  %v846_v53 = vpop.f32.mrf.mxu1 }
 0x1d6   : > { %v3850_v12 = vadd.f32 %v3745_v39, %v771_v7  ;;  %v3853_v55 = vadd.f32 %v3747_v17, %v846_v53 }
 0x1d7   : > { %2701 = vmatmul.msk.bf16.gmra.mxu1 %vm370_vm1, %v3473_v28 }
 0x1d8   : > { %2687 = vmatmul.msk.bf16.gmra.mxu0 %vm370_vm1, %v3473_v28 }
 0x1dc   : > { %v940_v18 = vpop.f32.mrf.mxu2  ;;  %v1015_v35 = vpop.f32.mrf.mxu3 }
 0x1dd   : > { %v773_v14 = vpop.f32.mrf.mxu0  ;;  %v848_v15 = vpop.f32.mrf.mxu1 }
 0x1de   : > { %v1370_v23 = vadd.f32 %v3753_v32, %v773_v14  ;;  %v1371_v40 = vadd.f32 %v3755_v34, %v848_v15  ;;  %v1362_v32 = vadd.f32 %v3431_v63, %v3681_v60  ;;  %v1363_v34 = vadd.f32 %v3433_v0, %v3683_v59 }
 0x1e0   : > { %v3861_v1 = vadd.f32 %v1370_v23, %v940_v18  ;;  %v3863_v39 = vadd.f32 %v1371_v40, %v1015_v35  ;;  %v1364_v40 = vadd.f32 %v3437_v5, %v3693_v22  ;;  %v1366_v5 = vadd.f32 %v3451_v10, %v3701_v49 }
 0x1e4   : > { %v3865_v17 = vpop.f32.mrf.mxu2  ;;  %v3867_v7 = vpop.f32.mrf.mxu3 }
 0x1e5   : > { %5005 = vst [vmem:[#allocation42_spill] sm:$0xff] %v3867_v7  ;;  %v776_v53 = vpop.f32.mrf.mxu0  ;;  %v851_v13 = vpop.f32.mrf.mxu1  ;;  %v5032_v7 = vld [vmem:[#allocation18_spill] sm:$0xff] }
 0x1e6   : > { %v3870_v27 = vadd.f32 %v3769_v41, %v776_v53  ;;  %v3873_v30 = vadd.f32 %v3771_v21, %v851_v13  ;;  %v1365_v53 = vadd.f32 %v3439_v6, %v3695_v37  ;;  %v1367_v6 = vadd.f32 %v3453_v11, %v3703_v47  ;;  %v1498_v47 = vld [vmem:[%s4955_s2 + $0x230] sm:$0xff] }
 0x1e7   : > { %2702 = vmatmul.msk.bf16.gmra.mxu1 %vm370_vm1, %v3507_v61  ;;  %v1719_v49 = vunpack.c.h.b16 %v1498_v47 }
 0x1e8   : > { %5006 = vst [vmem:[#allocation43_spill] sm:$0xff] %v3870_v27  ;;  %2688 = vmatmul.msk.bf16.gmra.mxu0 %vm370_vm1, %v3507_v61 }
 0x1e9   : > { %5007 = vst [vmem:[#allocation44_spill] sm:$0xff] %v3873_v30 }
 0x1ec   : > { %v945_v18 = vpop.f32.mrf.mxu2  ;;  %v1020_v35 = vpop.f32.mrf.mxu3 }
 0x1ed   : > { %v778_v14 = vpop.f32.mrf.mxu0  ;;  %v853_v41 = vpop.f32.mrf.mxu1 }
 0x1ee   : > { %v1374_v15 = vadd.f32 %v1362_v32, %v778_v14  ;;  %v1375_v23 = vadd.f32 %v1363_v34, %v853_v41 }
 0x1f0   : > { %v3883_v21 = vadd.f32 %v1374_v15, %v945_v18  ;;  %v3885_v13 = vadd.f32 %v1375_v23, %v1020_v35 }
 0x1f2   : > { %5008 = vst [vmem:[#allocation45_spill] sm:$0xff] %v3883_v21 }
 0x1f3   : > { %5009 = vst [vmem:[#allocation46_spill] sm:$0xff] %v3885_v13  ;;  %v5031_v13 = vld [vmem:[#allocation17_spill] sm:$0xff] }
 0x1f4   : > { %v3891_v63 = vpop.f32.mrf.mxu2  ;;  %v3893_v60 = vpop.f32.mrf.mxu3 }
 0x1f5   : > { %5010 = vst [vmem:[#allocation47_spill] sm:$0xff] %v3891_v63  ;;  %v781_v0 = vpop.f32.mrf.mxu0  ;;  %v856_v59 = vpop.f32.mrf.mxu1 }
 0x1f6   : > { %5011 = vst [vmem:[#allocation48_spill] sm:$0xff] %v3893_v60  ;;  %v3895_v20 = vadd.f32 %v1364_v40, %v781_v0  ;;  %v3897_v32 = vadd.f32 %v1365_v53, %v856_v59  ;;  %v1718_v0 = vunpack.c.l.b16 %v1498_v47  ;;  %v1799_v59 = vpack.c.b16 %v1719_v49, %v1719_v49 }
 0x1f7   : > { %2745 = vmatmul.msk.bf16.vlgmr.msrb.gmra.mxu1 %vm370_vm1, %v3318_v31 }
 0x1f8   : > { %5012 = vst [vmem:[#allocation49_spill] sm:$0xff] %v3895_v20  ;;  %2731 = vmatmul.msk.bf16.vlgmr.msrb.gmra.mxu0 %vm370_vm1, %v3318_v31  ;;  %v5021_v20 = vld [vmem:[#allocation8_spill] sm:$0xff] }
 0x1f9   : > { %5013 = vst [vmem:[#allocation50_spill] sm:$0xff] %v3897_v32  ;;  %v5020_v32 = vld [vmem:[#allocation3_spill] sm:$0xff] }
 0x1fc   : > { %v950_v22 = vpop.f32.mrf.mxu2  ;;  %v1025_v37 = vpop.f32.mrf.mxu3 }
 0x1fd   : > { %v783_v34 = vpop.f32.mrf.mxu0  ;;  %v858_v18 = vpop.f32.mrf.mxu1 }
 0x1fe   : > { %v1378_v35 = vadd.f32 %v1366_v5, %v783_v34  ;;  %v1379_v14 = vadd.f32 %v1367_v6, %v858_v18  ;;  %v1798_v5 = vpack.c.b16 %v1718_v0, %v1718_v0 }
 0x200   : > { %v3907_v41 = vadd.f32 %v1378_v35, %v950_v22  ;;  %v3909_v15 = vadd.f32 %v1379_v14, %v1025_v37  ;;  %v1899_v22 = vsel %vm1897_vm2, %v1798_v5, 0 }
 0x201   : > { %1928 = vmatpush.bf16.msra.mxu2 %v1899_v22 }
 0x202   : > { %5014 = vst [vmem:[#allocation51_spill] sm:$0xff] %v3907_v41 }
 0x203   : > { %5015 = vst [vmem:[#allocation52_spill] sm:$0xff] %v3909_v15 }
 0x204   : > { %v3911_v23 = vpop.f32.mrf.mxu2  ;;  %v3913_v40 = vpop.f32.mrf.mxu3 }
 0x205   : > { %v786_v31 = vpop.f32.mrf.mxu0  ;;  %v861_v53 = vpop.f32.mrf.mxu1 }
 0x206   : > { %v3916_v10 = vadd.f32 %v3469_v24, %v786_v31  ;;  %v3919_v11 = vadd.f32 %v3471_v25, %v861_v53  ;;  %v1902_v24 = vsel %vm1897_vm2, %v1799_v59, 0 }
 0x207   : > { %2746 = vmatmul.msk.bf16.gmra.mxu1 %vm370_vm1, %v3335_v38  ;;  %1963 = vmatpush.bf16.msra.mxu3 %v1902_v24 }
 0x208   : > { %2732 = vmatmul.msk.bf16.gmra.mxu0 %vm370_vm1, %v3335_v38 }
 0x20c   : > { %v955_v6 = vpop.f32.mrf.mxu2  ;;  %v1030_v25 = vpop.f32.mrf.mxu3 }
 0x20d   : > { %v788_v37 = vpop.f32.mrf.mxu0  ;;  %v863_v34 = vpop.f32.mrf.mxu1 }
 0x20e   : > { %v1208_v18 = vadd.f32 %v3497_v44, %v788_v37  ;;  %v1209_v35 = vadd.f32 %v3499_v46, %v863_v34  ;;  %v3187_v37 = vld [vmem:[%s4955_s2 + $0x204] sm:$0xf0] }
 0x210   : > { %v3932_v14 = vadd.f32 %v1208_v18, %v955_v6  ;;  %v3934_v38 = vadd.f32 %v1209_v35, %v1030_v25 }
 0x214   : > { %v3936_v31 = vpop.f32.mrf.mxu2  ;;  %v3938_v53 = vpop.f32.mrf.mxu3 }
 0x215   : > { %v791_v47 = vpop.f32.mrf.mxu0  ;;  %v866_v49 = vpop.f32.mrf.mxu1 }
 0x216   : > { %v3941_v0 = vadd.f32 %v3503_v56, %v791_v47  ;;  %v3944_v59 = vadd.f32 %v3505_v58, %v866_v49  ;;  %v3182_v56 = vld [vmem:[%s4955_s2 + $0x1e4] sm:$0xf]  ;;  %v3003_v58 = vld [vmem:[%s4955_s2 + $0x208] sm:$0xf0] }
 0x217   : > { %2747 = vmatmul.msk.bf16.gmra.mxu1 %vm370_vm1, %v3321_v33  ;;  %v3006_v22 = vor.u32 %v3182_v56, %v3003_v58  ;;  %v5017_v58 = vld [vmem:[#allocation2_spill] sm:$0xff] }
 0x218   : > { %2733 = vmatmul.msk.bf16.gmra.mxu0 %vm370_vm1, %v3321_v33  ;;  %v3001_v33 = vld [vmem:[%s4955_s2 + $0x1e0] sm:$0xf] }
 0x219   : > { %v3002_v34 = vor.u32 %v3187_v37, %v3001_v33  ;;  %1964 = vmatpush.bf16.msra.mxu3 %v3006_v22  ;;  %v5018_v33 = vld [vmem:[#allocation6_spill] sm:$0xff]  ;;  %v5019_v37 = vld [vmem:[#allocation7_spill] sm:$0xff] }
 0x21b   : > { %1929 = vmatpush.bf16.msra.mxu2 %v3002_v34 }
 0x21c   : > { %v960_v44 = vpop.f32.mrf.mxu2  ;;  %v1035_v46 = vpop.f32.mrf.mxu3 }
 0x21d   : > { %v793_v5 = vpop.f32.mrf.mxu0  ;;  %v868_v24 = vpop.f32.mrf.mxu1 }
 0x21e   : > { %v1212_v6 = vadd.f32 %v3517_v3, %v793_v5  ;;  %v1213_v25 = vadd.f32 %v3519_v4, %v868_v24  ;;  %v5016_v24 = vld [vmem:[#allocation5_spill] sm:$0xff] }
 0x220   : > { %v3964_v3 = vadd.f32 %v1212_v6, %v960_v44  ;;  %v3966_v4 = vadd.f32 %v1213_v25, %v1035_v46 }
 0x224   : > { %v3968_v18 = vpop.f32.mrf.mxu2  ;;  %v3970_v35 = vpop.f32.mrf.mxu3 }
 0x225   : > { %v796_v47 = vpop.f32.mrf.mxu0  ;;  %v871_v49 = vpop.f32.mrf.mxu1 }
 0x226   : > { %v3973_v5 = vadd.f32 %v3521_v16, %v796_v47  ;;  %v3976_v56 = vadd.f32 %v5016_v24, %v871_v49 }
 0x227   : > { %2748 = vmatmul.msk.bf16.gmra.mxu1 %vm370_vm1, %v5017_v58 }
 0x228   : > { %2734 = vmatmul.msk.bf16.gmra.mxu0 %vm370_vm1, %v5017_v58 }
 0x22c   : > { %v965_v44 = vpop.f32.mrf.mxu2  ;;  %v1040_v46 = vpop.f32.mrf.mxu3 }
 0x22d   : > { %v798_v6 = vpop.f32.mrf.mxu0  ;;  %v873_v25 = vpop.f32.mrf.mxu1 }
 0x22e   : > { %v1216_v22 = vadd.f32 %v5018_v33, %v798_v6  ;;  %v1217_v34 = vadd.f32 %v5019_v37, %v873_v25  ;;  %v5022_v25 = vld [vmem:[#allocation9_spill] sm:$0xff] }
 0x230   : > { %v3984_v15 = vadd.f32 %v1216_v22, %v965_v44  ;;  %v3986_v16 = vadd.f32 %v1217_v34, %v1040_v46  ;;  %v3172_v46 = vld [vmem:[%s4955_s2 + $0x194] sm:$0xf]  ;;  %v5023_v34 = vld [vmem:[#allocation10_spill] sm:$0xff] }
 0x234   : > { %v967_v47 = vpop.f32.mrf.mxu2  ;;  %v1042_v49 = vpop.f32.mrf.mxu3 }
 0x235   : > { %v801_v24 = vpop.f32.mrf.mxu0  ;;  %v876_v41 = vpop.f32.mrf.mxu1  ;;  %v5024_v49 = vld [vmem:[#allocation11_spill] sm:$0xff] }
 0x236   : > { %v2963_v41 = vld [vmem:[%s4955_s2 + $0x1b8] sm:$0xf0] }
 0x237   : > { %2749 = vmatmul.msk.bf16.gmra.mxu1 %vm370_vm1, %v5020_v32  ;;  %v2966_v33 = vor.u32 %v3172_v46, %v2963_v41  ;;  %v5026_v41 = vld [vmem:[#allocation12_spill] sm:$0xff] }
 0x238   : > { %2735 = vmatmul.msk.bf16.gmra.mxu0 %vm370_vm1, %v5020_v32  ;;  %v2961_v32 = vld [vmem:[%s4955_s2 + $0x190] sm:$0xf] }
 0x239   : > { %1965 = vmatpush.bf16.msra.mxu3 %v2966_v33  ;;  %v5027_v33 = vld [vmem:[#allocation13_spill] sm:$0xff] }
 0x23d   : > { %v802_v58 = vpop.f32.mrf.mxu0  ;;  %v877_v60 = vpop.f32.mrf.mxu1 }
 0x23e   : > { %v3993_v6 = vadd.f32 %v5021_v20, %v802_v58  ;;  %v3996_v44 = vadd.f32 %v5022_v25, %v877_v60  ;;  %v3177_v20 = vld [vmem:[%s4955_s2 + $0x1b4] sm:$0xf0]  ;;  %v5025_v58 = vld [vmem:[#allocation4_spill] sm:$0xff] }
 0x23f   : > { %v2962_v22 = vor.u32 %v3177_v20, %v2961_v32 }
 0x241   : > { %1930 = vmatpush.bf16.msra.mxu2 %v2962_v22 }
 0x245   : > { %v805_v60 = vpop.f32.mrf.mxu0  ;;  %v880_v37 = vpop.f32.mrf.mxu1 }
 0x246   : > { %v4011_v47 = vadd.f32 %v5023_v34, %v805_v60  ;;  %v4014_v24 = vadd.f32 %v5024_v49, %v880_v37  ;;  %v5028_v34 = vld [vmem:[#allocation14_spill] sm:$0xff]  ;;  %v5029_v37 = vld [vmem:[#allocation15_spill] sm:$0xff] }
 0x247   : > { %2750 = vmatmul.msk.bf16.gmra.mxu1 %vm370_vm1, %v5025_v58 }
 0x248   : > { %2736 = vmatmul.msk.bf16.gmra.mxu0 %vm370_vm1, %v5025_v58  ;;  %v3162_v58 = vld [vmem:[%s4955_s2 + $0x144] sm:$0xf] }
 0x24d   : > { %v807_v25 = vpop.f32.mrf.mxu0  ;;  %v882_v46 = vpop.f32.mrf.mxu1 }
 0x24e   : > { %v4021_v32 = vadd.f32 %v5026_v41, %v807_v25  ;;  %v4024_v20 = vadd.f32 %v5027_v33, %v882_v46  ;;  %v2923_v25 = vld [vmem:[%s4955_s2 + $0x168] sm:$0xf0]  ;;  %v2921_v46 = vld [vmem:[%s4955_s2 + $0x140] sm:$0xf]  ;;  %v3167_v33 = vld [vmem:[%s4955_s2 + $0x164] sm:$0xf0] }
 0x24f   : > { %v2926_v41 = vor.u32 %v3162_v58, %v2923_v25  ;;  %v5033_v58 = vld [vmem:[#allocation19_spill] sm:$0xff] }
 0x251   : > { %1966 = vmatpush.bf16.msra.mxu3 %v2926_v41 }
 0x255   : > { %v810_v22 = vpop.f32.mrf.mxu0  ;;  %v885_v60 = vpop.f32.mrf.mxu1 }
 0x256   : > { %v4027_v63 = vadd.f32 %v5028_v34, %v810_v22  ;;  %v4030_v49 = vadd.f32 %v5029_v37, %v885_v60  ;;  %v2922_v22 = vor.u32 %v3167_v33, %v2921_v46  ;;  %v5030_v34 = vld [vmem:[#allocation16_spill] sm:$0xff] }
 0x257   : > { %2751 = vmatmul.msk.bf16.gmra.mxu1 %vm370_vm1, %v3373_v48 }
 0x258   : > { %2737 = vmatmul.msk.bf16.gmra.mxu0 %vm370_vm1, %v3373_v48  ;;  %1931 = vmatpush.bf16.msra.mxu2 %v2922_v22 }
 0x25d   : > { %v812_v48 = vpop.f32.mrf.mxu0  ;;  %v887_v60 = vpop.f32.mrf.mxu1 }
 0x25e   : > { %v4049_v37 = vadd.f32 %v5030_v34, %v812_v48  ;;  %v4052_v21 = vadd.f32 %v5031_v13, %v887_v60  ;;  %v3152_v13 = vld [vmem:[%s4955_s2 + $0xf4] sm:$0xf]  ;;  %v1218_v60 = vadd.f32 %v3916_v10, %v3911_v23  ;;  %v1219_v34 = vadd.f32 %v3919_v11, %v3913_v40 }
 0x25f   : > { %v1222_v23 = vadd.f32 %v3941_v0, %v3936_v31  ;;  %v1223_v40 = vadd.f32 %v3944_v59, %v3938_v53  ;;  %v3147_v53 = vld [vmem:[%s4955_s2 + $0xc4] sm:$0xf0] }
 0x265   : > { %v815_v8 = vpop.f32.mrf.mxu0  ;;  %v890_v30 = vpop.f32.mrf.mxu1 }
 0x266   : > { %v4055_v27 = vadd.f32 %v5032_v7, %v815_v8  ;;  %v4058_v25 = vadd.f32 %v5033_v58, %v890_v30  ;;  %v2883_v8 = vld [vmem:[%s4955_s2 + $0x118] sm:$0xf0]  ;;  %v3157_v7 = vld [vmem:[%s4955_s2 + $0x114] sm:$0xf0] }
 0x267   : > { %2752 = vmatmul.msk.bf16.gmra.mxu1 %vm370_vm1, %v3385_v51  ;;  %v2886_v30 = vor.u32 %v3152_v13, %v2883_v8  ;;  %v3142_v13 = vld [vmem:[%s4955_s2 + $0xa4] sm:$0xf]  ;;  %v2843_v8 = vld [vmem:[%s4955_s2 + $0xc8] sm:$0xf0] }
 0x268   : > { %2738 = vmatmul.msk.bf16.gmra.mxu0 %vm370_vm1, %v3385_v51  ;;  %v2881_v51 = vld [vmem:[%s4955_s2 + $0xf0] sm:$0xf]  ;;  %v2846_v0 = vor.u32 %v3142_v13, %v2843_v8  ;;  %v3185_v13 = vld [vmem:[%s4955_s2 + $0x1fc] sm:$0xf]  ;;  %v1227_v8 = vadd.f32 %v3976_v56, %v3970_v35 }
 0x269   : > { %1967 = vmatpush.bf16.msra.mxu3 %v2886_v30  ;;  %v2882_v48 = vor.u32 %v3157_v7, %v2881_v51  ;;  %v1501_v51 = vld [vmem:[%s4955_s2 + $0x248] sm:$0xff] }
 0x26b   : > { %1932 = vmatpush.bf16.msra.mxu2 %v2882_v48 }
 0x26d   : > { %v817_v46 = vpop.f32.mrf.mxu0  ;;  %v892_v41 = vpop.f32.mrf.mxu1  ;;  %1968 = vmatpush.bf16.msra.mxu3 %v2846_v0  ;;  %v3027_v0 = vld [vmem:[%s4955_s2 + $0x220] sm:$0xf0] }
 0x275   : > { %v1053_v33 = vpop.f32.mrf.mxu0  ;;  %v1128_v22 = vpop.f32.mrf.mxu1 }
 0x277   : > { %2753 = vmatmul.msk.bf16.gmra.mxu1 %vm370_vm1, %v3397_v54 }
 0x278   : > { %2739 = vmatmul.msk.bf16.gmra.mxu0 %vm370_vm1, %v3397_v54 }
 0x27d   : > { %v1054_v58 = vpop.f32.mrf.mxu0  ;;  %v1129_v46 = vpop.f32.mrf.mxu1 }
 0x27e   : > { %v4084_v54 = vadd.f32 %v1218_v60, %v1054_v58  ;;  %v4086_v41 = vadd.f32 %v1219_v34, %v1129_v46  ;;  %v1724_v60 = vunpack.c.l.b16 %v1501_v51  ;;  %v1725_v34 = vunpack.c.h.b16 %v1501_v51 }
 0x27f   : > { %v3030_v51 = vor.u32 %v3185_v13, %v3027_v0  ;;  %v2987_v13 = vld [vmem:[%s4955_s2 + $0x1d0] sm:$0xf0]  ;;  %v3122_v0 = vld [vmem:[%s4955_s2 + $0x4] sm:$0xf] }
 0x280   : > { %v1804_v58 = vpack.c.b16 %v1724_v60, %v1724_v60  ;;  %v1805_v46 = vpack.c.b16 %v1725_v34, %v1725_v34  ;;  %v2801_v60 = vld [vmem:[%s4955_s2 + $0x50] sm:$0xf]  ;;  %v3137_v34 = vld [vmem:[%s4955_s2 + $0x74] sm:$0xf0] }
 0x281   : > { %v2802_v56 = vor.u32 %v3137_v34, %v2801_v60  ;;  %v2945_v60 = vld [vmem:[%s4955_s2 + $0x158] sm:$0xf]  ;;  %v3170_v34 = vld [vmem:[%s4955_s2 + $0x17c] sm:$0xf0] }
 0x285   : > { %v4088_v33 = vpop.f32.mrf.mxu0  ;;  %v4090_v22 = vpop.f32.mrf.mxu1 }
 0x287   : > { %2754 = vmatmul.msk.bf16.gmra.mxu1 %vm370_vm1, %v3409_v57 }
 0x288   : > { %2740 = vmatmul.msk.bf16.gmra.mxu0 %vm370_vm1, %v3409_v57  ;;  %v2841_v57 = vld [vmem:[%s4955_s2 + $0xa0] sm:$0xf] }
 0x289   : > { %v2842_v59 = vor.u32 %v3147_v53, %v2841_v57 }
 0x28b   : > { %1933 = vmatpush.bf16.msra.mxu2 %v2842_v59 }
 0x28d   : > { %v1059_v10 = vpop.f32.mrf.mxu0  ;;  %v1134_v11 = vpop.f32.mrf.mxu1 }
 0x28e   : > { %v4109_v30 = vadd.f32 %v1222_v23, %v1059_v10  ;;  %v4111_v31 = vadd.f32 %v1223_v40, %v1134_v11  ;;  %v1917_v23 = vsel %vm1897_vm2, %v1804_v58, 0  ;;  %v1920_v40 = vsel %vm1897_vm2, %v1805_v46, 0  ;;  %v3025_v10 = vld [vmem:[%s4955_s2 + $0x1f8] sm:$0xf]  ;;  %v3190_v11 = vld [vmem:[%s4955_s2 + $0x21c] sm:$0xf0] }
 0x28f   : > { %2138 = vmatpush.bf16.msra.mxu0 %v1917_v23  ;;  %2173 = vmatpush.bf16.msra.mxu1 %v1920_v40  ;;  %v3026_v57 = vor.u32 %v3190_v11, %v3025_v10  ;;  %v2803_v58 = vld [vmem:[%s4955_s2 + $0x78] sm:$0xf0]  ;;  %v2985_v23 = vld [vmem:[%s4955_s2 + $0x1a8] sm:$0xf]  ;;  %v3180_v40 = vld [vmem:[%s4955_s2 + $0x1cc] sm:$0xf0] }
 0x290   : > { %v3175_v10 = vld [vmem:[%s4955_s2 + $0x1ac] sm:$0xf]  ;;  %1934 = vmatpush.bf16.msra.mxu2 %v2802_v56  ;;  %v2986_v11 = vor.u32 %v3180_v40, %v2985_v23  ;;  %v2946_v56 = vor.u32 %v3170_v34, %v2945_v60 }
 0x293   : > { %2139 = vmatpush.bf16.msra.mxu0 %v3026_v57  ;;  %2174 = vmatpush.bf16.msra.mxu1 %v3030_v51  ;;  %v3127_v57 = vld [vmem:[%s4955_s2 + $0x24] sm:$0xf0] }
 0x295   : > { %v4119_v7 = vpop.f32.mrf.mxu0  ;;  %v4121_v48 = vpop.f32.mrf.mxu1 }
 0x297   : > { %2755 = vmatmul.msk.bf16.gmra.mxu1 %vm370_vm1, %v3421_v62  ;;  %2140 = vmatpush.bf16.msra.mxu0 %v2986_v11  ;;  %v3160_v11 = vld [vmem:[%s4955_s2 + $0x12c] sm:$0xf0] }
 0x298   : > { %2741 = vmatmul.msk.bf16.gmra.mxu0 %vm370_vm1, %v3421_v62  ;;  %v1226_v62 = vadd.f32 %v3973_v5, %v3968_v18  ;;  %v3132_v18 = vld [vmem:[%s4955_s2 + $0x54] sm:$0xf] }
 0x299   : > { %v2806_v46 = vor.u32 %v3132_v18, %v2803_v58  ;;  %v3165_v18 = vld [vmem:[%s4955_s2 + $0x15c] sm:$0xf]  ;;  %v2947_v58 = vld [vmem:[%s4955_s2 + $0x180] sm:$0xf0] }
 0x29a   : > { %v2950_v40 = vor.u32 %v3165_v18, %v2947_v58  ;;  %v3140_v58 = vld [vmem:[%s4955_s2 + $0x8c] sm:$0xf0] }
 0x29b   : > { %1969 = vmatpush.bf16.msra.mxu3 %v2806_v46  ;;  %2141 = vmatpush.bf16.msra.mxu0 %v2946_v56  ;;  %v2825_v56 = vld [vmem:[%s4955_s2 + $0x68] sm:$0xf] }
 0x29d   : > { %v1064_v53 = vpop.f32.mrf.mxu0  ;;  %v1139_v59 = vpop.f32.mrf.mxu1 }
 0x29e   : > { %v4154_v35 = vadd.f32 %v1226_v62, %v1064_v53  ;;  %v4156_v5 = vadd.f32 %v1227_v8, %v1139_v59  ;;  %v2990_v62 = vor.u32 %v3175_v10, %v2987_v13  ;;  %v2761_v8 = vld [vmem:[%s4955_s2] sm:$0xf]  ;;  %v2763_v59 = vld [vmem:[%s4955_s2 + $0x28] sm:$0xf0]  ;;  %v2905_v10 = vld [vmem:[%s4955_s2 + $0x108] sm:$0xf] }
 0x29f   : > { %v2762_v53 = vor.u32 %v3127_v57, %v2761_v8  ;;  %v2766_v51 = vor.u32 %v3122_v0, %v2763_v59  ;;  %v3155_v13 = vld [vmem:[%s4955_s2 + $0x10c] sm:$0xf]  ;;  %v2907_v8 = vld [vmem:[%s4955_s2 + $0x130] sm:$0xf0]  ;;  %v2865_v0 = vld [vmem:[%s4955_s2 + $0xb8] sm:$0xf] }
 0x2a0   : > { %2175 = vmatpush.bf16.msra.mxu1 %v2990_v62  ;;  %v2906_v62 = vor.u32 %v3160_v11, %v2905_v10  ;;  %v2910_v57 = vor.u32 %v3155_v13, %v2907_v8  ;;  %v2826_v10 = vor.u32 %v3140_v58, %v2825_v56  ;;  %v2827_v11 = vld [vmem:[%s4955_s2 + $0x90] sm:$0xf0]  ;;  %v3130_v8 = vld [vmem:[%s4955_s2 + $0x3c] sm:$0xf0] }
 0x2a1   : > { %1935 = vmatpush.bf16.msra.mxu2 %v2762_v53  ;;  %1970 = vmatpush.bf16.msra.mxu3 %v2766_v51  ;;  %v3150_v53 = vld [vmem:[%s4955_s2 + $0xdc] sm:$0xf0]  ;;  %v2867_v51 = vld [vmem:[%s4955_s2 + $0xe0] sm:$0xf0] }
 0x2a2   : > { %2142 = vmatpush.bf16.msra.mxu0 %v2906_v62  ;;  %v2866_v59 = vor.u32 %v3150_v53, %v2865_v0  ;;  %v2785_v62 = vld [vmem:[%s4955_s2 + $0x18] sm:$0xf]  ;;  %v5034_v0 = vld [vmem:[#allocation20_spill] sm:$0xff] }
 0x2a3   : > { %v1266_v53 = vadd.f32 %v3993_v6, %v5034_v0 }
 0x2a4   : > { %2176 = vmatpush.bf16.msra.mxu1 %v2950_v40  ;;  %v3135_v40 = vld [vmem:[%s4955_s2 + $0x6c] sm:$0xf] }
 0x2a5   : > { %v4197_v46 = vpop.f32.mrf.mxu0  ;;  %v4199_v23 = vpop.f32.mrf.mxu1  ;;  %v2830_v13 = vor.u32 %v3135_v40, %v2827_v11 }
 0x2a6   : > { %2143 = vmatpush.bf16.msra.mxu0 %v2866_v59 }
 0x2a7   : > { %2756 = vmatmul.msk.bf16.gmra.mxu1 %vm370_vm1, %v3441_v9 }
 0x2a8   : > { %2742 = vmatmul.msk.bf16.gmra.mxu0 %vm370_vm1, %v3441_v9  ;;  %2177 = vmatpush.bf16.msra.mxu1 %v2910_v57  ;;  %v3145_v9 = vld [vmem:[%s4955_s2 + $0xbc] sm:$0xf] }
 0x2a9   : > { %v2870_v18 = vor.u32 %v3145_v9, %v2867_v51  ;;  %v3125_v57 = vld [vmem:[%s4955_s2 + $0x1c] sm:$0xf]  ;;  %v2786_v51 = vor.u32 %v3130_v8, %v2785_v62  ;;  %v5037_v62 = vld [vmem:[#allocation23_spill] sm:$0xff] }
 0x2aa   : > { %2144 = vmatpush.bf16.msra.mxu0 %v2826_v10  ;;  %v5035_v9 = vld [vmem:[#allocation21_spill] sm:$0xff]  ;;  %v1269_v8 = vadd.f32 %v4014_v24, %v5037_v62 }
 0x2ab   : > { %v1267_v59 = vadd.f32 %v3996_v44, %v5035_v9  ;;  %v5036_v44 = vld [vmem:[#allocation22_spill] sm:$0xff]  ;;  %v5039_v24 = vld [vmem:[#allocation25_spill] sm:$0xff] }
 0x2ac   : > { %2178 = vmatpush.bf16.msra.mxu1 %v2870_v18 }
 0x2ad   : > { %v1069_v60 = vpop.f32.mrf.mxu0  ;;  %v1144_v34 = vpop.f32.mrf.mxu1 }
 0x2ae   : > { %v2787_v60 = vld [vmem:[%s4955_s2 + $0x40] sm:$0xf0]  ;;  %2145 = vmatpush.bf16.msra.mxu0 %v2786_v51 }
 0x2af   : > { %v2790_v56 = vor.u32 %v3125_v57, %v2787_v60 }
 0x2b0   : > { %2179 = vmatpush.bf16.msra.mxu1 %v2830_v13  ;;  %v1268_v13 = vadd.f32 %v4011_v47, %v5036_v44  ;;  %v5038_v47 = vld [vmem:[#allocation24_spill] sm:$0xff] }
 0x2b4   : > { %2180 = vmatpush.bf16.msra.mxu1 %v2790_v56 }
 0x2b5   : > { %v1071_v34 = vpop.f32.mrf.mxu0  ;;  %v1146_v18 = vpop.f32.mrf.mxu1 }
 0x2b6   : > { %v1278_v58 = vadd.f32 %v1266_v53, %v1071_v34  ;;  %v1279_v40 = vadd.f32 %v1267_v59, %v1146_v18  ;;  %v1270_v34 = vadd.f32 %v4021_v32, %v5038_v47  ;;  %v1271_v18 = vadd.f32 %v4024_v20, %v5039_v24  ;;  %v5040_v20 = vld [vmem:[#allocation26_spill] sm:$0xff] }
 0x2b7   : > { %2757 = vmatmul.msk.bf16.gmra.mxu1 %vm370_vm1, %v3473_v28 }
 0x2b8   : > { %v1290_v10 = vmax.f32 %v4084_v54, %v1278_v58  ;;  %v1291_v11 = vmax.f32 %v4086_v41, %v1279_v40  ;;  %2743 = vmatmul.msk.bf16.gmra.mxu0 %vm370_vm1, %v3473_v28  ;;  %v1232_v54 = vadd.f32 %v3932_v14, %v4088_v33  ;;  %v1233_v41 = vadd.f32 %v3934_v38, %v4090_v22 }
 0x2b9   : > { %v1272_v40 = vadd.f32 %v4027_v63, %v5040_v20 }
 0x2ba   : > { %v1302_v6 = vmax.f32 %v1290_v10, %v1291_v11  ;;  %v5041_v10 = vld [vmem:[#allocation27_spill] sm:$0xff] }
 0x2bb   : > { %v1273_v11 = vadd.f32 %v4030_v49, %v5041_v10  ;;  %v3183_v10 = vld [vmem:[%s4955_s2 + $0x1ec] sm:$0xf] }
 0x2bd   : > { %v1073_v57 = vpop.f32.mrf.mxu0  ;;  %v1148_v0 = vpop.f32.mrf.mxu1 }
 0x2be   : > { %v1280_v53 = vadd.f32 %v1268_v13, %v1073_v57  ;;  %v1281_v9 = vadd.f32 %v1269_v8, %v1148_v0 }
 0x2c0   : > { %v1292_v59 = vmax.f32 %v1232_v54, %v1280_v53  ;;  %v1293_v51 = vmax.f32 %v1233_v41, %v1281_v9  ;;  %v5042_v54 = vld [vmem:[#allocation28_spill] sm:$0xff]  ;;  %v5043_v41 = vld [vmem:[#allocation29_spill] sm:$0xff] }
 0x2c1   : > { %v1274_v63 = vadd.f32 %v4049_v37, %v5042_v54  ;;  %v1275_v49 = vadd.f32 %v4052_v21, %v5043_v41  ;;  %v5044_v37 = vld [vmem:[#allocation30_spill] sm:$0xff] }
 0x2c2   : > { %v1303_v28 = vmax.f32 %v1292_v59, %v1293_v51  ;;  %v5045_v51 = vld [vmem:[#allocation31_spill] sm:$0xff]  ;;  %v2971_v54 = vld [vmem:[%s4955_s2 + $0x1c0] sm:$0xf0] }
 0x2c4   : > { %v4271_v60 = vpack.c.bf16 %v1303_v28, %v1302_v6  ;;  %v1277_v28 = vadd.f32 %v4058_v25, %v5045_v51 }
 0x2c5   : > { %v1076_v56 = vpop.f32.mrf.mxu0  ;;  %v1151_v58 = vpop.f32.mrf.mxu1 }
 0x2c6   : > { %v1282_v14 = vadd.f32 %v1270_v34, %v1076_v56  ;;  %v1283_v33 = vadd.f32 %v1271_v18, %v1151_v58  ;;  %3039 = vmatmul.msk.bf16.vlgmr.msra.gmra.mxu2 %vm1878_vm3, %v4271_v60  ;;  %3045 = vmatmul.msk.bf16.vlgmr.msra.gmra.mxu3 %vm1878_vm3, %v4271_v60 }
 0x2c7   : > { %2758 = vmatmul.msk.bf16.gmra.mxu1 %vm370_vm1, %v3507_v61 }
 0x2c8   : > { %v1294_v38 = vmax.f32 %v4109_v30, %v1282_v14  ;;  %v1295_v22 = vmax.f32 %v4111_v31, %v1283_v33  ;;  %2744 = vmatmul.msk.bf16.gmra.mxu0 %vm370_vm1, %v3507_v61  ;;  %v1236_v30 = vadd.f32 %v3964_v3, %v4119_v7  ;;  %v1237_v31 = vadd.f32 %v3966_v4, %v4121_v48 }
 0x2c9   : > { %v1276_v48 = vadd.f32 %v4055_v27, %v5044_v37  ;;  %v3168_v37 = vld [vmem:[%s4955_s2 + $0x16c] sm:$0xf0] }
 0x2ca   : > { %v1304_v32 = vmax.f32 %v1294_v38, %v1295_v22 }
 0x2cd   : > { %v1078_v6 = vpop.f32.mrf.mxu0  ;;  %v1153_v44 = vpop.f32.mrf.mxu1 }
 0x2ce   : > { %v1284_v13 = vadd.f32 %v1272_v40, %v1078_v6  ;;  %v1285_v62 = vadd.f32 %v1273_v11, %v1153_v44  ;;  %v3011_v11 = vld [vmem:[%s4955_s2 + $0x210] sm:$0xf0]  ;;  %v3009_v6 = vld [vmem:[%s4955_s2 + $0x1e8] sm:$0xf] }
 0x2cf   : > { %v3014_v44 = vor.u32 %v3183_v10, %v3011_v11 }
 0x2d0   : > { %v1296_v8 = vmax.f32 %v1236_v30, %v1284_v13  ;;  %v1297_v57 = vmax.f32 %v1237_v31, %v1285_v62  ;;  %v3188_v30 = vld [vmem:[%s4955_s2 + $0x20c] sm:$0xf0] }
 0x2d1   : > { %v3010_v31 = vor.u32 %v3188_v30, %v3009_v6 }
 0x2d2   : > { %v1305_v61 = vmax.f32 %v1296_v8, %v1297_v57 }
 0x2d4   : > { %v4295_v0 = vpack.c.bf16 %v1305_v61, %v1304_v32  ;;  %v3173_v61 = vld [vmem:[%s4955_s2 + $0x19c] sm:$0xf] }
 0x2d5   : > { %v1081_v53 = vpop.f32.mrf.mxu0  ;;  %v1156_v9 = vpop.f32.mrf.mxu1 }
 0x2d6   : > { %v1286_v59 = vadd.f32 %v1274_v63, %v1081_v53  ;;  %v1287_v3 = vadd.f32 %v1275_v49, %v1156_v9  ;;  %3040 = vmatmul.msk.bf16.gmra.mxu2 %vm1878_vm3, %v4295_v0  ;;  %3046 = vmatmul.msk.bf16.gmra.mxu3 %vm1878_vm3, %v4295_v0  ;;  %v2969_v63 = vld [vmem:[%s4955_s2 + $0x198] sm:$0xf]  ;;  %v2974_v53 = vor.u32 %v3173_v61, %v2971_v54  ;;  %v3178_v9 = vld [vmem:[%s4955_s2 + $0x1bc] sm:$0xf0] }
 0x2d7   : > { %3081 = vmatmul.msk.bf16.vlgmr.msra.gmra.mxu1 %vm1878_vm3, %v4271_v60 }
 0x2d8   : > { %v1298_v4 = vmax.f32 %v4154_v35, %v1286_v59  ;;  %v1299_v7 = vmax.f32 %v4156_v5, %v1287_v3  ;;  %3075 = vmatmul.msk.bf16.vlgmr.msra.gmra.mxu0 %vm1878_vm3, %v4271_v60  ;;  %v1240_v35 = vadd.f32 %v3984_v15, %v4197_v46  ;;  %v1241_v5 = vadd.f32 %v3986_v16, %v4199_v23  ;;  %v1499_v15 = vld [vmem:[%s4955_s2 + $0x238] sm:$0xff] }
 0x2d9   : > { %v1721_v16 = vunpack.c.h.b16 %v1499_v15  ;;  %v1720_v25 = vunpack.c.l.b16 %v1499_v15  ;;  %v2970_v59 = vor.u32 %v3178_v9, %v2969_v63  ;;  %v1381_v15 = vadd.f32 %v3853_v55, %v3847_v52  ;;  %v3148_v52 = vld [vmem:[%s4955_s2 + $0xcc] sm:$0xf0] }
 0x2da   : > { %v1306_v21 = vmax.f32 %v1298_v4, %v1299_v7  ;;  %v2929_v7 = vld [vmem:[%s4955_s2 + $0x148] sm:$0xf] }
 0x2db   : > { %v1801_v46 = vpack.c.b16 %v1721_v16, %v1721_v16  ;;  %v1800_v23 = vpack.c.b16 %v1720_v25, %v1720_v25  ;;  %v3143_v16 = vld [vmem:[%s4955_s2 + $0xac] sm:$0xf]  ;;  %v2851_v25 = vld [vmem:[%s4955_s2 + $0xd0] sm:$0xf0] }
 0x2dd   : > { %v1083_v47 = vpop.f32.mrf.mxu0  ;;  %v1158_v34 = vpop.f32.mrf.mxu1  ;;  %v1908_v22 = vsel %vm1897_vm2, %v1801_v46, 0  ;;  %v1905_v32 = vsel %vm1897_vm2, %v1800_v23, 0  ;;  %v2849_v46 = vld [vmem:[%s4955_s2 + $0xa8] sm:$0xf] }
 0x2de   : > { %v1288_v24 = vadd.f32 %v1276_v48, %v1083_v47  ;;  %v1289_v18 = vadd.f32 %v1277_v28, %v1158_v34  ;;  %2033 = vmatpush.bf16.msrb.mxu3 %v1908_v22  ;;  %1998 = vmatpush.bf16.msrb.mxu2 %v1905_v32  ;;  %v2930_v48 = vor.u32 %v3168_v37, %v2929_v7 }
 0x2df   : > { %v2850_v11 = vor.u32 %v3148_v52, %v2849_v46  ;;  %v5054_v46 = vld [vmem:[#allocation37_spill] sm:$0xff] }
 0x2e0   : > { %v1300_v56 = vmax.f32 %v1240_v35, %v1288_v24  ;;  %v1301_v58 = vmax.f32 %v1241_v5, %v1289_v18  ;;  %v3153_v24 = vld [vmem:[%s4955_s2 + $0xfc] sm:$0xf]  ;;  %v2891_v18 = vld [vmem:[%s4955_s2 + $0x120] sm:$0xf0] }
 0x2e2   : > { %v1307_v14 = vmax.f32 %v1300_v56, %v1301_v58  ;;  %2034 = vmatpush.bf16.msrb.mxu3 %v3014_v44  ;;  %1999 = vmatpush.bf16.msrb.mxu2 %v3010_v31  ;;  %v2894_v56 = vor.u32 %v3153_v24, %v2891_v18  ;;  %v5047_v31 = vld [vmem:[#allocation33_spill] sm:$0xff] }
 0x2e4   : > { %v4319_v33 = vpack.c.bf16 %v1307_v14, %v1306_v21 }
 0x2e5   : > { %v1086_v38 = vpop.f32.mrf.mxu0  ;;  %v1161_v27 = vpop.f32.mrf.mxu1 }
 0x2e6   : > { %3041 = vmatmul.msk.bf16.gmra.mxu2 %vm1878_vm3, %v4319_v33  ;;  %3047 = vmatmul.msk.bf16.gmra.mxu3 %vm1878_vm3, %v4319_v33  ;;  %v1380_v27 = vadd.f32 %v3850_v12, %v3845_v50  ;;  %v2854_v50 = vor.u32 %v3143_v16, %v2851_v25  ;;  %v5053_v25 = vld [vmem:[#allocation35_spill] sm:$0xff] }
 0x2e7   : > { %3082 = vmatmul.msk.bf16.gmra.mxu1 %vm1878_vm3, %v4295_v0  ;;  %2035 = vmatpush.bf16.msrb.mxu3 %v2974_v53 }
 0x2e8   : > { %3076 = vmatmul.msk.bf16.gmra.mxu0 %vm1878_vm3, %v4295_v0  ;;  %2000 = vmatpush.bf16.msrb.mxu2 %v2970_v59 }
 0x2ec   : > { %2001 = vmatpush.bf16.msrb.mxu2 %v2930_v48  ;;  %v3138_v48 = vld [vmem:[%s4955_s2 + $0x7c] sm:$0xf0] }
 0x2ed   : > { %v1087_v20 = vpop.f32.mrf.mxu0  ;;  %v1162_v40 = vpop.f32.mrf.mxu1 }
 0x2ee   : > { %v1344_v23 = vadd.f32 %v3783_v36, %v1087_v20  ;;  %v1345_v12 = vadd.f32 %v3785_v19, %v1162_v40  ;;  %v1334_v36 = vadd.f32 %v3792_v2, %v3787_v26  ;;  %v5046_v20 = vld [vmem:[#allocation32_spill] sm:$0xff]  ;;  %v5049_v2 = vld [vmem:[#allocation42_spill] sm:$0xff] }
 0x2ef   : > { %v5050_v26 = vld [vmem:[#allocation44_spill] sm:$0xff] }
 0x2f0   : > { %v1385_v7 = vadd.f32 %v5050_v26, %v5049_v2 }
 0x2f5   : > { %v4346_v13 = vpop.f32.mrf.mxu0  ;;  %v4348_v62 = vpop.f32.mrf.mxu1 }
 0x2f6   : > { %v1346_v54 = vadd.f32 %v1334_v36, %v4346_v13  ;;  %v3133_v13 = vld [vmem:[%s4955_s2 + $0x5c] sm:$0xf]  ;;  %v5057_v36 = vld [vmem:[#allocation47_spill] sm:$0xff] }
 0x2f7   : > { %3083 = vmatmul.msk.bf16.gmra.mxu1 %vm1878_vm3, %v4319_v33 }
 0x2f8   : > { %3077 = vmatmul.msk.bf16.gmra.mxu0 %vm1878_vm3, %v4319_v33 }
 0x2fd   : > { %v1092_v8 = vpop.f32.mrf.mxu0  ;;  %v1167_v57 = vpop.f32.mrf.mxu1 }
 0x2fe   : > { %v4364_v41 = vadd.f32 %v3807_v45, %v1092_v8  ;;  %v4367_v49 = vadd.f32 %v3809_v43, %v1167_v57  ;;  %v3163_v45 = vld [vmem:[%s4955_s2 + $0x14c] sm:$0xf]  ;;  %v2931_v43 = vld [vmem:[%s4955_s2 + $0x170] sm:$0xf0]  ;;  %v1335_v8 = vadd.f32 %v5047_v31, %v5046_v20  ;;  %v5058_v20 = vld [vmem:[#allocation49_spill] sm:$0xff] }
 0x2ff   : > { %v2934_v21 = vor.u32 %v3163_v45, %v2931_v43  ;;  %v5048_v45 = vld [vmem:[#allocation43_spill] sm:$0xff]  ;;  %v1388_v31 = vadd.f32 %v5058_v20, %v5057_v36 }
 0x300   : > { %v1347_v19 = vadd.f32 %v1335_v8, %v4348_v62  ;;  %v1384_v43 = vadd.f32 %v5048_v45, %v3865_v17  ;;  %v5059_v8 = vld [vmem:[#allocation48_spill] sm:$0xff] }
 0x301   : > { %2036 = vmatpush.bf16.msrb.mxu3 %v2934_v21 }
 0x305   : > { %v4372_v3 = vpop.f32.mrf.mxu0  ;;  %v4374_v4 = vpop.f32.mrf.mxu1  ;;  %2037 = vmatpush.bf16.msrb.mxu3 %v2894_v56  ;;  %v3123_v56 = vld [vmem:[%s4955_s2 + $0xc] sm:$0xf] }
 0x309   : > { %2038 = vmatpush.bf16.msrb.mxu3 %v2854_v50 }
 0x30d   : > { %v1097_v51 = vpop.f32.mrf.mxu0  ;;  %v1172_v28 = vpop.f32.mrf.mxu1 }
 0x30e   : > { %v4389_v47 = vadd.f32 %v3827_v42, %v1097_v51  ;;  %v4392_v34 = vadd.f32 %v3829_v29, %v1172_v28  ;;  %v2889_v42 = vld [vmem:[%s4955_s2 + $0xf8] sm:$0xf]  ;;  %v3158_v29 = vld [vmem:[%s4955_s2 + $0x11c] sm:$0xf0] }
 0x30f   : > { %v2890_v58 = vor.u32 %v3158_v29, %v2889_v42  ;;  %v2771_v29 = vld [vmem:[%s4955_s2 + $0x30] sm:$0xf0] }
 0x311   : > { %2002 = vmatpush.bf16.msrb.mxu2 %v2890_v58  ;;  %v2769_v58 = vld [vmem:[%s4955_s2 + $0x8] sm:$0xf] }
 0x315   : > { %v4394_v35 = vpop.f32.mrf.mxu0  ;;  %v4396_v5 = vpop.f32.mrf.mxu1  ;;  %2003 = vmatpush.bf16.msrb.mxu2 %v2850_v11 }
 0x31d   : > { %v1102_v14 = vpop.f32.mrf.mxu0  ;;  %v1177_v38 = vpop.f32.mrf.mxu1 }
 0x31e   : > { %v2774_v38 = vor.u32 %v3123_v56, %v2771_v29  ;;  %v5066_v29 = vld [vmem:[#allocation52_spill] sm:$0xff] }
 0x325   : > { %v1104_v22 = vpop.f32.mrf.mxu0  ;;  %v1179_v32 = vpop.f32.mrf.mxu1 }
 0x326   : > { %v1392_v55 = vadd.f32 %v1380_v27, %v1104_v22  ;;  %v1393_v10 = vadd.f32 %v1381_v15, %v1179_v32  ;;  %v5051_v27 = vld [vmem:[#allocation34_spill] sm:$0xff]  ;;  %v5052_v15 = vld [vmem:[#allocation36_spill] sm:$0xff] }
 0x327   : > { %v1338_v16 = vadd.f32 %v5052_v15, %v5051_v27  ;;  %v3184_v27 = vld [vmem:[%s4955_s2 + $0x1f4] sm:$0xf] }
 0x328   : > { %v1404_v6 = vmax.f32 %v1344_v23, %v1392_v55  ;;  %v1405_v44 = vmax.f32 %v1345_v12, %v1393_v10  ;;  %v1339_v23 = vadd.f32 %v5054_v46, %v5053_v25  ;;  %v5055_v12 = vld [vmem:[#allocation45_spill] sm:$0xff]  ;;  %v5056_v10 = vld [vmem:[#allocation46_spill] sm:$0xff] }
 0x329   : > { %v1350_v50 = vadd.f32 %v1338_v16, %v4372_v3  ;;  %v3189_v25 = vld [vmem:[%s4955_s2 + $0x214] sm:$0xf0] }
 0x32a   : > { %v1416_v30 = vmax.f32 %v1404_v6, %v1405_v44  ;;  %v1351_v52 = vadd.f32 %v1339_v23, %v4374_v4  ;;  %v1500_v4 = vld [vmem:[%s4955_s2 + $0x240] sm:$0xff] }
 0x32d   : > { %v1106_v57 = vpop.f32.mrf.mxu0  ;;  %v1181_v61 = vpop.f32.mrf.mxu1 }
 0x32e   : > { %v1394_v40 = vadd.f32 %v3861_v1, %v1106_v57  ;;  %v1395_v63 = vadd.f32 %v3863_v39, %v1181_v61  ;;  %v2811_v1 = vld [vmem:[%s4955_s2 + $0x80] sm:$0xf0]  ;;  %v2809_v39 = vld [vmem:[%s4955_s2 + $0x58] sm:$0xf] }
 0x32f   : > { %v2814_v17 = vor.u32 %v3133_v13, %v2811_v1  ;;  %v2810_v24 = vor.u32 %v3138_v48, %v2809_v39  ;;  %v5060_v57 = vld [vmem:[#allocation50_spill] sm:$0xff]  ;;  %v5063_v48 = vld [vmem:[#allocation39_spill] sm:$0xff] }
 0x330   : > { %v1406_v53 = vmax.f32 %v1346_v54, %v1394_v40  ;;  %v1407_v9 = vmax.f32 %v1347_v19, %v1395_v63  ;;  %v1389_v61 = vadd.f32 %v5060_v57, %v5059_v8  ;;  %v3164_v8 = vld [vmem:[%s4955_s2 + $0x154] sm:$0xf]  ;;  %v2939_v57 = vld [vmem:[%s4955_s2 + $0x178] sm:$0xf0] }
 0x331   : > { %2039 = vmatpush.bf16.msrb.mxu3 %v2814_v17  ;;  %2004 = vmatpush.bf16.msrb.mxu2 %v2810_v24 }
 0x332   : > { %v1417_v59 = vmax.f32 %v1406_v53, %v1407_v9  ;;  %v1723_v53 = vunpack.c.h.b16 %v1500_v4  ;;  %v1722_v9 = vunpack.c.l.b16 %v1500_v4 }
 0x334   : > { %v4440_v21 = vpack.c.bf16 %v1417_v59, %v1416_v30  ;;  %v1803_v26 = vpack.c.b16 %v1723_v53, %v1723_v53 }
 0x335   : > { %v1109_v62 = vpop.f32.mrf.mxu0  ;;  %v1184_v37 = vpop.f32.mrf.mxu1  ;;  %2040 = vmatpush.bf16.msrb.mxu3 %v2774_v38 }
 0x336   : > { %v1396_v51 = vadd.f32 %v1384_v43, %v1109_v62  ;;  %v1397_v28 = vadd.f32 %v1385_v7, %v1184_v37  ;;  %3042 = vmatmul.msk.bf16.gmra.mxu2 %vm1878_vm3, %v4440_v21  ;;  %3048 = vmatmul.msk.bf16.gmra.mxu3 %vm1878_vm3, %v4440_v21  ;;  %v1802_v7 = vpack.c.b16 %v1722_v9, %v1722_v9  ;;  %v1914_v1 = vsel %vm1897_vm2, %v1803_v26, 0  ;;  %v5061_v62 = vld [vmem:[#allocation38_spill] sm:$0xff]  ;;  %v5062_v37 = vld [vmem:[#allocation40_spill] sm:$0xff] }
 0x337   : > { %3078 = vmatmul.msk.bf16.gmra.mxu0 %vm1878_vm3, %v4440_v21  ;;  %3084 = vmatmul.msk.bf16.gmra.mxu1 %vm1878_vm3, %v4440_v21  ;;  %v1342_v17 = vadd.f32 %v5062_v37, %v5061_v62  ;;  %v2897_v26 = vld [vmem:[%s4955_s2 + $0x100] sm:$0xf]  ;;  %v2857_v37 = vld [vmem:[%s4955_s2 + $0xb0] sm:$0xf] }
 0x338   : > { %v1408_v18 = vmax.f32 %v4364_v41, %v1396_v51  ;;  %v1409_v42 = vmax.f32 %v4367_v49, %v1397_v28  ;;  %v3128_v41 = vld [vmem:[%s4955_s2 + $0x2c] sm:$0xf0]  ;;  %v1911_v39 = vsel %vm1897_vm2, %v1802_v7, 0  ;;  %v5064_v51 = vld [vmem:[#allocation41_spill] sm:$0xff] }
 0x339   : > { %v2770_v49 = vor.u32 %v3128_v41, %v2769_v58  ;;  %v1343_v28 = vadd.f32 %v5064_v51, %v5063_v48  ;;  %2103 = vmatpush.bf16.msra.mxu3 %v1914_v1  ;;  %v1354_v24 = vadd.f32 %v1342_v17, %v4394_v35  ;;  %v3019_v35 = vld [vmem:[%s4955_s2 + $0x218] sm:$0xf0]  ;;  %v3144_v1 = vld [vmem:[%s4955_s2 + $0xb4] sm:$0xf]  ;;  %v3149_v17 = vld [vmem:[%s4955_s2 + $0xd4] sm:$0xf0] }
 0x33a   : > { %v1418_v14 = vmax.f32 %v1408_v18, %v1409_v42  ;;  %v5065_v42 = vld [vmem:[#allocation51_spill] sm:$0xff]  ;;  %v3022_v16 = vor.u32 %v3184_v27, %v3019_v35  ;;  %v2858_v51 = vor.u32 %v3149_v17, %v2857_v37  ;;  %v2779_v27 = vld [vmem:[%s4955_s2 + $0x38] sm:$0xf0] }
 0x33b   : > { %2005 = vmatpush.bf16.msrb.mxu2 %v2770_v49  ;;  %v1355_v18 = vadd.f32 %v1343_v28, %v4396_v5  ;;  %v3017_v5 = vld [vmem:[%s4955_s2 + $0x1f0] sm:$0xf]  ;;  %v3134_v28 = vld [vmem:[%s4955_s2 + $0x64] sm:$0xf] }
 0x33c   : > { %v3018_v46 = vor.u32 %v3189_v25, %v3017_v5  ;;  %v2777_v5 = vld [vmem:[%s4955_s2 + $0x10] sm:$0xf] }
 0x33d   : > { %v1111_v22 = vpop.f32.mrf.mxu0  ;;  %v1186_v32 = vpop.f32.mrf.mxu1  ;;  %2104 = vmatpush.bf16.msra.mxu3 %v3022_v16 }
 0x33e   : > { %v1398_v55 = vadd.f32 %v5055_v12, %v1111_v22  ;;  %v1399_v11 = vadd.f32 %v5056_v10, %v1186_v32  ;;  %v3174_v10 = vld [vmem:[%s4955_s2 + $0x1a4] sm:$0xf] }
 0x33f   : > { %2068 = vmatpush.bf16.msra.mxu2 %v1911_v39  ;;  %v2859_v39 = vld [vmem:[%s4955_s2 + $0xd8] sm:$0xf0] }
 0x340   : > { %v1410_v6 = vmax.f32 %v1350_v50, %v1398_v55  ;;  %v1411_v44 = vmax.f32 %v1351_v52, %v1399_v11  ;;  %v2979_v11 = vld [vmem:[%s4955_s2 + $0x1c8] sm:$0xf0]  ;;  %v2862_v48 = vor.u32 %v3144_v1, %v2859_v39  ;;  %v3181_v1 = vld [vmem:[%s4955_s2 + $0x1d4] sm:$0xf0] }
 0x342   : > { %v1419_v30 = vmax.f32 %v1410_v6, %v1411_v44  ;;  %v2977_v6 = vld [vmem:[%s4955_s2 + $0x1a0] sm:$0xf]  ;;  %v2982_v44 = vor.u32 %v3174_v10, %v2979_v11 }
 0x343   : > { %2069 = vmatpush.bf16.msra.mxu2 %v3018_v46 }
 0x344   : > { %v4488_v54 = vpack.c.bf16 %v1419_v30, %v1418_v14  ;;  %v3179_v30 = vld [vmem:[%s4955_s2 + $0x1c4] sm:$0xf0]  ;;  %2105 = vmatpush.bf16.msra.mxu3 %v2982_v44 }
 0x345   : > { %v1114_v19 = vpop.f32.mrf.mxu0  ;;  %v1189_v40 = vpop.f32.mrf.mxu1  ;;  %v2978_v36 = vor.u32 %v3179_v30, %v2977_v6 }
 0x346   : > { %v1400_v3 = vadd.f32 %v1388_v31, %v1114_v19  ;;  %v1401_v63 = vadd.f32 %v1389_v61, %v1189_v40  ;;  %3043 = vmatmul.msk.bf16.gmra.mxu2 %vm1878_vm3, %v4488_v54  ;;  %3049 = vmatmul.msk.bf16.gmra.mxu3 %vm1878_vm3, %v4488_v54  ;;  %v2937_v61 = vld [vmem:[%s4955_s2 + $0x150] sm:$0xf]  ;;  %v2942_v19 = vor.u32 %v3164_v8, %v2939_v57  ;;  %v3169_v40 = vld [vmem:[%s4955_s2 + $0x174] sm:$0xf0]  ;;  %v3035_v8 = vld [vmem:[%s4955_s2 + $0x228] sm:$0xf0] }
 0x347   : > { %3079 = vmatmul.msk.bf16.gmra.mxu0 %vm1878_vm3, %v4488_v54  ;;  %3085 = vmatmul.msk.bf16.gmra.mxu1 %vm1878_vm3, %v4488_v54 }
 0x348   : > { %v1412_v59 = vmax.f32 %v4389_v47, %v1400_v3  ;;  %v1413_v45 = vmax.f32 %v4392_v34, %v1401_v63  ;;  %2070 = vmatpush.bf16.msra.mxu2 %v2978_v36  ;;  %v2938_v3 = vor.u32 %v3169_v40, %v2937_v61  ;;  %2106 = vmatpush.bf16.msra.mxu3 %v2942_v19  ;;  %v3186_v36 = vld [vmem:[%s4955_s2 + $0x204] sm:$0xf]  ;;  %v3033_v40 = vld [vmem:[%s4955_s2 + $0x200] sm:$0xf] }
 0x349   : > { %v4503_v43 = vpop.f32.mrf.mxu2  ;;  %v4505_v2 = vpop.f32.mrf.mxu3  ;;  %v3038_v57 = vor.u32 %v3186_v36, %v3035_v8 }
 0x34a   : > { %v1420_v13 = vmax.f32 %v1412_v59, %v1413_v45  ;;  %v3154_v59 = vld [vmem:[%s4955_s2 + $0x104] sm:$0xf]  ;;  %v2899_v45 = vld [vmem:[%s4955_s2 + $0x128] sm:$0xf0] }
 0x34b   : > { %v2902_v7 = vor.u32 %v3154_v59, %v2899_v45  ;;  %v3176_v45 = vld [vmem:[%s4955_s2 + $0x1b4] sm:$0xf] }
 0x34c   : > { %2071 = vmatpush.bf16.msra.mxu2 %v2938_v3  ;;  %v3191_v3 = vld [vmem:[%s4955_s2 + $0x224] sm:$0xf0] }
 0x34d   : > { %v1116_v47 = vpop.f32.mrf.mxu0  ;;  %v1191_v34 = vpop.f32.mrf.mxu1  ;;  %2107 = vmatpush.bf16.msra.mxu3 %v2902_v7  ;;  %v2993_v7 = vld [vmem:[%s4955_s2 + $0x1b0] sm:$0xf] }
 0x34e   : > { %v1402_v56 = vadd.f32 %v5065_v42, %v1116_v47  ;;  %v1403_v58 = vadd.f32 %v5066_v29, %v1191_v34  ;;  %v2819_v47 = vld [vmem:[%s4955_s2 + $0x88] sm:$0xf0]  ;;  %v2817_v34 = vld [vmem:[%s4955_s2 + $0x60] sm:$0xf]  ;;  %v2994_v39 = vor.u32 %v3181_v1, %v2993_v7  ;;  %v3151_v7 = vld [vmem:[%s4955_s2 + $0xe4] sm:$0xf0] }
 0x350   : > { %v1414_v14 = vmax.f32 %v1354_v24, %v1402_v56  ;;  %v1415_v38 = vmax.f32 %v1355_v18, %v1403_v58  ;;  %v2822_v24 = vor.u32 %v3134_v28, %v2819_v47  ;;  %v3139_v18 = vld [vmem:[%s4955_s2 + $0x84] sm:$0xf0]  ;;  %v3166_v47 = vld [vmem:[%s4955_s2 + $0x164] sm:$0xf] }
 0x351   : > { %v4517_v41 = vpop.f32.mrf.mxu2  ;;  %v4519_v49 = vpop.f32.mrf.mxu3  ;;  %2108 = vmatpush.bf16.msra.mxu3 %v2862_v48  ;;  %v2818_v42 = vor.u32 %v3139_v18, %v2817_v34  ;;  %v2955_v34 = vld [vmem:[%s4955_s2 + $0x188] sm:$0xf0] }
 0x352   : > { %v1421_v15 = vmax.f32 %v1414_v14, %v1415_v38  ;;  %v3124_v38 = vld [vmem:[%s4955_s2 + $0x14] sm:$0xf]  ;;  %v2958_v18 = vor.u32 %v3166_v47, %v2955_v34  ;;  %v2835_v34 = vld [vmem:[%s4955_s2 + $0x98] sm:$0xf0] }
 0x353   : > { %v2782_v35 = vor.u32 %v3124_v38, %v2779_v27  ;;  %v3136_v47 = vld [vmem:[%s4955_s2 + $0x74] sm:$0xf] }
 0x354   : > { %v4533_v23 = vpack.c.bf16 %v1421_v15, %v1420_v13  ;;  %v3159_v13 = vld [vmem:[%s4955_s2 + $0x124] sm:$0xf0]  ;;  %v3129_v15 = vld [vmem:[%s4955_s2 + $0x34] sm:$0xf0] }
 0x355   : > { %v2147_v22 = vpop.f32.mrf.mxu0  ;;  %v2182_v32 = vpop.f32.mrf.mxu1  ;;  %v2898_v62 = vor.u32 %v3159_v13, %v2897_v26  ;;  %2109 = vmatpush.bf16.msra.mxu3 %v2822_v24  ;;  %v2778_v16 = vor.u32 %v3129_v15, %v2777_v5  ;;  %v2995_v26 = vld [vmem:[%s4955_s2 + $0x1d8] sm:$0xf0]  ;;  %v2953_v24 = vld [vmem:[%s4955_s2 + $0x160] sm:$0xf] }
 0x356   : > { %3044 = vmatmul.msk.bf16.gmra.mxu2 %vm1878_vm3, %v4533_v23  ;;  %3050 = vmatmul.msk.bf16.gmra.mxu3 %vm1878_vm3, %v4533_v23  ;;  %v1502_v22 = vld [vmem:[%s4955_s2 + $0x250] sm:$0xff]  ;;  %v2998_v13 = vor.u32 %v3176_v45, %v2995_v26  ;;  %v2873_v45 = vld [vmem:[%s4955_s2 + $0xc0] sm:$0xf] }
 0x357   : > { %3080 = vmatmul.msk.bf16.gmra.mxu0 %vm1878_vm3, %v4533_v23  ;;  %3086 = vmatmul.msk.bf16.gmra.mxu1 %vm1878_vm3, %v4533_v23  ;;  %v1727_v32 = vunpack.c.h.b16 %v1502_v22 }
 0x358   : > { %2072 = vmatpush.bf16.msra.mxu2 %v2898_v62 }
 0x359   : > { %v4543_v50 = vpop.f32.mrf.mxu2  ;;  %v4545_v52 = vpop.f32.mrf.mxu3  ;;  %2110 = vmatpush.bf16.msra.mxu3 %v2782_v35 }
 0x35c   : > { %2073 = vmatpush.bf16.msra.mxu2 %v2858_v51 }
 0x35d   : > { %v2148_v12 = vpop.f32.mrf.mxu0  ;;  %v2183_v55 = vpop.f32.mrf.mxu1 }
 0x35e   : > { %v1726_v12 = vunpack.c.l.b16 %v1502_v22  ;;  %v1807_v55 = vpack.c.b16 %v1727_v32, %v1727_v32  ;;  %v3156_v32 = vld [vmem:[%s4955_s2 + $0x114] sm:$0xf] }
 0x360   : > { %2074 = vmatpush.bf16.msra.mxu2 %v2818_v42  ;;  %v1806_v10 = vpack.c.b16 %v1726_v12, %v1726_v12  ;;  %v1926_v11 = vsel %vm1897_vm2, %v1807_v55, 0  ;;  %v3171_v42 = vld [vmem:[%s4955_s2 + $0x184] sm:$0xf0]  ;;  %v2915_v12 = vld [vmem:[%s4955_s2 + $0x138] sm:$0xf0] }
 0x361   : > { %v4559_v20 = vpop.f32.mrf.mxu2  ;;  %v4561_v31 = vpop.f32.mrf.mxu3  ;;  %v2954_v38 = vor.u32 %v3171_v42, %v2953_v24  ;;  %v2913_v55 = vld [vmem:[%s4955_s2 + $0x110] sm:$0xf]  ;;  %v3141_v42 = vld [vmem:[%s4955_s2 + $0x94] sm:$0xf0] }
 0x362   : > { %v1923_v6 = vsel %vm1897_vm2, %v1806_v10, 0  ;;  %v2918_v10 = vor.u32 %v3156_v32, %v2915_v12  ;;  %v2833_v24 = vld [vmem:[%s4955_s2 + $0x70] sm:$0xf] }
 0x364   : > { %2075 = vmatpush.bf16.msra.mxu2 %v2778_v16 }
 0x365   : > { %v4623_v56 = vpop.f32.mrf.mxu0  ;;  %v4625_v29 = vpop.f32.mrf.mxu1 }
 0x366   : > { %3051 = vmatmul.msk.bf16.vlgmr.msrb.gmra.mxu2 %vm1878_vm3, %v4271_v60  ;;  %3057 = vmatmul.msk.bf16.vlgmr.msrb.gmra.mxu3 %vm1878_vm3, %v4271_v60 }
 0x367   : > { %2243 = vmatpush.bf16.msrb.mxu3 %v1926_v11  ;;  %v3161_v11 = vld [vmem:[%s4955_s2 + $0x134] sm:$0xf0] }
 0x368   : > { %2208 = vmatpush.bf16.msrb.mxu2 %v1923_v6  ;;  %v2914_v6 = vor.u32 %v3161_v11, %v2913_v55 }
 0x369   : > { %v1947_v63 = vpop.f32.mrf.mxu2  ;;  %v1982_v4 = vpop.f32.mrf.mxu3 }
 0x36a   : > { %v3034_v63 = vor.u32 %v3191_v3, %v3033_v40  ;;  %v3146_v3 = vld [vmem:[%s4955_s2 + $0xc4] sm:$0xf] }
 0x36b   : > { %2244 = vmatpush.bf16.msrb.mxu3 %v3038_v57 }
 0x36c   : > { %2209 = vmatpush.bf16.msrb.mxu2 %v3034_v63  ;;  %v2875_v63 = vld [vmem:[%s4955_s2 + $0xe8] sm:$0xf0] }
 0x36d   : > { %v4631_v58 = vpop.f32.mrf.mxu0  ;;  %v4633_v14 = vpop.f32.mrf.mxu1  ;;  %v2878_v26 = vor.u32 %v3146_v3, %v2875_v63 }
 0x36f   : > { %2245 = vmatpush.bf16.msrb.mxu3 %v2998_v13  ;;  %v2874_v13 = vor.u32 %v3151_v7, %v2873_v45 }
 0x370   : > { %2210 = vmatpush.bf16.msrb.mxu2 %v2994_v39 }
 0x371   : > { %v1948_v53 = vpop.f32.mrf.mxu2  ;;  %v1983_v9 = vpop.f32.mrf.mxu3 }
 0x373   : > { %2246 = vmatpush.bf16.msrb.mxu3 %v2958_v18  ;;  %v2838_v18 = vor.u32 %v3136_v47, %v2835_v34 }
 0x374   : > { %2211 = vmatpush.bf16.msrb.mxu2 %v2954_v38  ;;  %v2834_v38 = vor.u32 %v3141_v42, %v2833_v24 }
 0x375   : > { %v4647_v25 = vpop.f32.mrf.mxu0  ;;  %v4649_v46 = vpop.f32.mrf.mxu1 }
 0x376   : > { %3052 = vmatmul.msk.bf16.gmra.mxu2 %vm1878_vm3, %v4295_v0  ;;  %3058 = vmatmul.msk.bf16.gmra.mxu3 %vm1878_vm3, %v4295_v0 }
 0x377   : > { %2247 = vmatpush.bf16.msrb.mxu3 %v2918_v10 }
 0x378   : > { %2212 = vmatpush.bf16.msrb.mxu2 %v2914_v6 }
 0x37b   : > { %2248 = vmatpush.bf16.msrb.mxu3 %v2878_v26 }
 0x37c   : > { %2213 = vmatpush.bf16.msrb.mxu2 %v2874_v13 }
 0x37d   : > { %v4660_v44 = vpop.f32.mrf.mxu0  ;;  %v4662_v30 = vpop.f32.mrf.mxu1 }
 0x37f   : > { %2249 = vmatpush.bf16.msrb.mxu3 %v2838_v18 }
 0x380   : > { %2214 = vmatpush.bf16.msrb.mxu2 %v2834_v38 }
 0x386   : > { %3053 = vmatmul.msk.bf16.gmra.mxu2 %vm1878_vm3, %v4319_v33  ;;  %3059 = vmatmul.msk.bf16.gmra.mxu3 %vm1878_vm3, %v4319_v33 }
 0x396   : > { %3054 = vmatmul.msk.bf16.gmra.mxu2 %vm1878_vm3, %v4440_v21  ;;  %3060 = vmatmul.msk.bf16.gmra.mxu3 %vm1878_vm3, %v4440_v21 }
 0x3a6   : > { %3055 = vmatmul.msk.bf16.gmra.mxu2 %vm1878_vm3, %v4488_v54  ;;  %3061 = vmatmul.msk.bf16.gmra.mxu3 %vm1878_vm3, %v4488_v54 }
 0x3b4   : > { %v2160_v61 = vpop.f32.mrf.mxu0  ;;  %v2195_v19 = vpop.f32.mrf.mxu1 }
 0x3b6   : > { %3056 = vmatmul.msk.bf16.gmra.mxu2 %vm1878_vm3, %v4533_v23  ;;  %3062 = vmatmul.msk.bf16.gmra.mxu3 %vm1878_vm3, %v4533_v23 }
 0x3b9   : > { %v4680_v4 = vpop.f32.mrf.mxu2  ;;  %v4682_v53 = vpop.f32.mrf.mxu3 }
 0x3bc   : > { %v4684_v9 = vpop.f32.mrf.mxu0  ;;  %v4686_v59 = vpop.f32.mrf.mxu1 }
 0x3c1   : > { %v4700_v62 = vpop.f32.mrf.mxu2  ;;  %v4702_v37 = vpop.f32.mrf.mxu3 }
 0x3c4   : > { %v4704_v17 = vpop.f32.mrf.mxu0  ;;  %v4706_v48 = vpop.f32.mrf.mxu1 }
 0x3c6   : > { %3063 = vmatmul.msk.bf16.vlgmr.msra.gmra.mxu2 %vm1878_vm3, %v4271_v60  ;;  %3069 = vmatmul.msk.bf16.vlgmr.msra.gmra.mxu3 %vm1878_vm3, %v4271_v60 }
 0x3c9   : > { %v4712_v51 = vpop.f32.mrf.mxu2  ;;  %v4714_v28 = vpop.f32.mrf.mxu3 }
 0x3cc   : > { %v4728_v27 = vpop.f32.mrf.mxu0  ;;  %v4730_v35 = vpop.f32.mrf.mxu1 }
 0x3d1   : > { %v4732_v5 = vpop.f32.mrf.mxu2  ;;  %v4734_v15 = vpop.f32.mrf.mxu3 }
 0x3d4   : > { %v4736_v16 = vpop.f32.mrf.mxu0  ;;  %v4738_v22 = vpop.f32.mrf.mxu1 }
 0x3d6   : > { %3064 = vmatmul.msk.bf16.gmra.mxu2 %vm1878_vm3, %v4295_v0  ;;  %3070 = vmatmul.msk.bf16.gmra.mxu3 %vm1878_vm3, %v4295_v0 }
 0x3d9   : > { %v1960_v36 = vpop.f32.mrf.mxu2  ;;  %v1995_v8 = vpop.f32.mrf.mxu3 }
 0x3dc   : > { %v2171_v57 = vpop.f32.mrf.mxu0  ;;  %v2206_v61 = vpop.f32.mrf.mxu1 }
 0x3dd   : > { %v2793_v57 = vld [vmem:[%s4955_s2 + $0x20] sm:$0xf] }
 0x3e1   : > { %v1961_v19 = vpop.f32.mrf.mxu2  ;;  %v1996_v40 = vpop.f32.mrf.mxu3 }
 0x3e6   : > { %3065 = vmatmul.msk.bf16.gmra.mxu2 %vm1878_vm3, %v4319_v33  ;;  %3071 = vmatmul.msk.bf16.gmra.mxu3 %vm1878_vm3, %v4319_v33 }
 0x3e9   : > { %v2007_v1 = vpop.f32.mrf.mxu2  ;;  %v2042_v39 = vpop.f32.mrf.mxu3 }
 0x3f1   : > { %v2008_v32 = vpop.f32.mrf.mxu2  ;;  %v2043_v12 = vpop.f32.mrf.mxu3 }
 0x3f2   : > { %v4785_v55 = vadd.f32 %v2008_v32, %v4680_v4  ;;  %v4788_v10 = vadd.f32 %v2043_v12, %v4682_v53  ;;  %v3126_v4 = vld [vmem:[%s4955_s2 + $0x24] sm:$0xf]  ;;  %v2795_v53 = vld [vmem:[%s4955_s2 + $0x48] sm:$0xf0] }
 0x3f3   : > { %v2798_v61 = vor.u32 %v3126_v4, %v2795_v53 }
 0x3f5   : > { %2250 = vmatpush.bf16.msrb.mxu3 %v2798_v61 }
 0x3f6   : > { %3066 = vmatmul.msk.bf16.gmra.mxu2 %vm1878_vm3, %v4440_v21  ;;  %3072 = vmatmul.msk.bf16.gmra.mxu3 %vm1878_vm3, %v4440_v21 }
 0x3f9   : > { %v2011_v11 = vpop.f32.mrf.mxu2  ;;  %v2046_v6 = vpop.f32.mrf.mxu3 }
 0x3fa   : > { %v4795_v36 = vadd.f32 %v2011_v11, %v4700_v62  ;;  %v4798_v8 = vadd.f32 %v2046_v6, %v4702_v37  ;;  %v3131_v62 = vld [vmem:[%s4955_s2 + $0x44] sm:$0xf0] }
 0x3fb   : > { %v2794_v19 = vor.u32 %v3131_v62, %v2793_v57 }
 0x3fd   : > { %2215 = vmatpush.bf16.msrb.mxu2 %v2794_v19 }
 0x401   : > { %v2013_v37 = vpop.f32.mrf.mxu2  ;;  %v2048_v40 = vpop.f32.mrf.mxu3 }
 0x402   : > { %v4813_v3 = vadd.f32 %v2013_v37, %v4712_v51  ;;  %v4816_v63 = vadd.f32 %v2048_v40, %v4714_v28 }
 0x406   : > { %3067 = vmatmul.msk.bf16.gmra.mxu2 %vm1878_vm3, %v4488_v54  ;;  %3073 = vmatmul.msk.bf16.gmra.mxu3 %vm1878_vm3, %v4488_v54 }
 0x409   : > { %v2016_v45 = vpop.f32.mrf.mxu2  ;;  %v2051_v26 = vpop.f32.mrf.mxu3 }
 0x40a   : > { %v4823_v7 = vadd.f32 %v2016_v45, %v4732_v5  ;;  %v4826_v13 = vadd.f32 %v2051_v26, %v4734_v15 }
 0x411   : > { %v2018_v1 = vpop.f32.mrf.mxu2  ;;  %v2053_v51 = vpop.f32.mrf.mxu3 }
 0x416   : > { %3068 = vmatmul.msk.bf16.gmra.mxu2 %vm1878_vm3, %v4533_v23  ;;  %3074 = vmatmul.msk.bf16.gmra.mxu3 %vm1878_vm3, %v4533_v23 }
 0x419   : > { %v2020_v28 = vpop.f32.mrf.mxu2  ;;  %v2055_v39 = vpop.f32.mrf.mxu3 }
 0x41a   : > { %v2278_v6 = vadd.f32 %v2020_v28, %v4503_v43  ;;  %v2279_v4 = vadd.f32 %v2055_v39, %v4505_v2 }
 0x421   : > { %v2022_v47 = vpop.f32.mrf.mxu2  ;;  %v2057_v34 = vpop.f32.mrf.mxu3 }
 0x422   : > { %v2280_v62 = vadd.f32 %v2022_v47, %v4517_v41 }
 0x426   : > { %3087 = vmatmul.msk.bf16.vlgmr.msrb.gmra.mxu2 %vm1878_vm3, %v4271_v60  ;;  %3093 = vmatmul.msk.bf16.vlgmr.msrb.gmra.mxu3 %vm1878_vm3, %v4271_v60 }
 0x429   : > { %v2025_v5 = vpop.f32.mrf.mxu2  ;;  %v2060_v15 = vpop.f32.mrf.mxu3 }
 0x42a   : > { %v2282_v2 = vadd.f32 %v2025_v5, %v4543_v50  ;;  %v2283_v45 = vadd.f32 %v2060_v15, %v4545_v52 }
 0x431   : > { %v2027_v24 = vpop.f32.mrf.mxu2  ;;  %v2062_v18 = vpop.f32.mrf.mxu3 }
 0x432   : > { %v2285_v41 = vadd.f32 %v2062_v18, %v4561_v31 }
 0x436   : > { %3088 = vmatmul.msk.bf16.gmra.mxu2 %vm1878_vm3, %v4295_v0  ;;  %3094 = vmatmul.msk.bf16.gmra.mxu3 %vm1878_vm3, %v4295_v0 }
 0x439   : > { %v2030_v42 = vpop.f32.mrf.mxu2  ;;  %v2065_v38 = vpop.f32.mrf.mxu3 }
 0x441   : > { %v2031_v32 = vpop.f32.mrf.mxu2  ;;  %v2066_v12 = vpop.f32.mrf.mxu3 }
 0x446   : > { %3089 = vmatmul.msk.bf16.gmra.mxu2 %vm1878_vm3, %v4319_v33  ;;  %3095 = vmatmul.msk.bf16.gmra.mxu3 %vm1878_vm3, %v4319_v33  ;;  %v2281_v33 = vadd.f32 %v2057_v34, %v4519_v49 }
 0x449   : > { %v2077_v60 = vpop.f32.mrf.mxu2  ;;  %v2112_v11 = vpop.f32.mrf.mxu3 }
 0x451   : > { %v2078_v53 = vpop.f32.mrf.mxu2  ;;  %v2113_v57 = vpop.f32.mrf.mxu3 }
 0x452   : > { %v2286_v61 = vadd.f32 %v2278_v6, %v2078_v53  ;;  %v2287_v0 = vadd.f32 %v2279_v4, %v2113_v57 }
 0x456   : > { %3090 = vmatmul.msk.bf16.gmra.mxu2 %vm1878_vm3, %v4440_v21  ;;  %3096 = vmatmul.msk.bf16.gmra.mxu3 %vm1878_vm3, %v4440_v21  ;;  %v2284_v21 = vadd.f32 %v2027_v24, %v4559_v20 }
 0x459   : > { %v2081_v19 = vpop.f32.mrf.mxu2  ;;  %v2116_v37 = vpop.f32.mrf.mxu3 }
 0x45a   : > { %v2288_v40 = vadd.f32 %v2280_v62, %v2081_v19  ;;  %v2289_v43 = vadd.f32 %v2281_v33, %v2116_v37  ;;  %v2295_v33 = vadd.f32 %v2287_v0, %v4686_v59 }
 0x461   : > { %v2083_v26 = vpop.f32.mrf.mxu2  ;;  %v2118_v1 = vpop.f32.mrf.mxu3 }
 0x462   : > { %v4854_v51 = vadd.f32 %v2282_v2, %v2083_v26  ;;  %v4856_v28 = vadd.f32 %v2283_v45, %v2118_v1  ;;  %v2296_v2 = vadd.f32 %v2288_v40, %v4704_v17 }
 0x464   : > { %v2298_v17 = vadd.f32 %v4854_v51, %v4728_v27 }
 0x466   : > { %3091 = vmatmul.msk.bf16.gmra.mxu2 %vm1878_vm3, %v4488_v54  ;;  %3097 = vmatmul.msk.bf16.gmra.mxu3 %vm1878_vm3, %v4488_v54 }
 0x469   : > { %v2086_v49 = vpop.f32.mrf.mxu2  ;;  %v2121_v50 = vpop.f32.mrf.mxu3 }
 0x46a   : > { %v4864_v39 = vadd.f32 %v2284_v21, %v2086_v49  ;;  %v4866_v52 = vadd.f32 %v2285_v41, %v2121_v50 }
 0x46c   : > { %v2300_v27 = vadd.f32 %v4864_v39, %v4736_v16 }
 0x471   : > { %v2088_v47 = vpop.f32.mrf.mxu2  ;;  %v2123_v34 = vpop.f32.mrf.mxu3 }
 0x476   : > { %3092 = vmatmul.msk.bf16.gmra.mxu2 %vm1878_vm3, %v4533_v23  ;;  %3098 = vmatmul.msk.bf16.gmra.mxu3 %vm1878_vm3, %v4533_v23 }
 0x479   : > { %v2090_v5 = vpop.f32.mrf.mxu2  ;;  %v2125_v54 = vpop.f32.mrf.mxu3 }
 0x481   : > { %v2091_v15 = vpop.f32.mrf.mxu2  ;;  %v2126_v20 = vpop.f32.mrf.mxu3 }
 0x482   : > { %v4873_v31 = vadd.f32 %v4785_v55, %v2091_v15  ;;  %v4876_v24 = vadd.f32 %v4788_v10, %v2126_v20 }
 0x489   : > { %v2094_v18 = vpop.f32.mrf.mxu2  ;;  %v2129_v42 = vpop.f32.mrf.mxu3 }
 0x48a   : > { %v4879_v38 = vadd.f32 %v4795_v36, %v2094_v18  ;;  %v4882_v32 = vadd.f32 %v4798_v8, %v2129_v42 }
 0x491   : > { %v2096_v23 = vpop.f32.mrf.mxu2  ;;  %v2131_v12 = vpop.f32.mrf.mxu3 }
 0x492   : > { %v4885_v60 = vadd.f32 %v4813_v3, %v2096_v23  ;;  %v4888_v55 = vadd.f32 %v4816_v63, %v2131_v12  ;;  %v2294_v63 = vadd.f32 %v2286_v61, %v4684_v9  ;;  %v2297_v9 = vadd.f32 %v2289_v43, %v4706_v48 }
 0x493   : > { %v2299_v48 = vadd.f32 %v4856_v28, %v4730_v35  ;;  %v2301_v35 = vadd.f32 %v4866_v52, %v4738_v22  ;;  %v2326_v22 = vadd.f32 %v4873_v31, %v4623_v56  ;;  %v2327_v52 = vadd.f32 %v4876_v24, %v4625_v29 }
 0x494   : > { %v2328_v56 = vadd.f32 %v4879_v38, %v4631_v58  ;;  %v2329_v29 = vadd.f32 %v4882_v32, %v4633_v14  ;;  %v2330_v58 = vadd.f32 %v4885_v60, %v4647_v25  ;;  %v2331_v14 = vadd.f32 %v4888_v55, %v4649_v46 }
 0x499   : > { %v2099_v11 = vpop.f32.mrf.mxu2  ;;  %v2134_v10 = vpop.f32.mrf.mxu3 }
 0x49a   : > { %v4891_v6 = vadd.f32 %v4823_v7, %v2099_v11  ;;  %v4894_v4 = vadd.f32 %v4826_v13, %v2134_v10 }
 0x49c   : > { %v2332_v25 = vadd.f32 %v4891_v6, %v4660_v44  ;;  %v2333_v46 = vadd.f32 %v4894_v4, %v4662_v30 }
 0x4a1   : > { %v2101_v36 = vpop.f32.mrf.mxu2  ;;  %v2136_v53 = vpop.f32.mrf.mxu3 }
 0x4a9   : > { %v2217_v8 = vpop.f32.mrf.mxu2  ;;  %v2252_v57 = vpop.f32.mrf.mxu3 }
 0x4b1   : > { %v2218_v62 = vpop.f32.mrf.mxu2  ;;  %v2253_v3 = vpop.f32.mrf.mxu3 }
 0x4b9   : > { %v2220_v7 = vpop.f32.mrf.mxu2  ;;  %v2255_v13 = vpop.f32.mrf.mxu3 }
 0x4ba   : > { %v2302_v19 = vadd.f32 %v2294_v63, %v2220_v7  ;;  %v2303_v37 = vadd.f32 %v2295_v33, %v2255_v13 }
 0x4bc   : > { %2342 = vst [vmem:[%s4902_s11] sm:$0xff] %v2302_v19  ;;  %v2384_v26 = vmul.f32 %v2302_v19, %v2302_v19  ;;  %v2385_v1 = vmul.f32 %v2303_v37, %v2303_v37 }
 0x4bd   : > { %2343 = vst [vmem:[%s4902_s11 + $0x8] sm:$0xff] %v2303_v37 }
 0x4c1   : > { %v2222_v59 = vpop.f32.mrf.mxu2  ;;  %v2257_v61 = vpop.f32.mrf.mxu3 }
 0x4c2   : > { %v2304_v0 = vadd.f32 %v2296_v2, %v2222_v59  ;;  %v2305_v45 = vadd.f32 %v2297_v9, %v2257_v61 }
 0x4c4   : > { %2344 = vst [vmem:[%s4902_s11 + $0x10] sm:$0xff] %v2304_v0  ;;  %v2358_v21 = vadd.f32 %v2304_v0, %v2302_v19  ;;  %v2386_v41 = vmul.f32 %v2304_v0, %v2304_v0  ;;  %v2371_v49 = vadd.f32 %v2305_v45, %v2303_v37  ;;  %v2387_v50 = vmul.f32 %v2305_v45, %v2305_v45 }
 0x4c5   : > { %2345 = vst [vmem:[%s4902_s11 + $0x18] sm:$0xff] %v2305_v45 }
 0x4c6   : > { %v2400_v47 = vadd.f32 %v2386_v41, %v2384_v26  ;;  %v2413_v34 = vadd.f32 %v2387_v50, %v2385_v1 }
 0x4c9   : > { %v2225_v40 = vpop.f32.mrf.mxu2  ;;  %v2260_v43 = vpop.f32.mrf.mxu3 }
 0x4ca   : > { %v2306_v5 = vadd.f32 %v2298_v17, %v2225_v40  ;;  %v2307_v54 = vadd.f32 %v2299_v48, %v2260_v43 }
 0x4cc   : > { %2346 = vst [vmem:[%s4902_s11 + $0x20] sm:$0xff] %v2306_v5  ;;  %v2359_v15 = vadd.f32 %v2358_v21, %v2306_v5  ;;  %v2388_v20 = vmul.f32 %v2306_v5, %v2306_v5  ;;  %v2372_v18 = vadd.f32 %v2371_v49, %v2307_v54  ;;  %v2389_v42 = vmul.f32 %v2307_v54, %v2307_v54 }
 0x4cd   : > { %2347 = vst [vmem:[%s4902_s11 + $0x28] sm:$0xff] %v2307_v54 }
 0x4ce   : > { %v2401_v23 = vadd.f32 %v2400_v47, %v2388_v20  ;;  %v2414_v12 = vadd.f32 %v2413_v34, %v2389_v42 }
 0x4d1   : > { %v2227_v51 = vpop.f32.mrf.mxu2  ;;  %v2262_v28 = vpop.f32.mrf.mxu3 }
 0x4d2   : > { %v2308_v11 = vadd.f32 %v2300_v27, %v2227_v51  ;;  %v2309_v10 = vadd.f32 %v2301_v35, %v2262_v28 }
 0x4d4   : > { %2348 = vst [vmem:[%s4902_s11 + $0x30] sm:$0xff] %v2308_v11  ;;  %v2360_v36 = vadd.f32 %v2359_v15, %v2308_v11  ;;  %v2390_v53 = vmul.f32 %v2308_v11, %v2308_v11  ;;  %v2373_v8 = vadd.f32 %v2372_v18, %v2309_v10  ;;  %v2391_v57 = vmul.f32 %v2309_v10, %v2309_v10 }
 0x4d5   : > { %2349 = vst [vmem:[%s4902_s11 + $0x38] sm:$0xff] %v2309_v10 }
 0x4d6   : > { %v2402_v62 = vadd.f32 %v2401_v23, %v2390_v53  ;;  %v2415_v3 = vadd.f32 %v2414_v12, %v2391_v57 }
 0x4d9   : > { %v2230_v63 = vpop.f32.mrf.mxu2  ;;  %v2265_v33 = vpop.f32.mrf.mxu3 }
 0x4e1   : > { %v2231_v16 = vpop.f32.mrf.mxu2  ;;  %v2266_v39 = vpop.f32.mrf.mxu3 }
 0x4e9   : > { %v2233_v7 = vpop.f32.mrf.mxu2  ;;  %v2268_v13 = vpop.f32.mrf.mxu3 }
 0x4ea   : > { %v2334_v19 = vadd.f32 %v2326_v22, %v2233_v7  ;;  %v2335_v37 = vadd.f32 %v2327_v52, %v2268_v13 }
 0x4ec   : > { %2350 = vst [vmem:[%s4902_s11 + $0x40] sm:$0xff] %v2334_v19  ;;  %v2361_v2 = vadd.f32 %v2360_v36, %v2334_v19  ;;  %v2392_v9 = vmul.f32 %v2334_v19, %v2334_v19  ;;  %v2374_v59 = vadd.f32 %v2373_v8, %v2335_v37  ;;  %v2393_v61 = vmul.f32 %v2335_v37, %v2335_v37 }
 0x4ed   : > { %2351 = vst [vmem:[%s4902_s11 + $0x48] sm:$0xff] %v2335_v37 }
 0x4ee   : > { %v2403_v0 = vadd.f32 %v2402_v62, %v2392_v9  ;;  %v2416_v45 = vadd.f32 %v2415_v3, %v2393_v61 }
 0x4f1   : > { %v2235_v31 = vpop.f32.mrf.mxu2  ;;  %v2270_v24 = vpop.f32.mrf.mxu3 }
 0x4f2   : > { %v2336_v26 = vadd.f32 %v2328_v56, %v2235_v31  ;;  %v2337_v1 = vadd.f32 %v2329_v29, %v2270_v24 }
 0x4f4   : > { %2352 = vst [vmem:[%s4902_s11 + $0x50] sm:$0xff] %v2336_v26  ;;  %v2362_v21 = vadd.f32 %v2361_v2, %v2336_v26  ;;  %v2394_v41 = vmul.f32 %v2336_v26, %v2336_v26  ;;  %v2375_v49 = vadd.f32 %v2374_v59, %v2337_v1  ;;  %v2395_v50 = vmul.f32 %v2337_v1, %v2337_v1 }
 0x4f5   : > { %2353 = vst [vmem:[%s4902_s11 + $0x58] sm:$0xff] %v2337_v1 }
 0x4f6   : > { %v2404_v47 = vadd.f32 %v2403_v0, %v2394_v41  ;;  %v2417_v34 = vadd.f32 %v2416_v45, %v2395_v50 }
 0x4f9   : > { %v2238_v38 = vpop.f32.mrf.mxu2  ;;  %v2273_v32 = vpop.f32.mrf.mxu3 }
 0x4fa   : > { %v2338_v17 = vadd.f32 %v2330_v58, %v2238_v38  ;;  %v2339_v48 = vadd.f32 %v2331_v14, %v2273_v32 }
 0x4fc   : > { %2354 = vst [vmem:[%s4902_s11 + $0x60] sm:$0xff] %v2338_v17  ;;  %v2363_v40 = vadd.f32 %v2362_v21, %v2338_v17  ;;  %v2396_v43 = vmul.f32 %v2338_v17, %v2338_v17  ;;  %v2376_v5 = vadd.f32 %v2375_v49, %v2339_v48  ;;  %v2397_v54 = vmul.f32 %v2339_v48, %v2339_v48 }
 0x4fd   : > { %2355 = vst [vmem:[%s4902_s11 + $0x68] sm:$0xff] %v2339_v48 }
 0x4fe   : > { %v2405_v15 = vadd.f32 %v2404_v47, %v2396_v43  ;;  %v2418_v20 = vadd.f32 %v2417_v34, %v2397_v54 }
 0x501   : > { %v2240_v60 = vpop.f32.mrf.mxu2  ;;  %v2275_v55 = vpop.f32.mrf.mxu3 }
 0x502   : > { %v2340_v18 = vadd.f32 %v2332_v25, %v2240_v60  ;;  %v2341_v42 = vadd.f32 %v2333_v46, %v2275_v55 }
 0x504   : > { %2356 = vst [vmem:[%s4902_s11 + $0x70] sm:$0xff] %v2340_v18  ;;  %v2364_v23 = vadd.f32 %v2363_v40, %v2340_v18  ;;  %v2398_v12 = vmul.f32 %v2340_v18, %v2340_v18  ;;  %v2377_v27 = vadd.f32 %v2376_v5, %v2341_v42  ;;  %v2399_v35 = vmul.f32 %v2341_v42, %v2341_v42 }
 0x505   : > { %2357 = vst [vmem:[%s4902_s11 + $0x78] sm:$0xff] %v2341_v42 }
 0x506   : > { %v2365_v51 = vrot.slane %v2364_v23, 4  ;;  %v2406_v28 = vadd.f32 %v2405_v15, %v2398_v12  ;;  %v2378_v11 = vrot.slane %v2377_v27, 4  ;;  %v2419_v10 = vadd.f32 %v2418_v20, %v2399_v35 }
 0x508   : > { %v2366_v44 = vadd.f32 %v2365_v51, %v2364_v23  ;;  %v2407_v6 = vrot.slane %v2406_v28, 4  ;;  %v2379_v36 = vadd.f32 %v2378_v11, %v2377_v27  ;;  %v2420_v53 = vrot.slane %v2419_v10, 4 }
 0x50a   : > { %v2367_v30 = vrot.slane %v2366_v44, 2  ;;  %v2408_v4 = vadd.f32 %v2407_v6, %v2406_v28  ;;  %v2380_v8 = vrot.slane %v2379_v36, 2  ;;  %v2421_v57 = vadd.f32 %v2420_v53, %v2419_v10 }
 0x50c   : > { %v2368_v62 = vadd.f32 %v2367_v30, %v2366_v44  ;;  %v2409_v3 = vrot.slane %v2408_v4, 2  ;;  %v2381_v63 = vadd.f32 %v2380_v8, %v2379_v36  ;;  %v2422_v33 = vrot.slane %v2421_v57, 2 }
 0x50e   : > { %v2369_v16 = vrot.slane %v2368_v62, 1  ;;  %v2410_v39 = vadd.f32 %v2409_v3, %v2408_v4  ;;  %v2382_v22 = vrot.slane %v2381_v63, 1  ;;  %v2423_v52 = vadd.f32 %v2422_v33, %v2421_v57 }
 0x510   : > { %v2411_v7 = vrot.slane %v2410_v39, 1  ;;  %v2424_v13 = vrot.slane %v2423_v52, 1  ;;  %v2370_v19 = vadd.f32 %v2369_v16, %v2368_v62  ;;  %v2383_v2 = vadd.f32 %v2382_v22, %v2381_v63 }
 0x512   : > { %v2412_v37 = vadd.f32 %v2411_v7, %v2410_v39  ;;  %v2425_v9 = vadd.f32 %v2424_v13, %v2423_v52 }
 0x514   : > { %v2427_v59 = vsel %vm2426_vm4, %v2370_v19, %v2412_v37  ;;  %v2428_v61 = vsel %vm2426_vm4, %v2383_v2, %v2425_v9 }
 0x515   : > { %v2431_v0 = vrot.slane %v2428_v61, 6 }
 0x517   : > { %v2433_v45 = vsel %vm2432_vm5, %v2427_v59, %v2431_v0 }
 0x518   : > { %2435 = vst [vmem:[%s215_s17] sm:$0xf] %v2433_v45 }
 0x519 PF: > { %s15_s15 = sadd.s32 1, %s3210_s15  }
 0x51a   : > { %p12_p6 = scmp.ge.s32.totalorder %s15_s15, 4  }
 0x51c   :  { %14 = sbr.rel (!%p12_p6) target bundleno = 1 (0x1), region = 74 }

</bundles_post_ra>
